<compile_context>
chip_gen: v6e
topology: v6e:2x2x1
jax: 0.10.0
libtpu: 0.0.40
codegen_flags: <defaults>
</compile_context>

<pallas_src>
import math
import numpy as np
import jax
import jax.numpy as jnp
from jax.experimental import pallas as pl
from jax.experimental.pallas import tpu as pltpu

# ---------------- hyper-params (small, consistent with the module) ----------
VOCAB = 50        # hp.vocab_size
D_MODEL = 32      # hp.d_model_d
N_LAYERS = 2      # hp.N_d
HEADS = 4         # hp.heads
D_FF = 64         # feed-forward hidden dim (synthetic; real default is 2048)
D_K = D_MODEL // HEADS
MAX_LEN = 64

# TODO(synk): hp.decoder_rel_pos=True path (RelativePositionalEncoder) not
# implemented; this script uses the absolute sinusoidal PositionalEncoder path.


# ---------------------------- fused Pallas kernel ----------------------------
def _fused_decoder_kernel(x_ref, e_ref, smask_ref, tmask_ref,
                          ln_ref,
                          swqkv_ref, sbqkv_ref, swo_ref, sbo_ref,
                          cwq_ref, cbq_ref, cwkv_ref, cbkv_ref, cwo_ref, cbo_ref,
                          w1_ref, b1_ref, w2_ref, b2_ref,
                          fg_ref, fb_ref,
                          out_ref, add_ref, ade_ref):
    """All N_LAYERS pre-norm decoder layers + final LayerNorm for B_blk batch elems."""
    Bb, L, D = x_ref.shape
    T = e_ref.shape[1]
    H, DK, HDK = HEADS, D_K, HEADS * D_K
    R = Bb * L
    scale = 1.0 / math.sqrt(DK)

    # activations flattened to rows (sublane-dense) -- resident in VMEM/vregs
    x = x_ref[...].reshape(R, D)                        # (R, D)
    e2d = e_ref[...].reshape(Bb * T, D)                 # (Bb*T, D)

    # hoisted additive mask biases, head-batched with leading (Bb*H) axis
    tbias = jnp.where(tmask_ref[...] == 0.0, -1e9, 0.0)            # (Bb, L, L)
    tbias = jnp.broadcast_to(tbias[:, None], (Bb, H, L, L)).reshape(Bb * H, L, L)
    sbias = jnp.where(smask_ref[...] == 0.0, -1e9, 0.0)            # (Bb, 1, T)
    sbias = jnp.broadcast_to(sbias[:, None], (Bb, H, L, T)).reshape(Bb * H, L, T)

    def layer_norm(v, g, b, eps):
        mu = jnp.mean(v, axis=-1, keepdims=True)
        var = jnp.mean(jnp.square(v - mu), axis=-1, keepdims=True)
        return (v - mu) * jax.lax.rsqrt(var + eps) * g + b

    def to_heads(y2d, rows):
        # (Bb*rows, H*DK) row-major -> (Bb*H, rows, DK) head-batched (leading batch)
        y3 = y2d.reshape(Bb, rows, HDK)
        parts = [y3[:, :, h * DK:(h + 1) * DK] for h in range(H)]  # (Bb, rows, DK)
        return jnp.stack(parts, axis=1).reshape(Bb * H, rows, DK)

    def from_heads(y3):
        # (Bb*H, L, DK) head-batched -> (Bb*L, H*DK) row-major (heads along lanes)
        y4 = y3.reshape(Bb, H, L, DK)
        parts = [y4[:, h] for h in range(H)]                       # (Bb, L, DK)
        return jnp.concatenate(parts, axis=-1).reshape(R, HDK)

    def attention(qh, kh, vh, bias, attn_ref, layer, lk):
        # single head-batched score matmul (leading batch dim = Bb*H)
        s = jnp.einsum("bqd,bkd->bqk", qh, kh,
                       preferred_element_type=jnp.float32) * scale + bias
        s = s - jnp.max(s, axis=-1, keepdims=True)
        p = jnp.exp(s)
        # exact normalization: attention maps are a user-visible output
        p = p / jnp.sum(p, axis=-1, keepdims=True)
        attn_ref[:, layer * H:(layer + 1) * H] = p.reshape(Bb, H, L, lk)
        ctx = jnp.einsum("bqk,bkd->bqd", p, vh,
                         preferred_element_type=jnp.float32)       # (Bb*H, L, DK)
        return from_heads(ctx)                                     # (R, H*DK)

    for layer in range(N_LAYERS):                       # static unroll (N small)
        # --- masked self-attention ---
        x2 = layer_norm(x, ln_ref[3 * layer + 0, 0], ln_ref[3 * layer + 0, 1], 1e-6)
        qkv = jnp.dot(x2, swqkv_ref[layer],
                      preferred_element_type=jnp.float32) + sbqkv_ref[layer]
        qh = to_heads(qkv[:, 0 * HDK:1 * HDK], L)
        kh = to_heads(qkv[:, 1 * HDK:2 * HDK], L)
        vh = to_heads(qkv[:, 2 * HDK:3 * HDK], L)
        ctx = attention(qh, kh, vh, tbias, add_ref, layer, L)
        x = x + jnp.dot(ctx, swo_ref[layer],
                        preferred_element_type=jnp.float32) + sbo_ref[layer]

        # --- encoder-decoder (cross) attention ---
        x2 = layer_norm(x, ln_ref[3 * layer + 1, 0], ln_ref[3 * layer + 1, 1], 1e-6)
        q = jnp.dot(x2, cwq_ref[layer],
                    preferred_element_type=jnp.float32) + cbq_ref[layer]
        kv = jnp.dot(e2d, cwkv_ref[layer],
                     preferred_element_type=jnp.float32) + cbkv_ref[layer]
        qh = to_heads(q, L)
        kh = to_heads(kv[:, 0:HDK], T)
        vh = to_heads(kv[:, HDK:2 * HDK], T)
        ctx = attention(qh, kh, vh, sbias, ade_ref, layer, T)
        x = x + jnp.dot(ctx, cwo_ref[layer],
                        preferred_element_type=jnp.float32) + cbo_ref[layer]

        # --- position-wise feed forward ---
        x2 = layer_norm(x, ln_ref[3 * layer + 2, 0], ln_ref[3 * layer + 2, 1], 1e-6)
        h1 = jnp.maximum(
            jnp.dot(x2, w1_ref[layer], preferred_element_type=jnp.float32)
            + b1_ref[layer], 0.0)
        x = x + jnp.dot(h1, w2_ref[layer],
                        preferred_element_type=jnp.float32) + b2_ref[layer]

    # final nn.LayerNorm (default eps=1e-5; per-layer Norm uses 1e-6 -- matches
    # the reference module and is intentional).
    out = layer_norm(x, fg_ref[...], fb_ref[...], 1e-5)
    out_ref[...] = out.reshape(Bb, L, D)


# ----------------------------- wrappers --------------------------------------
def _full_spec(shape):
    n = len(shape)
    return pl.BlockSpec(shape, lambda b, n=n: (0,) * n)


def _default_num_blocks(batch):
    """2 grid steps on dual-TensorCore chips (v7x) so 'parallel' shards the
    batch across both cores; one full-batch step on 1-TC chips (v5e/v6e) to
    amortize the fixed per-grid-step overhead."""
    try:
        kind = jax.devices()[0].device_kind.lower()
    except Exception:
        kind = ""
    if ("v7" in kind or "7x" in kind) and batch >= 2 and batch % 2 == 0:
        return 2
    return 1


def fused_decoder_forward(x, e_outputs, src_mask, trg_mask, packed, num_blocks):
    B, L, D = x.shape
    T = e_outputs.shape[1]
    N, H = N_LAYERS, HEADS
    assert B % num_blocks == 0
    Bb = B // num_blocks

    out_shape = (
        jax.ShapeDtypeStruct((B, L, D), jnp.float32),
        jax.ShapeDtypeStruct((B, N * H, L, L), jnp.float32),
        jax.ShapeDtypeStruct((B, N * H, L, T), jnp.float32),
    )
    grid_spec = pltpu.PrefetchScalarGridSpec(
        num_scalar_prefetch=0,
        grid=(num_blocks,),
        in_specs=[
            pl.BlockSpec((Bb, L, D), lambda b: (b, 0, 0)),      # x
            pl.BlockSpec((Bb, T, D), lambda b: (b, 0, 0)),      # e_outputs
            pl.BlockSpec((Bb, 1, T), lambda b: (b, 0, 0)),      # src_mask
            pl.BlockSpec((Bb, L, L), lambda b: (b, 0, 0)),      # trg_mask
            _full_spec(packed["ln"].shape),                     # (N*3, 2, D)
            _full_spec(packed["swqkv"].shape),                  # (N, D, 3*H*DK)
            _full_spec(packed["sbqkv"].shape),                  # (N, 1, 3*H*DK)
            _full_spec(packed["swo"].shape),                    # (N, H*DK, D)
            _full_spec(packed["sbo"].shape),                    # (N, 1, D)
            _full_spec(packed["cwq"].shape),                    # (N, D, H*DK)
            _full_spec(packed["cbq"].shape),                    # (N, 1, H*DK)
            _full_spec(packed["cwkv"].shape),                   # (N, D, 2*H*DK)
            _full_spec(packed["cbkv"].shape),                   # (N, 1, 2*H*DK)
            _full_spec(packed["cwo"].shape),                    # (N, H*DK, D)
            _full_spec(packed["cbo"].shape),                    # (N, 1, D)
            _full_spec(packed["w1"].shape),                     # (N, D, F)
            _full_spec(packed["b1"].shape),                     # (N, 1, F)
            _full_spec(packed["w2"].shape),                     # (N, F, D)
            _full_spec(packed["b2"].shape),                     # (N, 1, D)
            _full_spec(packed["fg"].shape),                     # (1, D)
            _full_spec(packed["fb"].shape),                     # (1, D)
        ],
        out_specs=[
            pl.BlockSpec((Bb, L, D), lambda b: (b, 0, 0)),
            pl.BlockSpec((Bb, N * H, L, L), lambda b: (b, 0, 0, 0)),
            pl.BlockSpec((Bb, N * H, L, T), lambda b: (b, 0, 0, 0)),
        ],
    )
    out, a_dd, a_de = pl.pallas_call(
        _fused_decoder_kernel,
        out_shape=out_shape,
        grid_spec=grid_spec,
        compiler_params=pltpu.CompilerParams(
            dimension_semantics=("parallel",),          # batch blocks independent
            vmem_limit_bytes=32 * 1024 * 1024),
    )(x, e_outputs, src_mask, trg_mask,
      packed["ln"],
      packed["swqkv"], packed["sbqkv"], packed["swo"], packed["sbo"],
      packed["cwq"], packed["cbq"], packed["cwkv"], packed["cbkv"],
      packed["cwo"], packed["cbo"],
      packed["w1"], packed["b1"], packed["w2"], packed["b2"],
      packed["fg"], packed["fb"])
    return (out,
            a_dd.reshape(B, N, H, L, L),
            a_de.reshape(B, N, H, L, T))


def pack_params(params):
    """Stack per-layer weights with a leading layer axis, using lane-dense
    layouts: fused (D, 3*H*DK) QKV weights, (H*DK, D) output projections."""
    def split_attn(w4, b4):
        # w4: (4, D, D) = [Wq, Wk, Wv, Wo] stored (in, out); b4: (4, D)
        wqkv = jnp.concatenate([w4[0], w4[1], w4[2]], axis=1)      # (D, 3D)
        bqkv = jnp.concatenate([b4[0], b4[1], b4[2]])[None, :]     # (1, 3D)
        wq, bq = w4[0], b4[0][None, :]                             # (D, D), (1, D)
        wkv = jnp.concatenate([w4[1], w4[2]], axis=1)              # (D, 2D)
        bkv = jnp.concatenate([b4[1], b4[2]])[None, :]             # (1, 2D)
        wo, bo = w4[3], b4[3][None, :]                             # (D, D), (1, D)
        return wqkv, bqkv, wq, bq, wkv, bkv, wo, bo

    ln = []
    s_wqkv, s_bqkv, s_wo, s_bo = [], [], [], []
    c_wq, c_bq, c_wkv, c_bkv, c_wo, c_bo = [], [], [], [], [], []
    w1, b1, w2, b2 = [], [], [], []
    for lp in params["layers"]:
        ln.append(lp["ln"])                                        # (3, 2, D)
        wqkv, bqkv, _, _, _, _, wo, bo = split_attn(lp["sw"], lp["sb"])
        s_wqkv.append(wqkv); s_bqkv.append(bqkv); s_wo.append(wo); s_bo.append(bo)
        _, _, wq, bq, wkv, bkv, wo, bo = split_attn(lp["cw"], lp["cb"])
        c_wq.append(wq); c_bq.append(bq); c_wkv.append(wkv); c_bkv.append(bkv)
        c_wo.append(wo); c_bo.append(bo)
        w1.append(lp["w1"]); b1.append(lp["b1"])
        w2.append(lp["w2"]); b2.append(lp["b2"])
    return dict(
        ln=jnp.concatenate(ln, axis=0),                            # (N*3, 2, D)
        swqkv=jnp.stack(s_wqkv), sbqkv=jnp.stack(s_bqkv),
        swo=jnp.stack(s_wo), sbo=jnp.stack(s_bo),
        cwq=jnp.stack(c_wq), cbq=jnp.stack(c_bq),
        cwkv=jnp.stack(c_wkv), cbkv=jnp.stack(c_bkv),
        cwo=jnp.stack(c_wo), cbo=jnp.stack(c_bo),
        w1=jnp.stack(w1), b1=jnp.stack(b1),
        w2=jnp.stack(w2), b2=jnp.stack(b2),
        fg=params["norm_g"], fb=params["norm_b"],
    )


def make_pe_table(max_len, d_model):
    pe = np.zeros((max_len, d_model), dtype=np.float32)
    pos = np.arange(max_len, dtype=np.float32)[:, None]
    div = np.exp(np.arange(0, d_model, 2, dtype=np.float32)
                 * -(math.log(10000.0) / d_model))
    pe[:, 0::2] = np.sin(pos * div)
    pe[:, 1::2] = np.cos(pos * div)
    return jnp.asarray(pe)


def diff_transformer_decoder(trg, e_outputs, src_mask, trg_mask, params,
                             num_blocks=None):
    """Forward pass. Returns (decoder_out, attns_dec_dec, attns_dec_enc)."""
    B, L = trg.shape
    if num_blocks is None:
        num_blocks = _default_num_blocks(B)
    # Embedder + PositionalEncoder (XLA glue: table gather + broadcast add;
    # dropout is identity in eval mode).
    x = params["embed"][trg] * math.sqrt(D_MODEL) + params["pe"][None, :L, :]
    x = x.astype(jnp.float32)
    packed = pack_params(params)
    return fused_decoder_forward(x, e_outputs, src_mask, trg_mask, packed,
                                 num_blocks)


# ------------------- pure-JAX reference (for verification) -------------------
def reference_forward(trg, e_outputs, src_mask, trg_mask, params):
    B, L = trg.shape
    x = params["embed"][trg] * math.sqrt(D_MODEL) + params["pe"][None, :L, :]

    def layer_norm(v, g, b, eps):
        mu = jnp.mean(v, axis=-1, keepdims=True)
        var = jnp.mean(jnp.square(v - mu), axis=-1, keepdims=True)
        return (v - mu) * jax.lax.rsqrt(var + eps) * g + b

    def mha(xq, xkv, mask, w4, b4):
        Bq, Lq, _ = xq.shape
        Lk = xkv.shape[1]
        q = xq @ w4[0] + b4[0]
        k = xkv @ w4[1] + b4[1]
        v = xkv @ w4[2] + b4[2]
        qh = q.reshape(Bq, Lq, HEADS, D_K).transpose(0, 2, 1, 3)
        kh = k.reshape(Bq, Lk, HEADS, D_K).transpose(0, 2, 1, 3)
        vh = v.reshape(Bq, Lk, HEADS, D_K).transpose(0, 2, 1, 3)
        s = jnp.einsum("bhqd,bhkd->bhqk", qh, kh) / math.sqrt(D_K)
        s = jnp.where(mask[:, None] == 0.0, -1e9, s)
        p = jax.nn.softmax(s, axis=-1)
        ctx = jnp.einsum("bhqk,bhkd->bhqd", p, vh)
        ctx = ctx.transpose(0, 2, 1, 3).reshape(Bq, Lq, D_MODEL)
        return ctx @ w4[3] + b4[3], p

    attns_dd, attns_de = [], []
    for lp in params["layers"]:
        x2 = layer_norm(x, lp["ln"][0, 0], lp["ln"][0, 1], 1e-6)
        a, p_dd = mha(x2, x2, trg_mask, lp["sw"], lp["sb"])
        x = x + a
        x2 = layer_norm(x, lp["ln"][1, 0], lp["ln"][1, 1], 1e-6)
        a, p_de = mha(x2, e_outputs, src_mask, lp["cw"], lp["cb"])
        x = x + a
        x2 = layer_norm(x, lp["ln"][2, 0], lp["ln"][2, 1], 1e-6)
        h1 = jnp.maximum(x2 @ lp["w1"] + lp["b1"], 0.0)
        x = x + h1 @ lp["w2"] + lp["b2"]
        attns_dd.append(p_dd)
        attns_de.append(p_de)
    out = layer_norm(x, params["norm_g"][0], params["norm_b"][0], 1e-5)
    return out, jnp.stack(attns_dd, 1), jnp.stack(attns_de, 1)


# ------------------------- deterministic params ------------------------------
def init_params(key):
    keys = jax.random.split(key, 1 + N_LAYERS)
    params = {
        "embed": jax.random.normal(keys[0], (VOCAB, D_MODEL), jnp.float32) * 0.1,
        "pe": make_pe_table(MAX_LEN, D_MODEL),
        "norm_g": jnp.ones((1, D_MODEL), jnp.float32),
        "norm_b": jnp.zeros((1, D_MODEL), jnp.float32),
        "layers": [],
    }
    ln = jnp.stack([jnp.stack([jnp.ones(D_MODEL, jnp.float32),
                               jnp.zeros(D_MODEL, jnp.float32)])] * 3)  # (3,2,D)
    for i in range(N_LAYERS):
        kk = jax.random.split(keys[1 + i], 4)
        params["layers"].append(dict(
            ln=ln,
            sw=jax.random.normal(kk[0], (4, D_MODEL, D_MODEL), jnp.float32) * 0.05,
            sb=jnp.zeros((4, D_MODEL), jnp.float32),
            cw=jax.random.normal(kk[1], (4, D_MODEL, D_MODEL), jnp.float32) * 0.05,
            cb=jnp.zeros((4, D_MODEL), jnp.float32),
            w1=jax.random.normal(kk[2], (D_MODEL, D_FF), jnp.float32) * 0.05,
            b1=jnp.zeros((1, D_FF), jnp.float32),
            w2=jax.random.normal(kk[3], (D_FF, D_MODEL), jnp.float32) * 0.05,
            b2=jnp.zeros((1, D_MODEL), jnp.float32),
        ))
    return params


# --------------------------------- main ---------------------------------------
if __name__ == "__main__":
    B, L, T = 2, 8, 16   # batch, target length, encoder (source) length

    root = jax.random.PRNGKey(0)
    k_param, k_trg, k_enc = jax.random.split(root, 3)

    params = init_params(k_param)

    trg = jax.random.randint(k_trg, (B, L), 0, VOCAB, dtype=jnp.int32)
    e_outputs = jax.random.normal(k_enc, (B, T, D_MODEL), jnp.float32)
    src_mask = jnp.ones((B, 1, T), jnp.float32)                        # all visible
    trg_mask = jnp.broadcast_to(jnp.tril(jnp.ones((L, L), jnp.float32)),
                                (B, L, L))                             # causal

    fwd = jax.jit(diff_transformer_decoder)
    out, attns_dd, attns_de = jax.block_until_ready(
        fwd(trg, e_outputs, src_mask, trg_mask, params))

    assert out.shape == (B, L, D_MODEL)
    assert attns_dd.shape == (B, N_LAYERS, HEADS, L, L)
    assert attns_de.shape == (B, N_LAYERS, HEADS, L, T)
    assert bool(jnp.all(jnp.isfinite(out)))
    # attention rows sum to 1 (exact softmax normalization in the kernel)
    assert bool(jnp.allclose(jnp.sum(attns_dd, axis=-1), 1.0, atol=1e-3))
    assert bool(jnp.allclose(jnp.sum(attns_de, axis=-1), 1.0, atol=1e-3))

    # cross-check against a plain-XLA reference of the same module
    ref_out, ref_dd, ref_de = reference_forward(
        trg, e_outputs, src_mask, trg_mask, params)
    assert bool(jnp.allclose(out, ref_out, atol=1e-3, rtol=1e-3))
    assert bool(jnp.allclose(attns_dd, ref_dd, atol=1e-3))
    assert bool(jnp.allclose(attns_de, ref_de, atol=1e-3))

    print("KERNEL_OK")
</pallas_src>

<mosaic_0001>
module attributes {stable_mosaic.version = 11 : i64} {
  func.func @_fused_decoder_kernel(%arg0: i32, %arg1: memref<2x8x32xf32, #tpu.memory_space<vmem>>, %arg2: memref<2x16x32xf32, #tpu.memory_space<vmem>>, %arg3: memref<2x1x16xf32, #tpu.memory_space<vmem>>, %arg4: memref<2x8x8xf32, #tpu.memory_space<vmem>>, %arg5: memref<6x2x32xf32, #tpu.memory_space<vmem>>, %arg6: memref<2x32x96xf32, #tpu.memory_space<vmem>>, %arg7: memref<2x1x96xf32, #tpu.memory_space<vmem>>, %arg8: memref<2x32x32xf32, #tpu.memory_space<vmem>>, %arg9: memref<2x1x32xf32, #tpu.memory_space<vmem>>, %arg10: memref<2x32x32xf32, #tpu.memory_space<vmem>>, %arg11: memref<2x1x32xf32, #tpu.memory_space<vmem>>, %arg12: memref<2x32x64xf32, #tpu.memory_space<vmem>>, %arg13: memref<2x1x64xf32, #tpu.memory_space<vmem>>, %arg14: memref<2x32x32xf32, #tpu.memory_space<vmem>>, %arg15: memref<2x1x32xf32, #tpu.memory_space<vmem>>, %arg16: memref<2x32x64xf32, #tpu.memory_space<vmem>>, %arg17: memref<2x1x64xf32, #tpu.memory_space<vmem>>, %arg18: memref<2x64x32xf32, #tpu.memory_space<vmem>>, %arg19: memref<2x1x32xf32, #tpu.memory_space<vmem>>, %arg20: memref<1x32xf32, #tpu.memory_space<vmem>>, %arg21: memref<1x32xf32, #tpu.memory_space<vmem>>, %arg22: memref<2x8x32xf32, #tpu.memory_space<vmem>>, %arg23: memref<2x8x8x8xf32, #tpu.memory_space<vmem>>, %arg24: memref<2x8x8x16xf32, #tpu.memory_space<vmem>>) attributes {dimension_semantics = [#tpu.dimension_semantics<parallel>], iteration_bounds = array<i64: 1>, scalar_prefetch = 0 : i64, scratch_operands = 0 : i64, tpu.core_type = #tpu.core_type<tc>, window_params = [{transform_indices = @transform_0, window_bounds = array<i64: 2, 8, 32>}, {transform_indices = @transform_1, window_bounds = array<i64: 2, 16, 32>}, {transform_indices = @transform_2, window_bounds = array<i64: 2, 1, 16>}, {transform_indices = @transform_3, window_bounds = array<i64: 2, 8, 8>}, {pipeline_mode = #tpu.pipeline_mode<synchronous>, transform_indices = @transform_4, window_bounds = array<i64: 6, 2, 32>}, {pipeline_mode = #tpu.pipeline_mode<synchronous>, transform_indices = @transform_5, window_bounds = array<i64: 2, 32, 96>}, {pipeline_mode = #tpu.pipeline_mode<synchronous>, transform_indices = @transform_6, window_bounds = array<i64: 2, 1, 96>}, {pipeline_mode = #tpu.pipeline_mode<synchronous>, transform_indices = @transform_7, window_bounds = array<i64: 2, 32, 32>}, {pipeline_mode = #tpu.pipeline_mode<synchronous>, transform_indices = @transform_8, window_bounds = array<i64: 2, 1, 32>}, {pipeline_mode = #tpu.pipeline_mode<synchronous>, transform_indices = @transform_9, window_bounds = array<i64: 2, 32, 32>}, {pipeline_mode = #tpu.pipeline_mode<synchronous>, transform_indices = @transform_10, window_bounds = array<i64: 2, 1, 32>}, {pipeline_mode = #tpu.pipeline_mode<synchronous>, transform_indices = @transform_11, window_bounds = array<i64: 2, 32, 64>}, {pipeline_mode = #tpu.pipeline_mode<synchronous>, transform_indices = @transform_12, window_bounds = array<i64: 2, 1, 64>}, {pipeline_mode = #tpu.pipeline_mode<synchronous>, transform_indices = @transform_13, window_bounds = array<i64: 2, 32, 32>}, {pipeline_mode = #tpu.pipeline_mode<synchronous>, transform_indices = @transform_14, window_bounds = array<i64: 2, 1, 32>}, {pipeline_mode = #tpu.pipeline_mode<synchronous>, transform_indices = @transform_15, window_bounds = array<i64: 2, 32, 64>}, {pipeline_mode = #tpu.pipeline_mode<synchronous>, transform_indices = @transform_16, window_bounds = array<i64: 2, 1, 64>}, {pipeline_mode = #tpu.pipeline_mode<synchronous>, transform_indices = @transform_17, window_bounds = array<i64: 2, 64, 32>}, {pipeline_mode = #tpu.pipeline_mode<synchronous>, transform_indices = @transform_18, window_bounds = array<i64: 2, 1, 32>}, {pipeline_mode = #tpu.pipeline_mode<synchronous>, transform_indices = @transform_19, window_bounds = array<i64: 1, 32>}, {pipeline_mode = #tpu.pipeline_mode<synchronous>, transform_indices = @transform_20, window_bounds = array<i64: 1, 32>}, {transform_indices = @transform_21, window_bounds = array<i64: 2, 8, 32>}, {transform_indices = @transform_22, window_bounds = array<i64: 2, 8, 8, 8>}, {transform_indices = @transform_23, window_bounds = array<i64: 2, 8, 8, 16>}]} {
    %c0 = arith.constant 0 : index
    %c0_0 = arith.constant 0 : index
    %c0_1 = arith.constant 0 : index
    %0 = vector.load %arg1[%c0, %c0_0, %c0_1] : memref<2x8x32xf32, #tpu.memory_space<vmem>>, vector<2x8x32xf32>
    %1 = vector.shape_cast %0 : vector<2x8x32xf32> to vector<16x32xf32>
    %c0_2 = arith.constant 0 : index
    %c0_3 = arith.constant 0 : index
    %c0_4 = arith.constant 0 : index
    %2 = vector.load %arg2[%c0_2, %c0_3, %c0_4] : memref<2x16x32xf32, #tpu.memory_space<vmem>>, vector<2x16x32xf32>
    %3 = vector.shape_cast %2 : vector<2x16x32xf32> to vector<32x32xf32>
    %c0_5 = arith.constant 0 : index
    %c0_6 = arith.constant 0 : index
    %c0_7 = arith.constant 0 : index
    %4 = vector.load %arg4[%c0_5, %c0_6, %c0_7] : memref<2x8x8xf32, #tpu.memory_space<vmem>>, vector<2x8x8xf32>
    %cst = arith.constant 0.000000e+00 : f32
    %5 = vector.broadcast %cst : f32 to vector<2x8x8xf32>
    %6 = arith.cmpf oeq, %4, %5 : vector<2x8x8xf32>
    %cst_8 = arith.constant -1.000000e+09 : f32
    %cst_9 = arith.constant 0.000000e+00 : f32
    %7 = vector.broadcast %cst_8 : f32 to vector<2x8x8xf32>
    %8 = vector.broadcast %cst_9 : f32 to vector<2x8x8xf32>
    %9 = arith.select %6, %7, %8 : vector<2x8x8xi1>, vector<2x8x8xf32>
    %10 = vector.shape_cast %9 : vector<2x8x8xf32> to vector<2x1x8x8xf32>
    %11 = vector.shape_cast %10 : vector<2x1x8x8xf32> to vector<2x1x8x8xf32>
    %12 = vector.broadcast %11 : vector<2x1x8x8xf32> to vector<2x4x8x8xf32>
    %13 = vector.shape_cast %12 : vector<2x4x8x8xf32> to vector<8x8x8xf32>
    %c0_10 = arith.constant 0 : index
    %c0_11 = arith.constant 0 : index
    %c0_12 = arith.constant 0 : index
    %14 = vector.load %arg3[%c0_10, %c0_11, %c0_12] : memref<2x1x16xf32, #tpu.memory_space<vmem>>, vector<2x1x16xf32>
    %cst_13 = arith.constant 0.000000e+00 : f32
    %15 = vector.broadcast %cst_13 : f32 to vector<2x1x16xf32>
    %16 = arith.cmpf oeq, %14, %15 : vector<2x1x16xf32>
    %cst_14 = arith.constant -1.000000e+09 : f32
    %cst_15 = arith.constant 0.000000e+00 : f32
    %17 = vector.broadcast %cst_14 : f32 to vector<2x1x16xf32>
    %18 = vector.broadcast %cst_15 : f32 to vector<2x1x16xf32>
    %19 = arith.select %16, %17, %18 : vector<2x1x16xi1>, vector<2x1x16xf32>
    %20 = vector.shape_cast %19 : vector<2x1x16xf32> to vector<2x1x1x16xf32>
    %21 = vector.shape_cast %20 : vector<2x1x1x16xf32> to vector<2x1x1x16xf32>
    %22 = vector.broadcast %21 : vector<2x1x1x16xf32> to vector<2x4x8x16xf32>
    %23 = vector.shape_cast %22 : vector<2x4x8x16xf32> to vector<8x8x16xf32>
    %c0_16 = arith.constant 0 : index
    %c0_17 = arith.constant 0 : index
    %c0_18 = arith.constant 0 : index
    %24 = vector.load %arg5[%c0_16, %c0_17, %c0_18] : memref<6x2x32xf32, #tpu.memory_space<vmem>>, vector<1x1x32xf32>
    %25 = vector.shape_cast %24 : vector<1x1x32xf32> to vector<32xf32>
    %c0_19 = arith.constant 0 : index
    %c1 = arith.constant 1 : index
    %c0_20 = arith.constant 0 : index
    %26 = vector.load %arg5[%c0_19, %c1, %c0_20] : memref<6x2x32xf32, #tpu.memory_space<vmem>>, vector<1x1x32xf32>
    %27 = vector.shape_cast %26 : vector<1x1x32xf32> to vector<32xf32>
    %cst_21 = arith.constant dense<0.000000e+00> : vector<16xf32>
    %28 = vector.multi_reduction <add>, %1, %cst_21 [1] : vector<16x32xf32> to vector<16xf32>
    %29 = vector.shape_cast %28 : vector<16xf32> to vector<16x1xf32>
    %cst_22 = arith.constant 3.200000e+01 : f32
    %30 = vector.broadcast %cst_22 : f32 to vector<16x1xf32>
    %31 = arith.divf %29, %30 : vector<16x1xf32>
    %32 = vector.broadcast %31 : vector<16x1xf32> to vector<16x32xf32>
    %33 = arith.subf %1, %32 : vector<16x32xf32>
    %34 = arith.mulf %33, %33 : vector<16x32xf32>
    %cst_23 = arith.constant dense<0.000000e+00> : vector<16xf32>
    %35 = vector.multi_reduction <add>, %34, %cst_23 [1] : vector<16x32xf32> to vector<16xf32>
    %36 = vector.shape_cast %35 : vector<16xf32> to vector<16x1xf32>
    %cst_24 = arith.constant 3.200000e+01 : f32
    %37 = vector.broadcast %cst_24 : f32 to vector<16x1xf32>
    %38 = arith.divf %36, %37 : vector<16x1xf32>
    %39 = vector.broadcast %31 : vector<16x1xf32> to vector<16x32xf32>
    %40 = arith.subf %1, %39 : vector<16x32xf32>
    %cst_25 = arith.constant 9.99999997E-7 : f32
    %41 = vector.broadcast %cst_25 : f32 to vector<16x1xf32>
    %42 = arith.addf %38, %41 : vector<16x1xf32>
    %43 = math.rsqrt %42 : vector<16x1xf32>
    %44 = vector.broadcast %43 : vector<16x1xf32> to vector<16x32xf32>
    %45 = arith.mulf %40, %44 : vector<16x32xf32>
    %46 = vector.shape_cast %25 : vector<32xf32> to vector<1x32xf32>
    %47 = vector.broadcast %46 : vector<1x32xf32> to vector<16x32xf32>
    %48 = arith.mulf %45, %47 : vector<16x32xf32>
    %49 = vector.shape_cast %27 : vector<32xf32> to vector<1x32xf32>
    %50 = vector.broadcast %49 : vector<1x32xf32> to vector<16x32xf32>
    %51 = arith.addf %48, %50 : vector<16x32xf32>
    %c0_26 = arith.constant 0 : index
    %c0_27 = arith.constant 0 : index
    %c0_28 = arith.constant 0 : index
    %52 = vector.load %arg6[%c0_26, %c0_27, %c0_28] : memref<2x32x96xf32, #tpu.memory_space<vmem>>, vector<1x32x96xf32>
    %53 = vector.shape_cast %52 : vector<1x32x96xf32> to vector<32x96xf32>
    %cst_29 = arith.constant dense<0.000000e+00> : vector<16x96xf32>
    %54 = tpu.matmul %51, %53, %cst_29 {dimension_numbers = #tpu.dot_dimension_numbers<[1], [0], [0], [1], [0, 0, 1, 1], [], []>} : vector<16x32xf32>, vector<32x96xf32>, vector<16x96xf32> -> vector<16x96xf32>
    %c0_30 = arith.constant 0 : index
    %c0_31 = arith.constant 0 : index
    %c0_32 = arith.constant 0 : index
    %55 = vector.load %arg7[%c0_30, %c0_31, %c0_32] : memref<2x1x96xf32, #tpu.memory_space<vmem>>, vector<1x1x96xf32>
    %56 = vector.shape_cast %55 : vector<1x1x96xf32> to vector<1x96xf32>
    %57 = vector.broadcast %56 : vector<1x96xf32> to vector<16x96xf32>
    %58 = arith.addf %54, %57 : vector<16x96xf32>
    %59 = vector.extract_strided_slice %58 {offsets = [0, 0], sizes = [16, 32], strides = [1, 1]} : vector<16x96xf32> to vector<16x32xf32>
    %60 = vector.shape_cast %59 : vector<16x32xf32> to vector<2x8x32xf32>
    %61 = vector.extract_strided_slice %60 {offsets = [0, 0, 0], sizes = [2, 8, 8], strides = [1, 1, 1]} : vector<2x8x32xf32> to vector<2x8x8xf32>
    %62 = vector.extract_strided_slice %60 {offsets = [0, 0, 8], sizes = [2, 8, 8], strides = [1, 1, 1]} : vector<2x8x32xf32> to vector<2x8x8xf32>
    %63 = vector.extract_strided_slice %60 {offsets = [0, 0, 16], sizes = [2, 8, 8], strides = [1, 1, 1]} : vector<2x8x32xf32> to vector<2x8x8xf32>
    %64 = vector.extract_strided_slice %60 {offsets = [0, 0, 24], sizes = [2, 8, 8], strides = [1, 1, 1]} : vector<2x8x32xf32> to vector<2x8x8xf32>
    %65 = vector.shape_cast %61 : vector<2x8x8xf32> to vector<2x1x8x8xf32>
    %66 = vector.shape_cast %62 : vector<2x8x8xf32> to vector<2x1x8x8xf32>
    %67 = vector.shape_cast %63 : vector<2x8x8xf32> to vector<2x1x8x8xf32>
    %68 = vector.shape_cast %64 : vector<2x8x8xf32> to vector<2x1x8x8xf32>
    %69 = tpu.concatenate %65, %66, %67, %68 in 1 : vector<2x1x8x8xf32>, vector<2x1x8x8xf32>, vector<2x1x8x8xf32>, vector<2x1x8x8xf32> -> vector<2x4x8x8xf32>
    %70 = vector.shape_cast %69 : vector<2x4x8x8xf32> to vector<8x8x8xf32>
    %71 = vector.extract_strided_slice %58 {offsets = [0, 32], sizes = [16, 32], strides = [1, 1]} : vector<16x96xf32> to vector<16x32xf32>
    %72 = vector.shape_cast %71 : vector<16x32xf32> to vector<2x8x32xf32>
    %73 = vector.extract_strided_slice %72 {offsets = [0, 0, 0], sizes = [2, 8, 8], strides = [1, 1, 1]} : vector<2x8x32xf32> to vector<2x8x8xf32>
    %74 = vector.extract_strided_slice %72 {offsets = [0, 0, 8], sizes = [2, 8, 8], strides = [1, 1, 1]} : vector<2x8x32xf32> to vector<2x8x8xf32>
    %75 = vector.extract_strided_slice %72 {offsets = [0, 0, 16], sizes = [2, 8, 8], strides = [1, 1, 1]} : vector<2x8x32xf32> to vector<2x8x8xf32>
    %76 = vector.extract_strided_slice %72 {offsets = [0, 0, 24], sizes = [2, 8, 8], strides = [1, 1, 1]} : vector<2x8x32xf32> to vector<2x8x8xf32>
    %77 = vector.shape_cast %73 : vector<2x8x8xf32> to vector<2x1x8x8xf32>
    %78 = vector.shape_cast %74 : vector<2x8x8xf32> to vector<2x1x8x8xf32>
    %79 = vector.shape_cast %75 : vector<2x8x8xf32> to vector<2x1x8x8xf32>
    %80 = vector.shape_cast %76 : vector<2x8x8xf32> to vector<2x1x8x8xf32>
    %81 = tpu.concatenate %77, %78, %79, %80 in 1 : vector<2x1x8x8xf32>, vector<2x1x8x8xf32>, vector<2x1x8x8xf32>, vector<2x1x8x8xf32> -> vector<2x4x8x8xf32>
    %82 = vector.shape_cast %81 : vector<2x4x8x8xf32> to vector<8x8x8xf32>
    %83 = vector.extract_strided_slice %58 {offsets = [0, 64], sizes = [16, 32], strides = [1, 1]} : vector<16x96xf32> to vector<16x32xf32>
    %84 = vector.shape_cast %83 : vector<16x32xf32> to vector<2x8x32xf32>
    %85 = vector.extract_strided_slice %84 {offsets = [0, 0, 0], sizes = [2, 8, 8], strides = [1, 1, 1]} : vector<2x8x32xf32> to vector<2x8x8xf32>
    %86 = vector.extract_strided_slice %84 {offsets = [0, 0, 8], sizes = [2, 8, 8], strides = [1, 1, 1]} : vector<2x8x32xf32> to vector<2x8x8xf32>
    %87 = vector.extract_strided_slice %84 {offsets = [0, 0, 16], sizes = [2, 8, 8], strides = [1, 1, 1]} : vector<2x8x32xf32> to vector<2x8x8xf32>
    %88 = vector.extract_strided_slice %84 {offsets = [0, 0, 24], sizes = [2, 8, 8], strides = [1, 1, 1]} : vector<2x8x32xf32> to vector<2x8x8xf32>
    %89 = vector.shape_cast %85 : vector<2x8x8xf32> to vector<2x1x8x8xf32>
    %90 = vector.shape_cast %86 : vector<2x8x8xf32> to vector<2x1x8x8xf32>
    %91 = vector.shape_cast %87 : vector<2x8x8xf32> to vector<2x1x8x8xf32>
    %92 = vector.shape_cast %88 : vector<2x8x8xf32> to vector<2x1x8x8xf32>
    %93 = tpu.concatenate %89, %90, %91, %92 in 1 : vector<2x1x8x8xf32>, vector<2x1x8x8xf32>, vector<2x1x8x8xf32>, vector<2x1x8x8xf32> -> vector<2x4x8x8xf32>
    %94 = vector.shape_cast %93 : vector<2x4x8x8xf32> to vector<8x8x8xf32>
    "tpu.trace_start"() <{level = 10 : i32, message = "bqd,bkd->bqk"}> : () -> ()
    %cst_33 = arith.constant dense<0.000000e+00> : vector<8x8x8xf32>
    %95 = tpu.matmul %70, %82, %cst_33 {dimension_numbers = #tpu.dot_dimension_numbers<[2], [2], [1], [1], [0, 0, 0, 1, 1, 1], [0], [0]>} : vector<8x8x8xf32>, vector<8x8x8xf32>, vector<8x8x8xf32> -> vector<8x8x8xf32>
    "tpu.trace_stop"() : () -> ()
    %cst_34 = arith.constant 0.353553385 : f32
    %96 = vector.broadcast %cst_34 : f32 to vector<8x8x8xf32>
    %97 = arith.mulf %95, %96 : vector<8x8x8xf32>
    %98 = arith.addf %97, %13 : vector<8x8x8xf32>
    %cst_35 = arith.constant dense<0xFF800000> : vector<8x8xf32>
    %99 = vector.multi_reduction <maximumf>, %98, %cst_35 [2] : vector<8x8x8xf32> to vector<8x8xf32>
    %100 = vector.shape_cast %99 : vector<8x8xf32> to vector<8x8x1xf32>
    %101 = vector.broadcast %100 : vector<8x8x1xf32> to vector<8x8x8xf32>
    %102 = arith.subf %98, %101 : vector<8x8x8xf32>
    %103 = math.exp %102 : vector<8x8x8xf32>
    %cst_36 = arith.constant dense<0.000000e+00> : vector<8x8xf32>
    %104 = vector.multi_reduction <add>, %103, %cst_36 [2] : vector<8x8x8xf32> to vector<8x8xf32>
    %105 = vector.shape_cast %104 : vector<8x8xf32> to vector<8x8x1xf32>
    %106 = vector.broadcast %105 : vector<8x8x1xf32> to vector<8x8x8xf32>
    %107 = arith.divf %103, %106 : vector<8x8x8xf32>
    %108 = vector.shape_cast %107 : vector<8x8x8xf32> to vector<2x4x8x8xf32>
    %c0_37 = arith.constant 0 : index
    %c0_38 = arith.constant 0 : index
    %c0_39 = arith.constant 0 : index
    %c0_40 = arith.constant 0 : index
    %109 = vector.load %arg23[%c0_37, %c0_38, %c0_39, %c0_40] : memref<2x8x8x8xf32, #tpu.memory_space<vmem>>, vector<2x4x8x8xf32>
    tpu.vector_store %arg23[%c0_37, %c0_38, %c0_39, %c0_40], %108 {strides = array<i32>} : memref<2x8x8x8xf32, #tpu.memory_space<vmem>>, vector<2x4x8x8xf32>,
    "tpu.trace_start"() <{level = 10 : i32, message = "bqk,bkd->bqd"}> : () -> ()
    %cst_41 = arith.constant dense<0.000000e+00> : vector<8x8x8xf32>
    %110 = tpu.matmul %107, %94, %cst_41 {dimension_numbers = #tpu.dot_dimension_numbers<[2], [1], [1], [2], [0, 0, 0, 1, 1, 2], [0], [0]>} : vector<8x8x8xf32>, vector<8x8x8xf32>, vector<8x8x8xf32> -> vector<8x8x8xf32>
    "tpu.trace_stop"() : () -> ()
    %111 = vector.shape_cast %110 : vector<8x8x8xf32> to vector<2x4x8x8xf32>
    %112 = vector.extract_strided_slice %111 {offsets = [0, 0, 0, 0], sizes = [2, 1, 8, 8], strides = [1, 1, 1, 1]} : vector<2x4x8x8xf32> to vector<2x1x8x8xf32>
    %113 = vector.shape_cast %112 : vector<2x1x8x8xf32> to vector<2x8x8xf32>
    %114 = vector.extract_strided_slice %111 {offsets = [0, 1, 0, 0], sizes = [2, 1, 8, 8], strides = [1, 1, 1, 1]} : vector<2x4x8x8xf32> to vector<2x1x8x8xf32>
    %115 = vector.shape_cast %114 : vector<2x1x8x8xf32> to vector<2x8x8xf32>
    %116 = vector.extract_strided_slice %111 {offsets = [0, 2, 0, 0], sizes = [2, 1, 8, 8], strides = [1, 1, 1, 1]} : vector<2x4x8x8xf32> to vector<2x1x8x8xf32>
    %117 = vector.shape_cast %116 : vector<2x1x8x8xf32> to vector<2x8x8xf32>
    %118 = vector.extract_strided_slice %111 {offsets = [0, 3, 0, 0], sizes = [2, 1, 8, 8], strides = [1, 1, 1, 1]} : vector<2x4x8x8xf32> to vector<2x1x8x8xf32>
    %119 = vector.shape_cast %118 : vector<2x1x8x8xf32> to vector<2x8x8xf32>
    %120 = tpu.concatenate %113, %115, %117, %119 in 2 : vector<2x8x8xf32>, vector<2x8x8xf32>, vector<2x8x8xf32>, vector<2x8x8xf32> -> vector<2x8x32xf32>
    %121 = vector.shape_cast %120 : vector<2x8x32xf32> to vector<16x32xf32>
    %c0_42 = arith.constant 0 : index
    %c0_43 = arith.constant 0 : index
    %c0_44 = arith.constant 0 : index
    %122 = vector.load %arg8[%c0_42, %c0_43, %c0_44] : memref<2x32x32xf32, #tpu.memory_space<vmem>>, vector<1x32x32xf32>
    %123 = vector.shape_cast %122 : vector<1x32x32xf32> to vector<32x32xf32>
    %cst_45 = arith.constant dense<0.000000e+00> : vector<16x32xf32>
    %124 = tpu.matmul %121, %123, %cst_45 {dimension_numbers = #tpu.dot_dimension_numbers<[1], [0], [0], [1], [0, 0, 1, 1], [], []>} : vector<16x32xf32>, vector<32x32xf32>, vector<16x32xf32> -> vector<16x32xf32>
    %125 = arith.addf %1, %124 : vector<16x32xf32>
    %c0_46 = arith.constant 0 : index
    %c0_47 = arith.constant 0 : index
    %c0_48 = arith.constant 0 : index
    %126 = vector.load %arg9[%c0_46, %c0_47, %c0_48] : memref<2x1x32xf32, #tpu.memory_space<vmem>>, vector<1x1x32xf32>
    %127 = vector.shape_cast %126 : vector<1x1x32xf32> to vector<1x32xf32>
    %128 = vector.broadcast %127 : vector<1x32xf32> to vector<16x32xf32>
    %129 = arith.addf %125, %128 : vector<16x32xf32>
    %c1_49 = arith.constant 1 : index
    %c0_50 = arith.constant 0 : index
    %c0_51 = arith.constant 0 : index
    %130 = vector.load %arg5[%c1_49, %c0_50, %c0_51] : memref<6x2x32xf32, #tpu.memory_space<vmem>>, vector<1x1x32xf32>
    %131 = vector.shape_cast %130 : vector<1x1x32xf32> to vector<32xf32>
    %c1_52 = arith.constant 1 : index
    %c1_53 = arith.constant 1 : index
    %c0_54 = arith.constant 0 : index
    %132 = vector.load %arg5[%c1_52, %c1_53, %c0_54] : memref<6x2x32xf32, #tpu.memory_space<vmem>>, vector<1x1x32xf32>
    %133 = vector.shape_cast %132 : vector<1x1x32xf32> to vector<32xf32>
    %cst_55 = arith.constant dense<0.000000e+00> : vector<16xf32>
    %134 = vector.multi_reduction <add>, %129, %cst_55 [1] : vector<16x32xf32> to vector<16xf32>
    %135 = vector.shape_cast %134 : vector<16xf32> to vector<16x1xf32>
    %cst_56 = arith.constant 3.200000e+01 : f32
    %136 = vector.broadcast %cst_56 : f32 to vector<16x1xf32>
    %137 = arith.divf %135, %136 : vector<16x1xf32>
    %138 = vector.broadcast %137 : vector<16x1xf32> to vector<16x32xf32>
    %139 = arith.subf %129, %138 : vector<16x32xf32>
    %140 = arith.mulf %139, %139 : vector<16x32xf32>
    %cst_57 = arith.constant dense<0.000000e+00> : vector<16xf32>
    %141 = vector.multi_reduction <add>, %140, %cst_57 [1] : vector<16x32xf32> to vector<16xf32>
    %142 = vector.shape_cast %141 : vector<16xf32> to vector<16x1xf32>
    %cst_58 = arith.constant 3.200000e+01 : f32
    %143 = vector.broadcast %cst_58 : f32 to vector<16x1xf32>
    %144 = arith.divf %142, %143 : vector<16x1xf32>
    %145 = vector.broadcast %137 : vector<16x1xf32> to vector<16x32xf32>
    %146 = arith.subf %129, %145 : vector<16x32xf32>
    %cst_59 = arith.constant 9.99999997E-7 : f32
    %147 = vector.broadcast %cst_59 : f32 to vector<16x1xf32>
    %148 = arith.addf %144, %147 : vector<16x1xf32>
    %149 = math.rsqrt %148 : vector<16x1xf32>
    %150 = vector.broadcast %149 : vector<16x1xf32> to vector<16x32xf32>
    %151 = arith.mulf %146, %150 : vector<16x32xf32>
    %152 = vector.shape_cast %131 : vector<32xf32> to vector<1x32xf32>
    %153 = vector.broadcast %152 : vector<1x32xf32> to vector<16x32xf32>
    %154 = arith.mulf %151, %153 : vector<16x32xf32>
    %155 = vector.shape_cast %133 : vector<32xf32> to vector<1x32xf32>
    %156 = vector.broadcast %155 : vector<1x32xf32> to vector<16x32xf32>
    %157 = arith.addf %154, %156 : vector<16x32xf32>
    %c0_60 = arith.constant 0 : index
    %c0_61 = arith.constant 0 : index
    %c0_62 = arith.constant 0 : index
    %158 = vector.load %arg10[%c0_60, %c0_61, %c0_62] : memref<2x32x32xf32, #tpu.memory_space<vmem>>, vector<1x32x32xf32>
    %159 = vector.shape_cast %158 : vector<1x32x32xf32> to vector<32x32xf32>
    %cst_63 = arith.constant dense<0.000000e+00> : vector<16x32xf32>
    %160 = tpu.matmul %157, %159, %cst_63 {dimension_numbers = #tpu.dot_dimension_numbers<[1], [0], [0], [1], [0, 0, 1, 1], [], []>} : vector<16x32xf32>, vector<32x32xf32>, vector<16x32xf32> -> vector<16x32xf32>
    %c0_64 = arith.constant 0 : index
    %c0_65 = arith.constant 0 : index
    %c0_66 = arith.constant 0 : index
    %161 = vector.load %arg11[%c0_64, %c0_65, %c0_66] : memref<2x1x32xf32, #tpu.memory_space<vmem>>, vector<1x1x32xf32>
    %162 = vector.shape_cast %161 : vector<1x1x32xf32> to vector<1x32xf32>
    %163 = vector.broadcast %162 : vector<1x32xf32> to vector<16x32xf32>
    %164 = arith.addf %160, %163 : vector<16x32xf32>
    %c0_67 = arith.constant 0 : index
    %c0_68 = arith.constant 0 : index
    %c0_69 = arith.constant 0 : index
    %165 = vector.load %arg12[%c0_67, %c0_68, %c0_69] : memref<2x32x64xf32, #tpu.memory_space<vmem>>, vector<1x32x64xf32>
    %166 = vector.shape_cast %165 : vector<1x32x64xf32> to vector<32x64xf32>
    %cst_70 = arith.constant dense<0.000000e+00> : vector<32x64xf32>
    %167 = tpu.matmul %3, %166, %cst_70 {dimension_numbers = #tpu.dot_dimension_numbers<[1], [0], [0], [1], [0, 0, 1, 1], [], []>} : vector<32x32xf32>, vector<32x64xf32>, vector<32x64xf32> -> vector<32x64xf32>
    %c0_71 = arith.constant 0 : index
    %c0_72 = arith.constant 0 : index
    %c0_73 = arith.constant 0 : index
    %168 = vector.load %arg13[%c0_71, %c0_72, %c0_73] : memref<2x1x64xf32, #tpu.memory_space<vmem>>, vector<1x1x64xf32>
    %169 = vector.shape_cast %168 : vector<1x1x64xf32> to vector<1x64xf32>
    %170 = vector.broadcast %169 : vector<1x64xf32> to vector<32x64xf32>
    %171 = arith.addf %167, %170 : vector<32x64xf32>
    %172 = vector.shape_cast %164 : vector<16x32xf32> to vector<2x8x32xf32>
    %173 = vector.extract_strided_slice %172 {offsets = [0, 0, 0], sizes = [2, 8, 8], strides = [1, 1, 1]} : vector<2x8x32xf32> to vector<2x8x8xf32>
    %174 = vector.extract_strided_slice %172 {offsets = [0, 0, 8], sizes = [2, 8, 8], strides = [1, 1, 1]} : vector<2x8x32xf32> to vector<2x8x8xf32>
    %175 = vector.extract_strided_slice %172 {offsets = [0, 0, 16], sizes = [2, 8, 8], strides = [1, 1, 1]} : vector<2x8x32xf32> to vector<2x8x8xf32>
    %176 = vector.extract_strided_slice %172 {offsets = [0, 0, 24], sizes = [2, 8, 8], strides = [1, 1, 1]} : vector<2x8x32xf32> to vector<2x8x8xf32>
    %177 = vector.shape_cast %173 : vector<2x8x8xf32> to vector<2x1x8x8xf32>
    %178 = vector.shape_cast %174 : vector<2x8x8xf32> to vector<2x1x8x8xf32>
    %179 = vector.shape_cast %175 : vector<2x8x8xf32> to vector<2x1x8x8xf32>
    %180 = vector.shape_cast %176 : vector<2x8x8xf32> to vector<2x1x8x8xf32>
    %181 = tpu.concatenate %177, %178, %179, %180 in 1 : vector<2x1x8x8xf32>, vector<2x1x8x8xf32>, vector<2x1x8x8xf32>, vector<2x1x8x8xf32> -> vector<2x4x8x8xf32>
    %182 = vector.shape_cast %181 : vector<2x4x8x8xf32> to vector<8x8x8xf32>
    %183 = vector.extract_strided_slice %171 {offsets = [0, 0], sizes = [32, 32], strides = [1, 1]} : vector<32x64xf32> to vector<32x32xf32>
    %184 = vector.shape_cast %183 : vector<32x32xf32> to vector<2x16x32xf32>
    %185 = vector.extract_strided_slice %184 {offsets = [0, 0, 0], sizes = [2, 16, 8], strides = [1, 1, 1]} : vector<2x16x32xf32> to vector<2x16x8xf32>
    %186 = vector.extract_strided_slice %184 {offsets = [0, 0, 8], sizes = [2, 16, 8], strides = [1, 1, 1]} : vector<2x16x32xf32> to vector<2x16x8xf32>
    %187 = vector.extract_strided_slice %184 {offsets = [0, 0, 16], sizes = [2, 16, 8], strides = [1, 1, 1]} : vector<2x16x32xf32> to vector<2x16x8xf32>
    %188 = vector.extract_strided_slice %184 {offsets = [0, 0, 24], sizes = [2, 16, 8], strides = [1, 1, 1]} : vector<2x16x32xf32> to vector<2x16x8xf32>
    %189 = vector.shape_cast %185 : vector<2x16x8xf32> to vector<2x1x16x8xf32>
    %190 = vector.shape_cast %186 : vector<2x16x8xf32> to vector<2x1x16x8xf32>
    %191 = vector.shape_cast %187 : vector<2x16x8xf32> to vector<2x1x16x8xf32>
    %192 = vector.shape_cast %188 : vector<2x16x8xf32> to vector<2x1x16x8xf32>
    %193 = tpu.concatenate %189, %190, %191, %192 in 1 : vector<2x1x16x8xf32>, vector<2x1x16x8xf32>, vector<2x1x16x8xf32>, vector<2x1x16x8xf32> -> vector<2x4x16x8xf32>
    %194 = vector.shape_cast %193 : vector<2x4x16x8xf32> to vector<8x16x8xf32>
    %195 = vector.extract_strided_slice %171 {offsets = [0, 32], sizes = [32, 32], strides = [1, 1]} : vector<32x64xf32> to vector<32x32xf32>
    %196 = vector.shape_cast %195 : vector<32x32xf32> to vector<2x16x32xf32>
    %197 = vector.extract_strided_slice %196 {offsets = [0, 0, 0], sizes = [2, 16, 8], strides = [1, 1, 1]} : vector<2x16x32xf32> to vector<2x16x8xf32>
    %198 = vector.extract_strided_slice %196 {offsets = [0, 0, 8], sizes = [2, 16, 8], strides = [1, 1, 1]} : vector<2x16x32xf32> to vector<2x16x8xf32>
    %199 = vector.extract_strided_slice %196 {offsets = [0, 0, 16], sizes = [2, 16, 8], strides = [1, 1, 1]} : vector<2x16x32xf32> to vector<2x16x8xf32>
    %200 = vector.extract_strided_slice %196 {offsets = [0, 0, 24], sizes = [2, 16, 8], strides = [1, 1, 1]} : vector<2x16x32xf32> to vector<2x16x8xf32>
    %201 = vector.shape_cast %197 : vector<2x16x8xf32> to vector<2x1x16x8xf32>
    %202 = vector.shape_cast %198 : vector<2x16x8xf32> to vector<2x1x16x8xf32>
    %203 = vector.shape_cast %199 : vector<2x16x8xf32> to vector<2x1x16x8xf32>
    %204 = vector.shape_cast %200 : vector<2x16x8xf32> to vector<2x1x16x8xf32>
    %205 = tpu.concatenate %201, %202, %203, %204 in 1 : vector<2x1x16x8xf32>, vector<2x1x16x8xf32>, vector<2x1x16x8xf32>, vector<2x1x16x8xf32> -> vector<2x4x16x8xf32>
    %206 = vector.shape_cast %205 : vector<2x4x16x8xf32> to vector<8x16x8xf32>
    "tpu.trace_start"() <{level = 10 : i32, message = "bqd,bkd->bqk"}> : () -> ()
    %cst_74 = arith.constant dense<0.000000e+00> : vector<8x8x16xf32>
    %207 = tpu.matmul %182, %194, %cst_74 {dimension_numbers = #tpu.dot_dimension_numbers<[2], [2], [1], [1], [0, 0, 0, 1, 1, 1], [0], [0]>} : vector<8x8x8xf32>, vector<8x16x8xf32>, vector<8x8x16xf32> -> vector<8x8x16xf32>
    "tpu.trace_stop"() : () -> ()
    %cst_75 = arith.constant 0.353553385 : f32
    %208 = vector.broadcast %cst_75 : f32 to vector<8x8x16xf32>
    %209 = arith.mulf %207, %208 : vector<8x8x16xf32>
    %210 = arith.addf %209, %23 : vector<8x8x16xf32>
    %cst_76 = arith.constant dense<0xFF800000> : vector<8x8xf32>
    %211 = vector.multi_reduction <maximumf>, %210, %cst_76 [2] : vector<8x8x16xf32> to vector<8x8xf32>
    %212 = vector.shape_cast %211 : vector<8x8xf32> to vector<8x8x1xf32>
    %213 = vector.broadcast %212 : vector<8x8x1xf32> to vector<8x8x16xf32>
    %214 = arith.subf %210, %213 : vector<8x8x16xf32>
    %215 = math.exp %214 : vector<8x8x16xf32>
    %cst_77 = arith.constant dense<0.000000e+00> : vector<8x8xf32>
    %216 = vector.multi_reduction <add>, %215, %cst_77 [2] : vector<8x8x16xf32> to vector<8x8xf32>
    %217 = vector.shape_cast %216 : vector<8x8xf32> to vector<8x8x1xf32>
    %218 = vector.broadcast %217 : vector<8x8x1xf32> to vector<8x8x16xf32>
    %219 = arith.divf %215, %218 : vector<8x8x16xf32>
    %220 = vector.shape_cast %219 : vector<8x8x16xf32> to vector<2x4x8x16xf32>
    %c0_78 = arith.constant 0 : index
    %c0_79 = arith.constant 0 : index
    %c0_80 = arith.constant 0 : index
    %c0_81 = arith.constant 0 : index
    %221 = vector.load %arg24[%c0_78, %c0_79, %c0_80, %c0_81] : memref<2x8x8x16xf32, #tpu.memory_space<vmem>>, vector<2x4x8x16xf32>
    tpu.vector_store %arg24[%c0_78, %c0_79, %c0_80, %c0_81], %220 {strides = array<i32>} : memref<2x8x8x16xf32, #tpu.memory_space<vmem>>, vector<2x4x8x16xf32>,
    "tpu.trace_start"() <{level = 10 : i32, message = "bqk,bkd->bqd"}> : () -> ()
    %cst_82 = arith.constant dense<0.000000e+00> : vector<8x8x8xf32>
    %222 = tpu.matmul %219, %206, %cst_82 {dimension_numbers = #tpu.dot_dimension_numbers<[2], [1], [1], [2], [0, 0, 0, 1, 1, 2], [0], [0]>} : vector<8x8x16xf32>, vector<8x16x8xf32>, vector<8x8x8xf32> -> vector<8x8x8xf32>
    "tpu.trace_stop"() : () -> ()
    %223 = vector.shape_cast %222 : vector<8x8x8xf32> to vector<2x4x8x8xf32>
    %224 = vector.extract_strided_slice %223 {offsets = [0, 0, 0, 0], sizes = [2, 1, 8, 8], strides = [1, 1, 1, 1]} : vector<2x4x8x8xf32> to vector<2x1x8x8xf32>
    %225 = vector.shape_cast %224 : vector<2x1x8x8xf32> to vector<2x8x8xf32>
    %226 = vector.extract_strided_slice %223 {offsets = [0, 1, 0, 0], sizes = [2, 1, 8, 8], strides = [1, 1, 1, 1]} : vector<2x4x8x8xf32> to vector<2x1x8x8xf32>
    %227 = vector.shape_cast %226 : vector<2x1x8x8xf32> to vector<2x8x8xf32>
    %228 = vector.extract_strided_slice %223 {offsets = [0, 2, 0, 0], sizes = [2, 1, 8, 8], strides = [1, 1, 1, 1]} : vector<2x4x8x8xf32> to vector<2x1x8x8xf32>
    %229 = vector.shape_cast %228 : vector<2x1x8x8xf32> to vector<2x8x8xf32>
    %230 = vector.extract_strided_slice %223 {offsets = [0, 3, 0, 0], sizes = [2, 1, 8, 8], strides = [1, 1, 1, 1]} : vector<2x4x8x8xf32> to vector<2x1x8x8xf32>
    %231 = vector.shape_cast %230 : vector<2x1x8x8xf32> to vector<2x8x8xf32>
    %232 = tpu.concatenate %225, %227, %229, %231 in 2 : vector<2x8x8xf32>, vector<2x8x8xf32>, vector<2x8x8xf32>, vector<2x8x8xf32> -> vector<2x8x32xf32>
    %233 = vector.shape_cast %232 : vector<2x8x32xf32> to vector<16x32xf32>
    %c0_83 = arith.constant 0 : index
    %c0_84 = arith.constant 0 : index
    %c0_85 = arith.constant 0 : index
    %234 = vector.load %arg14[%c0_83, %c0_84, %c0_85] : memref<2x32x32xf32, #tpu.memory_space<vmem>>, vector<1x32x32xf32>
    %235 = vector.shape_cast %234 : vector<1x32x32xf32> to vector<32x32xf32>
    %cst_86 = arith.constant dense<0.000000e+00> : vector<16x32xf32>
    %236 = tpu.matmul %233, %235, %cst_86 {dimension_numbers = #tpu.dot_dimension_numbers<[1], [0], [0], [1], [0, 0, 1, 1], [], []>} : vector<16x32xf32>, vector<32x32xf32>, vector<16x32xf32> -> vector<16x32xf32>
    %237 = arith.addf %129, %236 : vector<16x32xf32>
    %c0_87 = arith.constant 0 : index
    %c0_88 = arith.constant 0 : index
    %c0_89 = arith.constant 0 : index
    %238 = vector.load %arg15[%c0_87, %c0_88, %c0_89] : memref<2x1x32xf32, #tpu.memory_space<vmem>>, vector<1x1x32xf32>
    %239 = vector.shape_cast %238 : vector<1x1x32xf32> to vector<1x32xf32>
    %240 = vector.broadcast %239 : vector<1x32xf32> to vector<16x32xf32>
    %241 = arith.addf %237, %240 : vector<16x32xf32>
    %c2 = arith.constant 2 : index
    %c0_90 = arith.constant 0 : index
    %c0_91 = arith.constant 0 : index
    %242 = vector.load %arg5[%c2, %c0_90, %c0_91] : memref<6x2x32xf32, #tpu.memory_space<vmem>>, vector<1x1x32xf32>
    %243 = vector.shape_cast %242 : vector<1x1x32xf32> to vector<32xf32>
    %c2_92 = arith.constant 2 : index
    %c1_93 = arith.constant 1 : index
    %c0_94 = arith.constant 0 : index
    %244 = vector.load %arg5[%c2_92, %c1_93, %c0_94] : memref<6x2x32xf32, #tpu.memory_space<vmem>>, vector<1x1x32xf32>
    %245 = vector.shape_cast %244 : vector<1x1x32xf32> to vector<32xf32>
    %cst_95 = arith.constant dense<0.000000e+00> : vector<16xf32>
    %246 = vector.multi_reduction <add>, %241, %cst_95 [1] : vector<16x32xf32> to vector<16xf32>
    %247 = vector.shape_cast %246 : vector<16xf32> to vector<16x1xf32>
    %cst_96 = arith.constant 3.200000e+01 : f32
    %248 = vector.broadcast %cst_96 : f32 to vector<16x1xf32>
    %249 = arith.divf %247, %248 : vector<16x1xf32>
    %250 = vector.broadcast %249 : vector<16x1xf32> to vector<16x32xf32>
    %251 = arith.subf %241, %250 : vector<16x32xf32>
    %252 = arith.mulf %251, %251 : vector<16x32xf32>
    %cst_97 = arith.constant dense<0.000000e+00> : vector<16xf32>
    %253 = vector.multi_reduction <add>, %252, %cst_97 [1] : vector<16x32xf32> to vector<16xf32>
    %254 = vector.shape_cast %253 : vector<16xf32> to vector<16x1xf32>
    %cst_98 = arith.constant 3.200000e+01 : f32
    %255 = vector.broadcast %cst_98 : f32 to vector<16x1xf32>
    %256 = arith.divf %254, %255 : vector<16x1xf32>
    %257 = vector.broadcast %249 : vector<16x1xf32> to vector<16x32xf32>
    %258 = arith.subf %241, %257 : vector<16x32xf32>
    %cst_99 = arith.constant 9.99999997E-7 : f32
    %259 = vector.broadcast %cst_99 : f32 to vector<16x1xf32>
    %260 = arith.addf %256, %259 : vector<16x1xf32>
    %261 = math.rsqrt %260 : vector<16x1xf32>
    %262 = vector.broadcast %261 : vector<16x1xf32> to vector<16x32xf32>
    %263 = arith.mulf %258, %262 : vector<16x32xf32>
    %264 = vector.shape_cast %243 : vector<32xf32> to vector<1x32xf32>
    %265 = vector.broadcast %264 : vector<1x32xf32> to vector<16x32xf32>
    %266 = arith.mulf %263, %265 : vector<16x32xf32>
    %267 = vector.shape_cast %245 : vector<32xf32> to vector<1x32xf32>
    %268 = vector.broadcast %267 : vector<1x32xf32> to vector<16x32xf32>
    %269 = arith.addf %266, %268 : vector<16x32xf32>
    %c0_100 = arith.constant 0 : index
    %c0_101 = arith.constant 0 : index
    %c0_102 = arith.constant 0 : index
    %270 = vector.load %arg16[%c0_100, %c0_101, %c0_102] : memref<2x32x64xf32, #tpu.memory_space<vmem>>, vector<1x32x64xf32>
    %271 = vector.shape_cast %270 : vector<1x32x64xf32> to vector<32x64xf32>
    %cst_103 = arith.constant dense<0.000000e+00> : vector<16x64xf32>
    %272 = tpu.matmul %269, %271, %cst_103 {dimension_numbers = #tpu.dot_dimension_numbers<[1], [0], [0], [1], [0, 0, 1, 1], [], []>} : vector<16x32xf32>, vector<32x64xf32>, vector<16x64xf32> -> vector<16x64xf32>
    %c0_104 = arith.constant 0 : index
    %c0_105 = arith.constant 0 : index
    %c0_106 = arith.constant 0 : index
    %273 = vector.load %arg17[%c0_104, %c0_105, %c0_106] : memref<2x1x64xf32, #tpu.memory_space<vmem>>, vector<1x1x64xf32>
    %274 = vector.shape_cast %273 : vector<1x1x64xf32> to vector<1x64xf32>
    %275 = vector.broadcast %274 : vector<1x64xf32> to vector<16x64xf32>
    %276 = arith.addf %272, %275 : vector<16x64xf32>
    %cst_107 = arith.constant 0.000000e+00 : f32
    %277 = vector.broadcast %cst_107 : f32 to vector<16x64xf32>
    %278 = arith.maximumf %276, %277 : vector<16x64xf32>
    %c0_108 = arith.constant 0 : index
    %c0_109 = arith.constant 0 : index
    %c0_110 = arith.constant 0 : index
    %279 = vector.load %arg18[%c0_108, %c0_109, %c0_110] : memref<2x64x32xf32, #tpu.memory_space<vmem>>, vector<1x64x32xf32>
    %280 = vector.shape_cast %279 : vector<1x64x32xf32> to vector<64x32xf32>
    %cst_111 = arith.constant dense<0.000000e+00> : vector<16x32xf32>
    %281 = tpu.matmul %278, %280, %cst_111 {dimension_numbers = #tpu.dot_dimension_numbers<[1], [0], [0], [1], [0, 0, 1, 1], [], []>} : vector<16x64xf32>, vector<64x32xf32>, vector<16x32xf32> -> vector<16x32xf32>
    %282 = arith.addf %241, %281 : vector<16x32xf32>
    %c0_112 = arith.constant 0 : index
    %c0_113 = arith.constant 0 : index
    %c0_114 = arith.constant 0 : index
    %283 = vector.load %arg19[%c0_112, %c0_113, %c0_114] : memref<2x1x32xf32, #tpu.memory_space<vmem>>, vector<1x1x32xf32>
    %284 = vector.shape_cast %283 : vector<1x1x32xf32> to vector<1x32xf32>
    %285 = vector.broadcast %284 : vector<1x32xf32> to vector<16x32xf32>
    %286 = arith.addf %282, %285 : vector<16x32xf32>
    %c3 = arith.constant 3 : index
    %c0_115 = arith.constant 0 : index
    %c0_116 = arith.constant 0 : index
    %287 = vector.load %arg5[%c3, %c0_115, %c0_116] : memref<6x2x32xf32, #tpu.memory_space<vmem>>, vector<1x1x32xf32>
    %288 = vector.shape_cast %287 : vector<1x1x32xf32> to vector<32xf32>
    %c3_117 = arith.constant 3 : index
    %c1_118 = arith.constant 1 : index
    %c0_119 = arith.constant 0 : index
    %289 = vector.load %arg5[%c3_117, %c1_118, %c0_119] : memref<6x2x32xf32, #tpu.memory_space<vmem>>, vector<1x1x32xf32>
    %290 = vector.shape_cast %289 : vector<1x1x32xf32> to vector<32xf32>
    %cst_120 = arith.constant dense<0.000000e+00> : vector<16xf32>
    %291 = vector.multi_reduction <add>, %286, %cst_120 [1] : vector<16x32xf32> to vector<16xf32>
    %292 = vector.shape_cast %291 : vector<16xf32> to vector<16x1xf32>
    %cst_121 = arith.constant 3.200000e+01 : f32
    %293 = vector.broadcast %cst_121 : f32 to vector<16x1xf32>
    %294 = arith.divf %292, %293 : vector<16x1xf32>
    %295 = vector.broadcast %294 : vector<16x1xf32> to vector<16x32xf32>
    %296 = arith.subf %286, %295 : vector<16x32xf32>
    %297 = arith.mulf %296, %296 : vector<16x32xf32>
    %cst_122 = arith.constant dense<0.000000e+00> : vector<16xf32>
    %298 = vector.multi_reduction <add>, %297, %cst_122 [1] : vector<16x32xf32> to vector<16xf32>
    %299 = vector.shape_cast %298 : vector<16xf32> to vector<16x1xf32>
    %cst_123 = arith.constant 3.200000e+01 : f32
    %300 = vector.broadcast %cst_123 : f32 to vector<16x1xf32>
    %301 = arith.divf %299, %300 : vector<16x1xf32>
    %302 = vector.broadcast %294 : vector<16x1xf32> to vector<16x32xf32>
    %303 = arith.subf %286, %302 : vector<16x32xf32>
    %cst_124 = arith.constant 9.99999997E-7 : f32
    %304 = vector.broadcast %cst_124 : f32 to vector<16x1xf32>
    %305 = arith.addf %301, %304 : vector<16x1xf32>
    %306 = math.rsqrt %305 : vector<16x1xf32>
    %307 = vector.broadcast %306 : vector<16x1xf32> to vector<16x32xf32>
    %308 = arith.mulf %303, %307 : vector<16x32xf32>
    %309 = vector.shape_cast %288 : vector<32xf32> to vector<1x32xf32>
    %310 = vector.broadcast %309 : vector<1x32xf32> to vector<16x32xf32>
    %311 = arith.mulf %308, %310 : vector<16x32xf32>
    %312 = vector.shape_cast %290 : vector<32xf32> to vector<1x32xf32>
    %313 = vector.broadcast %312 : vector<1x32xf32> to vector<16x32xf32>
    %314 = arith.addf %311, %313 : vector<16x32xf32>
    %c1_125 = arith.constant 1 : index
    %c0_126 = arith.constant 0 : index
    %c0_127 = arith.constant 0 : index
    %315 = vector.load %arg6[%c1_125, %c0_126, %c0_127] : memref<2x32x96xf32, #tpu.memory_space<vmem>>, vector<1x32x96xf32>
    %316 = vector.shape_cast %315 : vector<1x32x96xf32> to vector<32x96xf32>
    %cst_128 = arith.constant dense<0.000000e+00> : vector<16x96xf32>
    %317 = tpu.matmul %314, %316, %cst_128 {dimension_numbers = #tpu.dot_dimension_numbers<[1], [0], [0], [1], [0, 0, 1, 1], [], []>} : vector<16x32xf32>, vector<32x96xf32>, vector<16x96xf32> -> vector<16x96xf32>
    %c1_129 = arith.constant 1 : index
    %c0_130 = arith.constant 0 : index
    %c0_131 = arith.constant 0 : index
    %318 = vector.load %arg7[%c1_129, %c0_130, %c0_131] : memref<2x1x96xf32, #tpu.memory_space<vmem>>, vector<1x1x96xf32>
    %319 = vector.shape_cast %318 : vector<1x1x96xf32> to vector<1x96xf32>
    %320 = vector.broadcast %319 : vector<1x96xf32> to vector<16x96xf32>
    %321 = arith.addf %317, %320 : vector<16x96xf32>
    %322 = vector.extract_strided_slice %321 {offsets = [0, 0], sizes = [16, 32], strides = [1, 1]} : vector<16x96xf32> to vector<16x32xf32>
    %323 = vector.shape_cast %322 : vector<16x32xf32> to vector<2x8x32xf32>
    %324 = vector.extract_strided_slice %323 {offsets = [0, 0, 0], sizes = [2, 8, 8], strides = [1, 1, 1]} : vector<2x8x32xf32> to vector<2x8x8xf32>
    %325 = vector.extract_strided_slice %323 {offsets = [0, 0, 8], sizes = [2, 8, 8], strides = [1, 1, 1]} : vector<2x8x32xf32> to vector<2x8x8xf32>
    %326 = vector.extract_strided_slice %323 {offsets = [0, 0, 16], sizes = [2, 8, 8], strides = [1, 1, 1]} : vector<2x8x32xf32> to vector<2x8x8xf32>
    %327 = vector.extract_strided_slice %323 {offsets = [0, 0, 24], sizes = [2, 8, 8], strides = [1, 1, 1]} : vector<2x8x32xf32> to vector<2x8x8xf32>
    %328 = vector.shape_cast %324 : vector<2x8x8xf32> to vector<2x1x8x8xf32>
    %329 = vector.shape_cast %325 : vector<2x8x8xf32> to vector<2x1x8x8xf32>
    %330 = vector.shape_cast %326 : vector<2x8x8xf32> to vector<2x1x8x8xf32>
    %331 = vector.shape_cast %327 : vector<2x8x8xf32> to vector<2x1x8x8xf32>
    %332 = tpu.concatenate %328, %329, %330, %331 in 1 : vector<2x1x8x8xf32>, vector<2x1x8x8xf32>, vector<2x1x8x8xf32>, vector<2x1x8x8xf32> -> vector<2x4x8x8xf32>
    %333 = vector.shape_cast %332 : vector<2x4x8x8xf32> to vector<8x8x8xf32>
    %334 = vector.extract_strided_slice %321 {offsets = [0, 32], sizes = [16, 32], strides = [1, 1]} : vector<16x96xf32> to vector<16x32xf32>
    %335 = vector.shape_cast %334 : vector<16x32xf32> to vector<2x8x32xf32>
    %336 = vector.extract_strided_slice %335 {offsets = [0, 0, 0], sizes = [2, 8, 8], strides = [1, 1, 1]} : vector<2x8x32xf32> to vector<2x8x8xf32>
    %337 = vector.extract_strided_slice %335 {offsets = [0, 0, 8], sizes = [2, 8, 8], strides = [1, 1, 1]} : vector<2x8x32xf32> to vector<2x8x8xf32>
    %338 = vector.extract_strided_slice %335 {offsets = [0, 0, 16], sizes = [2, 8, 8], strides = [1, 1, 1]} : vector<2x8x32xf32> to vector<2x8x8xf32>
    %339 = vector.extract_strided_slice %335 {offsets = [0, 0, 24], sizes = [2, 8, 8], strides = [1, 1, 1]} : vector<2x8x32xf32> to vector<2x8x8xf32>
    %340 = vector.shape_cast %336 : vector<2x8x8xf32> to vector<2x1x8x8xf32>
    %341 = vector.shape_cast %337 : vector<2x8x8xf32> to vector<2x1x8x8xf32>
    %342 = vector.shape_cast %338 : vector<2x8x8xf32> to vector<2x1x8x8xf32>
    %343 = vector.shape_cast %339 : vector<2x8x8xf32> to vector<2x1x8x8xf32>
    %344 = tpu.concatenate %340, %341, %342, %343 in 1 : vector<2x1x8x8xf32>, vector<2x1x8x8xf32>, vector<2x1x8x8xf32>, vector<2x1x8x8xf32> -> vector<2x4x8x8xf32>
    %345 = vector.shape_cast %344 : vector<2x4x8x8xf32> to vector<8x8x8xf32>
    %346 = vector.extract_strided_slice %321 {offsets = [0, 64], sizes = [16, 32], strides = [1, 1]} : vector<16x96xf32> to vector<16x32xf32>
    %347 = vector.shape_cast %346 : vector<16x32xf32> to vector<2x8x32xf32>
    %348 = vector.extract_strided_slice %347 {offsets = [0, 0, 0], sizes = [2, 8, 8], strides = [1, 1, 1]} : vector<2x8x32xf32> to vector<2x8x8xf32>
    %349 = vector.extract_strided_slice %347 {offsets = [0, 0, 8], sizes = [2, 8, 8], strides = [1, 1, 1]} : vector<2x8x32xf32> to vector<2x8x8xf32>
    %350 = vector.extract_strided_slice %347 {offsets = [0, 0, 16], sizes = [2, 8, 8], strides = [1, 1, 1]} : vector<2x8x32xf32> to vector<2x8x8xf32>
    %351 = vector.extract_strided_slice %347 {offsets = [0, 0, 24], sizes = [2, 8, 8], strides = [1, 1, 1]} : vector<2x8x32xf32> to vector<2x8x8xf32>
    %352 = vector.shape_cast %348 : vector<2x8x8xf32> to vector<2x1x8x8xf32>
    %353 = vector.shape_cast %349 : vector<2x8x8xf32> to vector<2x1x8x8xf32>
    %354 = vector.shape_cast %350 : vector<2x8x8xf32> to vector<2x1x8x8xf32>
    %355 = vector.shape_cast %351 : vector<2x8x8xf32> to vector<2x1x8x8xf32>
    %356 = tpu.concatenate %352, %353, %354, %355 in 1 : vector<2x1x8x8xf32>, vector<2x1x8x8xf32>, vector<2x1x8x8xf32>, vector<2x1x8x8xf32> -> vector<2x4x8x8xf32>
    %357 = vector.shape_cast %356 : vector<2x4x8x8xf32> to vector<8x8x8xf32>
    "tpu.trace_start"() <{level = 10 : i32, message = "bqd,bkd->bqk"}> : () -> ()
    %cst_132 = arith.constant dense<0.000000e+00> : vector<8x8x8xf32>
    %358 = tpu.matmul %333, %345, %cst_132 {dimension_numbers = #tpu.dot_dimension_numbers<[2], [2], [1], [1], [0, 0, 0, 1, 1, 1], [0], [0]>} : vector<8x8x8xf32>, vector<8x8x8xf32>, vector<8x8x8xf32> -> vector<8x8x8xf32>
    "tpu.trace_stop"() : () -> ()
    %cst_133 = arith.constant 0.353553385 : f32
    %359 = vector.broadcast %cst_133 : f32 to vector<8x8x8xf32>
    %360 = arith.mulf %358, %359 : vector<8x8x8xf32>
    %361 = arith.addf %360, %13 : vector<8x8x8xf32>
    %cst_134 = arith.constant dense<0xFF800000> : vector<8x8xf32>
    %362 = vector.multi_reduction <maximumf>, %361, %cst_134 [2] : vector<8x8x8xf32> to vector<8x8xf32>
    %363 = vector.shape_cast %362 : vector<8x8xf32> to vector<8x8x1xf32>
    %364 = vector.broadcast %363 : vector<8x8x1xf32> to vector<8x8x8xf32>
    %365 = arith.subf %361, %364 : vector<8x8x8xf32>
    %366 = math.exp %365 : vector<8x8x8xf32>
    %cst_135 = arith.constant dense<0.000000e+00> : vector<8x8xf32>
    %367 = vector.multi_reduction <add>, %366, %cst_135 [2] : vector<8x8x8xf32> to vector<8x8xf32>
    %368 = vector.shape_cast %367 : vector<8x8xf32> to vector<8x8x1xf32>
    %369 = vector.broadcast %368 : vector<8x8x1xf32> to vector<8x8x8xf32>
    %370 = arith.divf %366, %369 : vector<8x8x8xf32>
    %371 = vector.shape_cast %370 : vector<8x8x8xf32> to vector<2x4x8x8xf32>
    %c0_136 = arith.constant 0 : index
    %c4 = arith.constant 4 : index
    %c0_137 = arith.constant 0 : index
    %c0_138 = arith.constant 0 : index
    %372 = vector.load %arg23[%c0_136, %c4, %c0_137, %c0_138] : memref<2x8x8x8xf32, #tpu.memory_space<vmem>>, vector<2x4x8x8xf32>
    tpu.vector_store %arg23[%c0_136, %c4, %c0_137, %c0_138], %371 {strides = array<i32>} : memref<2x8x8x8xf32, #tpu.memory_space<vmem>>, vector<2x4x8x8xf32>,
    "tpu.trace_start"() <{level = 10 : i32, message = "bqk,bkd->bqd"}> : () -> ()
    %cst_139 = arith.constant dense<0.000000e+00> : vector<8x8x8xf32>
    %373 = tpu.matmul %370, %357, %cst_139 {dimension_numbers = #tpu.dot_dimension_numbers<[2], [1], [1], [2], [0, 0, 0, 1, 1, 2], [0], [0]>} : vector<8x8x8xf32>, vector<8x8x8xf32>, vector<8x8x8xf32> -> vector<8x8x8xf32>
    "tpu.trace_stop"() : () -> ()
    %374 = vector.shape_cast %373 : vector<8x8x8xf32> to vector<2x4x8x8xf32>
    %375 = vector.extract_strided_slice %374 {offsets = [0, 0, 0, 0], sizes = [2, 1, 8, 8], strides = [1, 1, 1, 1]} : vector<2x4x8x8xf32> to vector<2x1x8x8xf32>
    %376 = vector.shape_cast %375 : vector<2x1x8x8xf32> to vector<2x8x8xf32>
    %377 = vector.extract_strided_slice %374 {offsets = [0, 1, 0, 0], sizes = [2, 1, 8, 8], strides = [1, 1, 1, 1]} : vector<2x4x8x8xf32> to vector<2x1x8x8xf32>
    %378 = vector.shape_cast %377 : vector<2x1x8x8xf32> to vector<2x8x8xf32>
    %379 = vector.extract_strided_slice %374 {offsets = [0, 2, 0, 0], sizes = [2, 1, 8, 8], strides = [1, 1, 1, 1]} : vector<2x4x8x8xf32> to vector<2x1x8x8xf32>
    %380 = vector.shape_cast %379 : vector<2x1x8x8xf32> to vector<2x8x8xf32>
    %381 = vector.extract_strided_slice %374 {offsets = [0, 3, 0, 0], sizes = [2, 1, 8, 8], strides = [1, 1, 1, 1]} : vector<2x4x8x8xf32> to vector<2x1x8x8xf32>
    %382 = vector.shape_cast %381 : vector<2x1x8x8xf32> to vector<2x8x8xf32>
    %383 = tpu.concatenate %376, %378, %380, %382 in 2 : vector<2x8x8xf32>, vector<2x8x8xf32>, vector<2x8x8xf32>, vector<2x8x8xf32> -> vector<2x8x32xf32>
    %384 = vector.shape_cast %383 : vector<2x8x32xf32> to vector<16x32xf32>
    %c1_140 = arith.constant 1 : index
    %c0_141 = arith.constant 0 : index
    %c0_142 = arith.constant 0 : index
    %385 = vector.load %arg8[%c1_140, %c0_141, %c0_142] : memref<2x32x32xf32, #tpu.memory_space<vmem>>, vector<1x32x32xf32>
    %386 = vector.shape_cast %385 : vector<1x32x32xf32> to vector<32x32xf32>
    %cst_143 = arith.constant dense<0.000000e+00> : vector<16x32xf32>
    %387 = tpu.matmul %384, %386, %cst_143 {dimension_numbers = #tpu.dot_dimension_numbers<[1], [0], [0], [1], [0, 0, 1, 1], [], []>} : vector<16x32xf32>, vector<32x32xf32>, vector<16x32xf32> -> vector<16x32xf32>
    %388 = arith.addf %286, %387 : vector<16x32xf32>
    %c1_144 = arith.constant 1 : index
    %c0_145 = arith.constant 0 : index
    %c0_146 = arith.constant 0 : index
    %389 = vector.load %arg9[%c1_144, %c0_145, %c0_146] : memref<2x1x32xf32, #tpu.memory_space<vmem>>, vector<1x1x32xf32>
    %390 = vector.shape_cast %389 : vector<1x1x32xf32> to vector<1x32xf32>
    %391 = vector.broadcast %390 : vector<1x32xf32> to vector<16x32xf32>
    %392 = arith.addf %388, %391 : vector<16x32xf32>
    %c4_147 = arith.constant 4 : index
    %c0_148 = arith.constant 0 : index
    %c0_149 = arith.constant 0 : index
    %393 = vector.load %arg5[%c4_147, %c0_148, %c0_149] : memref<6x2x32xf32, #tpu.memory_space<vmem>>, vector<1x1x32xf32>
    %394 = vector.shape_cast %393 : vector<1x1x32xf32> to vector<32xf32>
    %c4_150 = arith.constant 4 : index
    %c1_151 = arith.constant 1 : index
    %c0_152 = arith.constant 0 : index
    %395 = vector.load %arg5[%c4_150, %c1_151, %c0_152] : memref<6x2x32xf32, #tpu.memory_space<vmem>>, vector<1x1x32xf32>
    %396 = vector.shape_cast %395 : vector<1x1x32xf32> to vector<32xf32>
    %cst_153 = arith.constant dense<0.000000e+00> : vector<16xf32>
    %397 = vector.multi_reduction <add>, %392, %cst_153 [1] : vector<16x32xf32> to vector<16xf32>
    %398 = vector.shape_cast %397 : vector<16xf32> to vector<16x1xf32>
    %cst_154 = arith.constant 3.200000e+01 : f32
    %399 = vector.broadcast %cst_154 : f32 to vector<16x1xf32>
    %400 = arith.divf %398, %399 : vector<16x1xf32>
    %401 = vector.broadcast %400 : vector<16x1xf32> to vector<16x32xf32>
    %402 = arith.subf %392, %401 : vector<16x32xf32>
    %403 = arith.mulf %402, %402 : vector<16x32xf32>
    %cst_155 = arith.constant dense<0.000000e+00> : vector<16xf32>
    %404 = vector.multi_reduction <add>, %403, %cst_155 [1] : vector<16x32xf32> to vector<16xf32>
    %405 = vector.shape_cast %404 : vector<16xf32> to vector<16x1xf32>
    %cst_156 = arith.constant 3.200000e+01 : f32
    %406 = vector.broadcast %cst_156 : f32 to vector<16x1xf32>
    %407 = arith.divf %405, %406 : vector<16x1xf32>
    %408 = vector.broadcast %400 : vector<16x1xf32> to vector<16x32xf32>
    %409 = arith.subf %392, %408 : vector<16x32xf32>
    %cst_157 = arith.constant 9.99999997E-7 : f32
    %410 = vector.broadcast %cst_157 : f32 to vector<16x1xf32>
    %411 = arith.addf %407, %410 : vector<16x1xf32>
    %412 = math.rsqrt %411 : vector<16x1xf32>
    %413 = vector.broadcast %412 : vector<16x1xf32> to vector<16x32xf32>
    %414 = arith.mulf %409, %413 : vector<16x32xf32>
    %415 = vector.shape_cast %394 : vector<32xf32> to vector<1x32xf32>
    %416 = vector.broadcast %415 : vector<1x32xf32> to vector<16x32xf32>
    %417 = arith.mulf %414, %416 : vector<16x32xf32>
    %418 = vector.shape_cast %396 : vector<32xf32> to vector<1x32xf32>
    %419 = vector.broadcast %418 : vector<1x32xf32> to vector<16x32xf32>
    %420 = arith.addf %417, %419 : vector<16x32xf32>
    %c1_158 = arith.constant 1 : index
    %c0_159 = arith.constant 0 : index
    %c0_160 = arith.constant 0 : index
    %421 = vector.load %arg10[%c1_158, %c0_159, %c0_160] : memref<2x32x32xf32, #tpu.memory_space<vmem>>, vector<1x32x32xf32>
    %422 = vector.shape_cast %421 : vector<1x32x32xf32> to vector<32x32xf32>
    %cst_161 = arith.constant dense<0.000000e+00> : vector<16x32xf32>
    %423 = tpu.matmul %420, %422, %cst_161 {dimension_numbers = #tpu.dot_dimension_numbers<[1], [0], [0], [1], [0, 0, 1, 1], [], []>} : vector<16x32xf32>, vector<32x32xf32>, vector<16x32xf32> -> vector<16x32xf32>
    %c1_162 = arith.constant 1 : index
    %c0_163 = arith.constant 0 : index
    %c0_164 = arith.constant 0 : index
    %424 = vector.load %arg11[%c1_162, %c0_163, %c0_164] : memref<2x1x32xf32, #tpu.memory_space<vmem>>, vector<1x1x32xf32>
    %425 = vector.shape_cast %424 : vector<1x1x32xf32> to vector<1x32xf32>
    %426 = vector.broadcast %425 : vector<1x32xf32> to vector<16x32xf32>
    %427 = arith.addf %423, %426 : vector<16x32xf32>
    %c1_165 = arith.constant 1 : index
    %c0_166 = arith.constant 0 : index
    %c0_167 = arith.constant 0 : index
    %428 = vector.load %arg12[%c1_165, %c0_166, %c0_167] : memref<2x32x64xf32, #tpu.memory_space<vmem>>, vector<1x32x64xf32>
    %429 = vector.shape_cast %428 : vector<1x32x64xf32> to vector<32x64xf32>
    %cst_168 = arith.constant dense<0.000000e+00> : vector<32x64xf32>
    %430 = tpu.matmul %3, %429, %cst_168 {dimension_numbers = #tpu.dot_dimension_numbers<[1], [0], [0], [1], [0, 0, 1, 1], [], []>} : vector<32x32xf32>, vector<32x64xf32>, vector<32x64xf32> -> vector<32x64xf32>
    %c1_169 = arith.constant 1 : index
    %c0_170 = arith.constant 0 : index
    %c0_171 = arith.constant 0 : index
    %431 = vector.load %arg13[%c1_169, %c0_170, %c0_171] : memref<2x1x64xf32, #tpu.memory_space<vmem>>, vector<1x1x64xf32>
    %432 = vector.shape_cast %431 : vector<1x1x64xf32> to vector<1x64xf32>
    %433 = vector.broadcast %432 : vector<1x64xf32> to vector<32x64xf32>
    %434 = arith.addf %430, %433 : vector<32x64xf32>
    %435 = vector.shape_cast %427 : vector<16x32xf32> to vector<2x8x32xf32>
    %436 = vector.extract_strided_slice %435 {offsets = [0, 0, 0], sizes = [2, 8, 8], strides = [1, 1, 1]} : vector<2x8x32xf32> to vector<2x8x8xf32>
    %437 = vector.extract_strided_slice %435 {offsets = [0, 0, 8], sizes = [2, 8, 8], strides = [1, 1, 1]} : vector<2x8x32xf32> to vector<2x8x8xf32>
    %438 = vector.extract_strided_slice %435 {offsets = [0, 0, 16], sizes = [2, 8, 8], strides = [1, 1, 1]} : vector<2x8x32xf32> to vector<2x8x8xf32>
    %439 = vector.extract_strided_slice %435 {offsets = [0, 0, 24], sizes = [2, 8, 8], strides = [1, 1, 1]} : vector<2x8x32xf32> to vector<2x8x8xf32>
    %440 = vector.shape_cast %436 : vector<2x8x8xf32> to vector<2x1x8x8xf32>
    %441 = vector.shape_cast %437 : vector<2x8x8xf32> to vector<2x1x8x8xf32>
    %442 = vector.shape_cast %438 : vector<2x8x8xf32> to vector<2x1x8x8xf32>
    %443 = vector.shape_cast %439 : vector<2x8x8xf32> to vector<2x1x8x8xf32>
    %444 = tpu.concatenate %440, %441, %442, %443 in 1 : vector<2x1x8x8xf32>, vector<2x1x8x8xf32>, vector<2x1x8x8xf32>, vector<2x1x8x8xf32> -> vector<2x4x8x8xf32>
    %445 = vector.shape_cast %444 : vector<2x4x8x8xf32> to vector<8x8x8xf32>
    %446 = vector.extract_strided_slice %434 {offsets = [0, 0], sizes = [32, 32], strides = [1, 1]} : vector<32x64xf32> to vector<32x32xf32>
    %447 = vector.shape_cast %446 : vector<32x32xf32> to vector<2x16x32xf32>
    %448 = vector.extract_strided_slice %447 {offsets = [0, 0, 0], sizes = [2, 16, 8], strides = [1, 1, 1]} : vector<2x16x32xf32> to vector<2x16x8xf32>
    %449 = vector.extract_strided_slice %447 {offsets = [0, 0, 8], sizes = [2, 16, 8], strides = [1, 1, 1]} : vector<2x16x32xf32> to vector<2x16x8xf32>
    %450 = vector.extract_strided_slice %447 {offsets = [0, 0, 16], sizes = [2, 16, 8], strides = [1, 1, 1]} : vector<2x16x32xf32> to vector<2x16x8xf32>
    %451 = vector.extract_strided_slice %447 {offsets = [0, 0, 24], sizes = [2, 16, 8], strides = [1, 1, 1]} : vector<2x16x32xf32> to vector<2x16x8xf32>
    %452 = vector.shape_cast %448 : vector<2x16x8xf32> to vector<2x1x16x8xf32>
    %453 = vector.shape_cast %449 : vector<2x16x8xf32> to vector<2x1x16x8xf32>
    %454 = vector.shape_cast %450 : vector<2x16x8xf32> to vector<2x1x16x8xf32>
    %455 = vector.shape_cast %451 : vector<2x16x8xf32> to vector<2x1x16x8xf32>
    %456 = tpu.concatenate %452, %453, %454, %455 in 1 : vector<2x1x16x8xf32>, vector<2x1x16x8xf32>, vector<2x1x16x8xf32>, vector<2x1x16x8xf32> -> vector<2x4x16x8xf32>
    %457 = vector.shape_cast %456 : vector<2x4x16x8xf32> to vector<8x16x8xf32>
    %458 = vector.extract_strided_slice %434 {offsets = [0, 32], sizes = [32, 32], strides = [1, 1]} : vector<32x64xf32> to vector<32x32xf32>
    %459 = vector.shape_cast %458 : vector<32x32xf32> to vector<2x16x32xf32>
    %460 = vector.extract_strided_slice %459 {offsets = [0, 0, 0], sizes = [2, 16, 8], strides = [1, 1, 1]} : vector<2x16x32xf32> to vector<2x16x8xf32>
    %461 = vector.extract_strided_slice %459 {offsets = [0, 0, 8], sizes = [2, 16, 8], strides = [1, 1, 1]} : vector<2x16x32xf32> to vector<2x16x8xf32>
    %462 = vector.extract_strided_slice %459 {offsets = [0, 0, 16], sizes = [2, 16, 8], strides = [1, 1, 1]} : vector<2x16x32xf32> to vector<2x16x8xf32>
    %463 = vector.extract_strided_slice %459 {offsets = [0, 0, 24], sizes = [2, 16, 8], strides = [1, 1, 1]} : vector<2x16x32xf32> to vector<2x16x8xf32>
    %464 = vector.shape_cast %460 : vector<2x16x8xf32> to vector<2x1x16x8xf32>
    %465 = vector.shape_cast %461 : vector<2x16x8xf32> to vector<2x1x16x8xf32>
    %466 = vector.shape_cast %462 : vector<2x16x8xf32> to vector<2x1x16x8xf32>
    %467 = vector.shape_cast %463 : vector<2x16x8xf32> to vector<2x1x16x8xf32>
    %468 = tpu.concatenate %464, %465, %466, %467 in 1 : vector<2x1x16x8xf32>, vector<2x1x16x8xf32>, vector<2x1x16x8xf32>, vector<2x1x16x8xf32> -> vector<2x4x16x8xf32>
    %469 = vector.shape_cast %468 : vector<2x4x16x8xf32> to vector<8x16x8xf32>
    "tpu.trace_start"() <{level = 10 : i32, message = "bqd,bkd->bqk"}> : () -> ()
    %cst_172 = arith.constant dense<0.000000e+00> : vector<8x8x16xf32>
    %470 = tpu.matmul %445, %457, %cst_172 {dimension_numbers = #tpu.dot_dimension_numbers<[2], [2], [1], [1], [0, 0, 0, 1, 1, 1], [0], [0]>} : vector<8x8x8xf32>, vector<8x16x8xf32>, vector<8x8x16xf32> -> vector<8x8x16xf32>
    "tpu.trace_stop"() : () -> ()
    %cst_173 = arith.constant 0.353553385 : f32
    %471 = vector.broadcast %cst_173 : f32 to vector<8x8x16xf32>
    %472 = arith.mulf %470, %471 : vector<8x8x16xf32>
    %473 = arith.addf %472, %23 : vector<8x8x16xf32>
    %cst_174 = arith.constant dense<0xFF800000> : vector<8x8xf32>
    %474 = vector.multi_reduction <maximumf>, %473, %cst_174 [2] : vector<8x8x16xf32> to vector<8x8xf32>
    %475 = vector.shape_cast %474 : vector<8x8xf32> to vector<8x8x1xf32>
    %476 = vector.broadcast %475 : vector<8x8x1xf32> to vector<8x8x16xf32>
    %477 = arith.subf %473, %476 : vector<8x8x16xf32>
    %478 = math.exp %477 : vector<8x8x16xf32>
    %cst_175 = arith.constant dense<0.000000e+00> : vector<8x8xf32>
    %479 = vector.multi_reduction <add>, %478, %cst_175 [2] : vector<8x8x16xf32> to vector<8x8xf32>
    %480 = vector.shape_cast %479 : vector<8x8xf32> to vector<8x8x1xf32>
    %481 = vector.broadcast %480 : vector<8x8x1xf32> to vector<8x8x16xf32>
    %482 = arith.divf %478, %481 : vector<8x8x16xf32>
    %483 = vector.shape_cast %482 : vector<8x8x16xf32> to vector<2x4x8x16xf32>
    %c0_176 = arith.constant 0 : index
    %c4_177 = arith.constant 4 : index
    %c0_178 = arith.constant 0 : index
    %c0_179 = arith.constant 0 : index
    %484 = vector.load %arg24[%c0_176, %c4_177, %c0_178, %c0_179] : memref<2x8x8x16xf32, #tpu.memory_space<vmem>>, vector<2x4x8x16xf32>
    tpu.vector_store %arg24[%c0_176, %c4_177, %c0_178, %c0_179], %483 {strides = array<i32>} : memref<2x8x8x16xf32, #tpu.memory_space<vmem>>, vector<2x4x8x16xf32>,
    "tpu.trace_start"() <{level = 10 : i32, message = "bqk,bkd->bqd"}> : () -> ()
    %cst_180 = arith.constant dense<0.000000e+00> : vector<8x8x8xf32>
    %485 = tpu.matmul %482, %469, %cst_180 {dimension_numbers = #tpu.dot_dimension_numbers<[2], [1], [1], [2], [0, 0, 0, 1, 1, 2], [0], [0]>} : vector<8x8x16xf32>, vector<8x16x8xf32>, vector<8x8x8xf32> -> vector<8x8x8xf32>
    "tpu.trace_stop"() : () -> ()
    %486 = vector.shape_cast %485 : vector<8x8x8xf32> to vector<2x4x8x8xf32>
    %487 = vector.extract_strided_slice %486 {offsets = [0, 0, 0, 0], sizes = [2, 1, 8, 8], strides = [1, 1, 1, 1]} : vector<2x4x8x8xf32> to vector<2x1x8x8xf32>
    %488 = vector.shape_cast %487 : vector<2x1x8x8xf32> to vector<2x8x8xf32>
    %489 = vector.extract_strided_slice %486 {offsets = [0, 1, 0, 0], sizes = [2, 1, 8, 8], strides = [1, 1, 1, 1]} : vector<2x4x8x8xf32> to vector<2x1x8x8xf32>
    %490 = vector.shape_cast %489 : vector<2x1x8x8xf32> to vector<2x8x8xf32>
    %491 = vector.extract_strided_slice %486 {offsets = [0, 2, 0, 0], sizes = [2, 1, 8, 8], strides = [1, 1, 1, 1]} : vector<2x4x8x8xf32> to vector<2x1x8x8xf32>
    %492 = vector.shape_cast %491 : vector<2x1x8x8xf32> to vector<2x8x8xf32>
    %493 = vector.extract_strided_slice %486 {offsets = [0, 3, 0, 0], sizes = [2, 1, 8, 8], strides = [1, 1, 1, 1]} : vector<2x4x8x8xf32> to vector<2x1x8x8xf32>
    %494 = vector.shape_cast %493 : vector<2x1x8x8xf32> to vector<2x8x8xf32>
    %495 = tpu.concatenate %488, %490, %492, %494 in 2 : vector<2x8x8xf32>, vector<2x8x8xf32>, vector<2x8x8xf32>, vector<2x8x8xf32> -> vector<2x8x32xf32>
    %496 = vector.shape_cast %495 : vector<2x8x32xf32> to vector<16x32xf32>
    %c1_181 = arith.constant 1 : index
    %c0_182 = arith.constant 0 : index
    %c0_183 = arith.constant 0 : index
    %497 = vector.load %arg14[%c1_181, %c0_182, %c0_183] : memref<2x32x32xf32, #tpu.memory_space<vmem>>, vector<1x32x32xf32>
    %498 = vector.shape_cast %497 : vector<1x32x32xf32> to vector<32x32xf32>
    %cst_184 = arith.constant dense<0.000000e+00> : vector<16x32xf32>
    %499 = tpu.matmul %496, %498, %cst_184 {dimension_numbers = #tpu.dot_dimension_numbers<[1], [0], [0], [1], [0, 0, 1, 1], [], []>} : vector<16x32xf32>, vector<32x32xf32>, vector<16x32xf32> -> vector<16x32xf32>
    %500 = arith.addf %392, %499 : vector<16x32xf32>
    %c1_185 = arith.constant 1 : index
    %c0_186 = arith.constant 0 : index
    %c0_187 = arith.constant 0 : index
    %501 = vector.load %arg15[%c1_185, %c0_186, %c0_187] : memref<2x1x32xf32, #tpu.memory_space<vmem>>, vector<1x1x32xf32>
    %502 = vector.shape_cast %501 : vector<1x1x32xf32> to vector<1x32xf32>
    %503 = vector.broadcast %502 : vector<1x32xf32> to vector<16x32xf32>
    %504 = arith.addf %500, %503 : vector<16x32xf32>
    %c5 = arith.constant 5 : index
    %c0_188 = arith.constant 0 : index
    %c0_189 = arith.constant 0 : index
    %505 = vector.load %arg5[%c5, %c0_188, %c0_189] : memref<6x2x32xf32, #tpu.memory_space<vmem>>, vector<1x1x32xf32>
    %506 = vector.shape_cast %505 : vector<1x1x32xf32> to vector<32xf32>
    %c5_190 = arith.constant 5 : index
    %c1_191 = arith.constant 1 : index
    %c0_192 = arith.constant 0 : index
    %507 = vector.load %arg5[%c5_190, %c1_191, %c0_192] : memref<6x2x32xf32, #tpu.memory_space<vmem>>, vector<1x1x32xf32>
    %508 = vector.shape_cast %507 : vector<1x1x32xf32> to vector<32xf32>
    %cst_193 = arith.constant dense<0.000000e+00> : vector<16xf32>
    %509 = vector.multi_reduction <add>, %504, %cst_193 [1] : vector<16x32xf32> to vector<16xf32>
    %510 = vector.shape_cast %509 : vector<16xf32> to vector<16x1xf32>
    %cst_194 = arith.constant 3.200000e+01 : f32
    %511 = vector.broadcast %cst_194 : f32 to vector<16x1xf32>
    %512 = arith.divf %510, %511 : vector<16x1xf32>
    %513 = vector.broadcast %512 : vector<16x1xf32> to vector<16x32xf32>
    %514 = arith.subf %504, %513 : vector<16x32xf32>
    %515 = arith.mulf %514, %514 : vector<16x32xf32>
    %cst_195 = arith.constant dense<0.000000e+00> : vector<16xf32>
    %516 = vector.multi_reduction <add>, %515, %cst_195 [1] : vector<16x32xf32> to vector<16xf32>
    %517 = vector.shape_cast %516 : vector<16xf32> to vector<16x1xf32>
    %cst_196 = arith.constant 3.200000e+01 : f32
    %518 = vector.broadcast %cst_196 : f32 to vector<16x1xf32>
    %519 = arith.divf %517, %518 : vector<16x1xf32>
    %520 = vector.broadcast %512 : vector<16x1xf32> to vector<16x32xf32>
    %521 = arith.subf %504, %520 : vector<16x32xf32>
    %cst_197 = arith.constant 9.99999997E-7 : f32
    %522 = vector.broadcast %cst_197 : f32 to vector<16x1xf32>
    %523 = arith.addf %519, %522 : vector<16x1xf32>
    %524 = math.rsqrt %523 : vector<16x1xf32>
    %525 = vector.broadcast %524 : vector<16x1xf32> to vector<16x32xf32>
    %526 = arith.mulf %521, %525 : vector<16x32xf32>
    %527 = vector.shape_cast %506 : vector<32xf32> to vector<1x32xf32>
    %528 = vector.broadcast %527 : vector<1x32xf32> to vector<16x32xf32>
    %529 = arith.mulf %526, %528 : vector<16x32xf32>
    %530 = vector.shape_cast %508 : vector<32xf32> to vector<1x32xf32>
    %531 = vector.broadcast %530 : vector<1x32xf32> to vector<16x32xf32>
    %532 = arith.addf %529, %531 : vector<16x32xf32>
    %c1_198 = arith.constant 1 : index
    %c0_199 = arith.constant 0 : index
    %c0_200 = arith.constant 0 : index
    %533 = vector.load %arg16[%c1_198, %c0_199, %c0_200] : memref<2x32x64xf32, #tpu.memory_space<vmem>>, vector<1x32x64xf32>
    %534 = vector.shape_cast %533 : vector<1x32x64xf32> to vector<32x64xf32>
    %cst_201 = arith.constant dense<0.000000e+00> : vector<16x64xf32>
    %535 = tpu.matmul %532, %534, %cst_201 {dimension_numbers = #tpu.dot_dimension_numbers<[1], [0], [0], [1], [0, 0, 1, 1], [], []>} : vector<16x32xf32>, vector<32x64xf32>, vector<16x64xf32> -> vector<16x64xf32>
    %c1_202 = arith.constant 1 : index
    %c0_203 = arith.constant 0 : index
    %c0_204 = arith.constant 0 : index
    %536 = vector.load %arg17[%c1_202, %c0_203, %c0_204] : memref<2x1x64xf32, #tpu.memory_space<vmem>>, vector<1x1x64xf32>
    %537 = vector.shape_cast %536 : vector<1x1x64xf32> to vector<1x64xf32>
    %538 = vector.broadcast %537 : vector<1x64xf32> to vector<16x64xf32>
    %539 = arith.addf %535, %538 : vector<16x64xf32>
    %cst_205 = arith.constant 0.000000e+00 : f32
    %540 = vector.broadcast %cst_205 : f32 to vector<16x64xf32>
    %541 = arith.maximumf %539, %540 : vector<16x64xf32>
    %c1_206 = arith.constant 1 : index
    %c0_207 = arith.constant 0 : index
    %c0_208 = arith.constant 0 : index
    %542 = vector.load %arg18[%c1_206, %c0_207, %c0_208] : memref<2x64x32xf32, #tpu.memory_space<vmem>>, vector<1x64x32xf32>
    %543 = vector.shape_cast %542 : vector<1x64x32xf32> to vector<64x32xf32>
    %cst_209 = arith.constant dense<0.000000e+00> : vector<16x32xf32>
    %544 = tpu.matmul %541, %543, %cst_209 {dimension_numbers = #tpu.dot_dimension_numbers<[1], [0], [0], [1], [0, 0, 1, 1], [], []>} : vector<16x64xf32>, vector<64x32xf32>, vector<16x32xf32> -> vector<16x32xf32>
    %545 = arith.addf %504, %544 : vector<16x32xf32>
    %c1_210 = arith.constant 1 : index
    %c0_211 = arith.constant 0 : index
    %c0_212 = arith.constant 0 : index
    %546 = vector.load %arg19[%c1_210, %c0_211, %c0_212] : memref<2x1x32xf32, #tpu.memory_space<vmem>>, vector<1x1x32xf32>
    %547 = vector.shape_cast %546 : vector<1x1x32xf32> to vector<1x32xf32>
    %548 = vector.broadcast %547 : vector<1x32xf32> to vector<16x32xf32>
    %549 = arith.addf %545, %548 : vector<16x32xf32>
    %c0_213 = arith.constant 0 : index
    %c0_214 = arith.constant 0 : index
    %550 = vector.load %arg20[%c0_213, %c0_214] : memref<1x32xf32, #tpu.memory_space<vmem>>, vector<1x32xf32>
    %c0_215 = arith.constant 0 : index
    %c0_216 = arith.constant 0 : index
    %551 = vector.load %arg21[%c0_215, %c0_216] : memref<1x32xf32, #tpu.memory_space<vmem>>, vector<1x32xf32>
    %cst_217 = arith.constant dense<0.000000e+00> : vector<16xf32>
    %552 = vector.multi_reduction <add>, %549, %cst_217 [1] : vector<16x32xf32> to vector<16xf32>
    %553 = vector.shape_cast %552 : vector<16xf32> to vector<16x1xf32>
    %cst_218 = arith.constant 3.200000e+01 : f32
    %554 = vector.broadcast %cst_218 : f32 to vector<16x1xf32>
    %555 = arith.divf %553, %554 : vector<16x1xf32>
    %556 = vector.broadcast %555 : vector<16x1xf32> to vector<16x32xf32>
    %557 = arith.subf %549, %556 : vector<16x32xf32>
    %558 = arith.mulf %557, %557 : vector<16x32xf32>
    %cst_219 = arith.constant dense<0.000000e+00> : vector<16xf32>
    %559 = vector.multi_reduction <add>, %558, %cst_219 [1] : vector<16x32xf32> to vector<16xf32>
    %560 = vector.shape_cast %559 : vector<16xf32> to vector<16x1xf32>
    %cst_220 = arith.constant 3.200000e+01 : f32
    %561 = vector.broadcast %cst_220 : f32 to vector<16x1xf32>
    %562 = arith.divf %560, %561 : vector<16x1xf32>
    %563 = vector.broadcast %555 : vector<16x1xf32> to vector<16x32xf32>
    %564 = arith.subf %549, %563 : vector<16x32xf32>
    %cst_221 = arith.constant 9.99999974E-6 : f32
    %565 = vector.broadcast %cst_221 : f32 to vector<16x1xf32>
    %566 = arith.addf %562, %565 : vector<16x1xf32>
    %567 = math.rsqrt %566 : vector<16x1xf32>
    %568 = vector.broadcast %567 : vector<16x1xf32> to vector<16x32xf32>
    %569 = arith.mulf %564, %568 : vector<16x32xf32>
    %570 = vector.broadcast %550 : vector<1x32xf32> to vector<16x32xf32>
    %571 = arith.mulf %569, %570 : vector<16x32xf32>
    %572 = vector.broadcast %551 : vector<1x32xf32> to vector<16x32xf32>
    %573 = arith.addf %571, %572 : vector<16x32xf32>
    %574 = vector.shape_cast %573 : vector<16x32xf32> to vector<2x8x32xf32>
    %c0_222 = arith.constant 0 : index
    %c0_223 = arith.constant 0 : index
    %c0_224 = arith.constant 0 : index
    %575 = vector.load %arg22[%c0_222, %c0_223, %c0_224] : memref<2x8x32xf32, #tpu.memory_space<vmem>>, vector<2x8x32xf32>
    tpu.vector_store %arg22[%c0_222, %c0_223, %c0_224], %574 {strides = array<i32>} : memref<2x8x32xf32, #tpu.memory_space<vmem>>, vector<2x8x32xf32>,
    return
  }
  func.func @transform_0(%arg0: i32) -> (i32, i32, i32) {
    %c0_i32 = arith.constant 0 : i32
    %c0_i32_0 = arith.constant 0 : i32
    %c0_i32_1 = arith.constant 0 : i32
    return %arg0, %c0_i32, %c0_i32_0 : i32, i32, i32
  }
  func.func @transform_1(%arg0: i32) -> (i32, i32, i32) {
    %c0_i32 = arith.constant 0 : i32
    %c0_i32_0 = arith.constant 0 : i32
    %c0_i32_1 = arith.constant 0 : i32
    return %arg0, %c0_i32, %c0_i32_0 : i32, i32, i32
  }
  func.func @transform_2(%arg0: i32) -> (i32, i32, i32) {
    %c0_i32 = arith.constant 0 : i32
    %c0_i32_0 = arith.constant 0 : i32
    %c0_i32_1 = arith.constant 0 : i32
    return %arg0, %c0_i32, %c0_i32_0 : i32, i32, i32
  }
  func.func @transform_3(%arg0: i32) -> (i32, i32, i32) {
    %c0_i32 = arith.constant 0 : i32
    %c0_i32_0 = arith.constant 0 : i32
    %c0_i32_1 = arith.constant 0 : i32
    return %arg0, %c0_i32, %c0_i32_0 : i32, i32, i32
  }
  func.func @transform_4(%arg0: i32) -> (i32, i32, i32) {
    %c0_i32 = arith.constant 0 : i32
    %c0_i32_0 = arith.constant 0 : i32
    %c0_i32_1 = arith.constant 0 : i32
    %c0_i32_2 = arith.constant 0 : i32
    return %c0_i32, %c0_i32_0, %c0_i32_1 : i32, i32, i32
  }
  func.func @transform_5(%arg0: i32) -> (i32, i32, i32) {
    %c0_i32 = arith.constant 0 : i32
    %c0_i32_0 = arith.constant 0 : i32
    %c0_i32_1 = arith.constant 0 : i32
    %c0_i32_2 = arith.constant 0 : i32
    return %c0_i32, %c0_i32_0, %c0_i32_1 : i32, i32, i32
  }
  func.func @transform_6(%arg0: i32) -> (i32, i32, i32) {
    %c0_i32 = arith.constant 0 : i32
    %c0_i32_0 = arith.constant 0 : i32
    %c0_i32_1 = arith.constant 0 : i32
    %c0_i32_2 = arith.constant 0 : i32
    return %c0_i32, %c0_i32_0, %c0_i32_1 : i32, i32, i32
  }
  func.func @transform_7(%arg0: i32) -> (i32, i32, i32) {
    %c0_i32 = arith.constant 0 : i32
    %c0_i32_0 = arith.constant 0 : i32
    %c0_i32_1 = arith.constant 0 : i32
    %c0_i32_2 = arith.constant 0 : i32
    return %c0_i32, %c0_i32_0, %c0_i32_1 : i32, i32, i32
  }
  func.func @transform_8(%arg0: i32) -> (i32, i32, i32) {
    %c0_i32 = arith.constant 0 : i32
    %c0_i32_0 = arith.constant 0 : i32
    %c0_i32_1 = arith.constant 0 : i32
    %c0_i32_2 = arith.constant 0 : i32
    return %c0_i32, %c0_i32_0, %c0_i32_1 : i32, i32, i32
  }
  func.func @transform_9(%arg0: i32) -> (i32, i32, i32) {
    %c0_i32 = arith.constant 0 : i32
    %c0_i32_0 = arith.constant 0 : i32
    %c0_i32_1 = arith.constant 0 : i32
    %c0_i32_2 = arith.constant 0 : i32
    return %c0_i32, %c0_i32_0, %c0_i32_1 : i32, i32, i32
  }
  func.func @transform_10(%arg0: i32) -> (i32, i32, i32) {
    %c0_i32 = arith.constant 0 : i32
    %c0_i32_0 = arith.constant 0 : i32
    %c0_i32_1 = arith.constant 0 : i32
    %c0_i32_2 = arith.constant 0 : i32
    return %c0_i32, %c0_i32_0, %c0_i32_1 : i32, i32, i32
  }
  func.func @transform_11(%arg0: i32) -> (i32, i32, i32) {
    %c0_i32 = arith.constant 0 : i32
    %c0_i32_0 = arith.constant 0 : i32
    %c0_i32_1 = arith.constant 0 : i32
    %c0_i32_2 = arith.constant 0 : i32
    return %c0_i32, %c0_i32_0, %c0_i32_1 : i32, i32, i32
  }
  func.func @transform_12(%arg0: i32) -> (i32, i32, i32) {
    %c0_i32 = arith.constant 0 : i32
    %c0_i32_0 = arith.constant 0 : i32
    %c0_i32_1 = arith.constant 0 : i32
    %c0_i32_2 = arith.constant 0 : i32
    return %c0_i32, %c0_i32_0, %c0_i32_1 : i32, i32, i32
  }
  func.func @transform_13(%arg0: i32) -> (i32, i32, i32) {
    %c0_i32 = arith.constant 0 : i32
    %c0_i32_0 = arith.constant 0 : i32
    %c0_i32_1 = arith.constant 0 : i32
    %c0_i32_2 = arith.constant 0 : i32
    return %c0_i32, %c0_i32_0, %c0_i32_1 : i32, i32, i32
  }
  func.func @transform_14(%arg0: i32) -> (i32, i32, i32) {
    %c0_i32 = arith.constant 0 : i32
    %c0_i32_0 = arith.constant 0 : i32
    %c0_i32_1 = arith.constant 0 : i32
    %c0_i32_2 = arith.constant 0 : i32
    return %c0_i32, %c0_i32_0, %c0_i32_1 : i32, i32, i32
  }
  func.func @transform_15(%arg0: i32) -> (i32, i32, i32) {
    %c0_i32 = arith.constant 0 : i32
    %c0_i32_0 = arith.constant 0 : i32
    %c0_i32_1 = arith.constant 0 : i32
    %c0_i32_2 = arith.constant 0 : i32
    return %c0_i32, %c0_i32_0, %c0_i32_1 : i32, i32, i32
  }
  func.func @transform_16(%arg0: i32) -> (i32, i32, i32) {
    %c0_i32 = arith.constant 0 : i32
    %c0_i32_0 = arith.constant 0 : i32
    %c0_i32_1 = arith.constant 0 : i32
    %c0_i32_2 = arith.constant 0 : i32
    return %c0_i32, %c0_i32_0, %c0_i32_1 : i32, i32, i32
  }
  func.func @transform_17(%arg0: i32) -> (i32, i32, i32) {
    %c0_i32 = arith.constant 0 : i32
    %c0_i32_0 = arith.constant 0 : i32
    %c0_i32_1 = arith.constant 0 : i32
    %c0_i32_2 = arith.constant 0 : i32
    return %c0_i32, %c0_i32_0, %c0_i32_1 : i32, i32, i32
  }
  func.func @transform_18(%arg0: i32) -> (i32, i32, i32) {
    %c0_i32 = arith.constant 0 : i32
    %c0_i32_0 = arith.constant 0 : i32
    %c0_i32_1 = arith.constant 0 : i32
    %c0_i32_2 = arith.constant 0 : i32
    return %c0_i32, %c0_i32_0, %c0_i32_1 : i32, i32, i32
  }
  func.func @transform_19(%arg0: i32) -> (i32, i32) {
    %c0_i32 = arith.constant 0 : i32
    %c0_i32_0 = arith.constant 0 : i32
    %c0_i32_1 = arith.constant 0 : i32
    return %c0_i32, %c0_i32_0 : i32, i32
  }
  func.func @transform_20(%arg0: i32) -> (i32, i32) {
    %c0_i32 = arith.constant 0 : i32
    %c0_i32_0 = arith.constant 0 : i32
    %c0_i32_1 = arith.constant 0 : i32
    return %c0_i32, %c0_i32_0 : i32, i32
  }
  func.func @transform_21(%arg0: i32) -> (i32, i32, i32) {
    %c0_i32 = arith.constant 0 : i32
    %c0_i32_0 = arith.constant 0 : i32
    %c0_i32_1 = arith.constant 0 : i32
    return %arg0, %c0_i32, %c0_i32_0 : i32, i32, i32
  }
  func.func @transform_22(%arg0: i32) -> (i32, i32, i32, i32) {
    %c0_i32 = arith.constant 0 : i32
    %c0_i32_0 = arith.constant 0 : i32
    %c0_i32_1 = arith.constant 0 : i32
    %c0_i32_2 = arith.constant 0 : i32
    return %arg0, %c0_i32, %c0_i32_0, %c0_i32_1 : i32, i32, i32, i32
  }
  func.func @transform_23(%arg0: i32) -> (i32, i32, i32, i32) {
    %c0_i32 = arith.constant 0 : i32
    %c0_i32_0 = arith.constant 0 : i32
    %c0_i32_1 = arith.constant 0 : i32
    %c0_i32_2 = arith.constant 0 : i32
    return %arg0, %c0_i32, %c0_i32_0, %c0_i32_1 : i32, i32, i32, i32
  }
}

</mosaic_0001>

<bundles_post_ra>
// kernel: diff_transformer_decoder.1
= control target key start
LH: loop header
LB: loop body
LE: loop exit
PB: predicated region body
PF: predicated region fallthrough
CT: control target
= control target key end

     0   :  { %s10268_s0 = inlined_call_operand.vmem [shape: f32[2,8,32], index: 0, kind: input, shape index: {}]   ;;  %s10269_s1 = inlined_call_operand.vmem [shape: f32[2,16,32], index: 1, kind: input, shape index: {}]   ;;  %s10270_s2 = inlined_call_operand.vmem [shape: f32[2,1,16], index: 2, kind: input, shape index: {}]   ;;  %s10271_s3 = inlined_call_operand.vmem [shape: f32[2,8,8], index: 3, kind: input, shape index: {}]   ;;  %s10272_s4 = inlined_call_operand.vmem [shape: f32[6,2,32], index: 4, kind: input, shape index: {}]   ;;  %s10273_s5 = inlined_call_operand.vmem [shape: f32[2,32,96], index: 5, kind: input, shape index: {}]   ;;  %s10274_s6 = inlined_call_operand.vmem [shape: f32[2,1,96], index: 6, kind: input, shape index: {}]   ;;  %s10275_s7 = inlined_call_operand.vmem [shape: f32[2,32,32], index: 7, kind: input, shape index: {}]   ;;  %s10276_s8 = inlined_call_operand.vmem [shape: f32[2,1,32], index: 8, kind: input, shape index: {}]   ;;  %s10277_s9 = inlined_call_operand.vmem [shape: f32[2,32,32], index: 9, kind: input, shape index: {}]   ;;  %s10278_s10 = inlined_call_operand.vmem [shape: f32[2,1,32], index: 10, kind: input, shape index: {}]   ;;  %s10279_s11 = inlined_call_operand.vmem [shape: f32[2,32,64], index: 11, kind: input, shape index: {}]   ;;  %s10280_s12 = inlined_call_operand.vmem [shape: f32[2,1,64], index: 12, kind: input, shape index: {}]   ;;  %s10281_s13 = inlined_call_operand.vmem [shape: f32[2,32,32], index: 13, kind: input, shape index: {}]   ;;  %s10282_s14 = inlined_call_operand.vmem [shape: f32[2,1,32], index: 14, kind: input, shape index: {}]   ;;  %s10283_s15 = inlined_call_operand.vmem [shape: f32[2,32,64], index: 15, kind: input, shape index: {}]   ;;  %s10284_s16 = inlined_call_operand.vmem [shape: f32[2,1,64], index: 16, kind: input, shape index: {}]   ;;  %s10285_s17 = inlined_call_operand.vmem [shape: f32[2,64,32], index: 17, kind: input, shape index: {}]   ;;  %s10286_s18 = inlined_call_operand.vmem [shape: f32[2,1,32], index: 18, kind: input, shape index: {}]   ;;  %s10287_s19 = inlined_call_operand.vmem [shape: f32[1,32], index: 19, kind: input, shape index: {}]   ;;  %s10288_s20 = inlined_call_operand.vmem [shape: f32[1,32], index: 20, kind: input, shape index: {}]   ;;  %s10289_s21 = inlined_call_operand.hbm [shape: f32[2,8,32], index: 21, kind: output, shape index: {0}]   ;;  %s10290_s22 = inlined_call_operand.hbm [shape: f32[2,8,8,8], index: 22, kind: output, shape index: {1}]   ;;  %s10291_s23 = inlined_call_operand.hbm [shape: f32[2,8,8,16], index: 23, kind: output, shape index: {2}]  }
   0x1   :  { %10316 = sst [smem:[#allocation9_spill]] %s10268_s0 }
   0x2   :  { %10317 = sst [smem:[#allocation10_spill]] %s10269_s1 }
   0x3   :  { %10318 = sst [smem:[#allocation11_spill]] %s10270_s2 }
   0x4   :  { %10319 = sst [smem:[#allocation12_spill]] %s10271_s3 }
   0x5   :  { %10320 = sst [smem:[#allocation13_spill]] %s10272_s4 }
   0x6   :  { %10321 = sst [smem:[#allocation14_spill]] %s10273_s5 }
   0x7   :  { %10322 = sst [smem:[#allocation15_spill]] %s10274_s6 }
   0x8   :  { %10323 = sst [smem:[#allocation16_spill]] %s10275_s7 }
   0x9   :  { %10324 = sst [smem:[#allocation17_spill]] %s10287_s19 }
   0xa   :  { %10325 = sst [smem:[#allocation18_spill]] %s10288_s20 }
   0xb   :  { %10326 = sst [smem:[#allocation19_spill]] %s10289_s21 }
   0xc   :  { %29 = vsyncpa [#allocation3], 0  ;;  %s10327_s24 = sld [smem:[#allocation9_spill]]  ;;  %vm105_vm0 = vcmask 261120  }
  0x12   :  { %v8811_v0 = vld [vmem:[%s10327_s24] sm:$0xff]  ;;  %v8816_v1 = vld [vmem:[%s10327_s24 + $0x8] sm:$0xff] }
  0x13   :  { %30 = vsyncpa [#allocation5], 0  ;;  %v106_v2 = vsel %vm105_vm0, %v8811_v0, 0.0  ;;  %v109_v3 = vsel %vm105_vm0, %v8816_v1, 0.0  ;;  %s10328_s2 = sld [smem:[#allocation14_spill]]  ;;  %v8674_v34 = vmov 0.0  }
  0x14   :  { %107 = vadd.xlane.f32.xlu0 %v106_v2  ;;  %s10329_s30 = sld [smem:[#allocation13_spill]]  ;;  %7897 = vmatprep.subr.mxu0 %v8674_v34  ;;  %vm8675_vm1 = vmmov 0   ;;  %s10310_s6 = smov 112   ;;  %vm253_vm2 = vcmask 64512   ;;  %vm1606_vm5 = vcmask 130048   ;;  %vm1609_vm6 = vcmask 195584  }
  0x15   :  { %s10330_s26 = sld [smem:[#allocation15_spill]]  ;;  %7899 = vmatprep.mubr.msk.f32.mxu0 %vm8675_vm1, %v8674_v34  ;;  %s10314_s27 = smov 120   ;;  %vm3612_vm9 = vcmask 523264  }
  0x16   :  { %s10312_s7 = smov 104   ;;  %s10302_s28 = smov 96  }
  0x17   :  { %s10331_s0 = sld [smem:[#allocation12_spill]]  ;;  %s10300_s25 = smov 64  }
  0x18   :  { %110 = vadd.xlane.f32.xlu0 %v109_v3  ;;  %s10332_s29 = sld [smem:[#allocation16_spill]]  ;;  %s10308_s4 = smov 8  }
  0x19   :  { %v148_v14 = vld [vmem:[%s10328_s2 + $0x18] sm:$0xff]  ;;  %v147_v15 = vld [vmem:[%s10328_s2 + $0x10] sm:$0xff]  ;;  %v146_v16 = vld [vmem:[%s10328_s2 + $0x8] sm:$0xff]  ;;  %s10306_s1 = smov 16   ;;  %s10336_s24 = smov 96  }
  0x1a   :  { %7876 = vmatprep.subr.mxu1 %v148_v14  ;;  %v145_v17 = vld [vmem:[%s10328_s2] sm:$0xff]  ;;  %s10341_s19 = smov 104  }
  0x1b   :  { %7877 = vmatpush3.msra.mxu1 %v148_v14  ;;  %v7399_v25 = vld [vmem:[%s10329_s30] ss:$0 sm:$0xff]  ;;  %v7400_v27 = vld [vmem:[%s10329_s30 + $0x1] ss:$0 sm:$0xff] }
  0x1c   :  { %7878 = vmatprep.subr.mxu1 %v147_v15  ;;  %v7401_v36 = vld [vmem:[%s10330_s26] ss:$0 sm:$0xff] }
  0x1d   :  { %7879 = vmatpush3.msra.mxu1 %v147_v15  ;;  %v79_v54 = vld [vmem:[%s10331_s0] sm:$0xff]  ;;  %v80_v63 = vld [vmem:[%s10331_s0 + $0x8] sm:$0xff]  ;;  %s10340_s0 = smov 120  }
  0x1e   :  { %7880 = vmatprep.subr.mxu1 %v146_v16  ;;  %vm81_vm3 = vcmp.eq.f32.partialorder %v79_v54, 0.0  ;;  %vm82_vm4 = vcmp.eq.f32.partialorder %v80_v63, 0.0 }
  0x1f   :  { %7881 = vmatpush3.msra.mxu1 %v146_v16  ;;  %v8951_v56 = vsel %vm81_vm3, -1e+09, %v8674_v34  ;;  %v8963_v16 = vsel %vm82_vm4, -1e+09, %v8674_v34 }
  0x20   :  { %7882 = vmatprep.subr.mxu1 %v145_v17 }
  0x21   :  { %7883 = vmatpush3.msra.mxu1 %v145_v17 }
  0x22   :  { %7887 = vmatprep.subr.mxu1 %v8674_v34 }
  0x9d   :  { %v108_v4 = vpop.xlane.xlu0 %107 }
  0x9e   :  { %v113_v5 = vmul.f32 0.03125, %v108_v4 }
  0xa0   :  { %v115_v6 = vsub.f32 %v8811_v0, %v113_v5 }
  0xa1   :  { %v111_v7 = vpop.xlane.xlu0 %110 }
  0xa2   :  { %v114_v8 = vmul.f32 0.03125, %v111_v7  ;;  %v117_v9 = vmul.f32 %v115_v6, %v115_v6 }
  0xa4   :  { %v116_v10 = vsub.f32 %v8816_v1, %v114_v8  ;;  %v119_v11 = vsel %vm105_vm0, %v117_v9, 0.0 }
  0xa5   :  { %120 = vadd.xlane.f32.xlu1 %v119_v11 }
  0xa6   :  { %v118_v12 = vmul.f32 %v116_v10, %v116_v10 }
  0xa8   :  { %v122_v13 = vsel %vm105_vm0, %v118_v12, 0.0 }
  0xa9   :  { %123 = vadd.xlane.f32.xlu1 %v122_v13 }
 0x12e   :  { %v121_v18 = vpop.xlane.xlu1 %120 }
 0x12f   :  { %v125_v19 = vmul.f32 0.03125, %v121_v18 }
 0x131   :  { %v127_v20 = vadd.f32 1e-06, %v125_v19 }
 0x132   :  { %v124_v21 = vpop.xlane.xlu1 %123 }
 0x133   :  { %8450 = vrsqrt.f32 %v127_v20  ;;  %v126_v22 = vmul.f32 0.03125, %v124_v21 }
 0x135   :  { %v128_v23 = vadd.f32 1e-06, %v126_v22 }
 0x137   :  { %8452 = vrsqrt.f32 %v128_v23 }
 0x140   :  { %v8451_v24 = vpop.eup %8450 }
 0x141   :  { %v131_v26 = vmul.f32 %v8451_v24, %v115_v6 }
 0x143   :  { %v137_v28 = vmul.f32 %v7399_v25, %v131_v26 }
 0x144   :  { %v8453_v29 = vpop.eup %8452 }
 0x145   :  { %v132_v30 = vmul.f32 %v8453_v29, %v116_v10  ;;  %v143_v31 = vadd.f32 %v7400_v27, %v137_v28 }
 0x147   :  { %v138_v32 = vmul.f32 %v7399_v25, %v132_v30  ;;  %7884 = vmatprep.mubr.msk.f32.mxu1 %vm105_vm0, %v143_v31 }
 0x149   :  { %v144_v33 = vadd.f32 %v7400_v27, %v138_v32 }
 0x14b   :  { %7885 = vmatmul.mubr.msk.f32.vlgmr.msra.gmra.mxu1 %vm105_vm0, %v144_v33 }
 0x14c   :  { %7889 = vmatprep.mubr.msk.f32.mxu1 %vm8675_vm1, %v8674_v34 }
 0x20b   :  { %v7886_v35 = vpop.f32.mrf.mxu1 }
 0x20c   :  { %v8861_v39 = vadd.f32 %v7886_v35, %v7401_v36 }
 0x20d   :  { %v228_v37 = vpop.f32.mrf.mxu1 }
 0x20e   :  { %v8855_v38 = vadd.f32 %v7401_v36, %v228_v37 }
 0x210   :  { %243 = vrot.lane.b32.xlu1 %v8855_v38, %s10310_s6  ;;  %239 = vrot.lane.b32.xlu0 %v8855_v38, %s10314_s27 }
 0x214   :  { %247 = vrot.lane.b32.xlu1 %v8855_v38, %s10312_s7  ;;  %245 = vrot.lane.b32.xlu0 %v8861_v39, %s10310_s6  ;;  %s10333_s6 = sld [smem:[#allocation10_spill]] }
 0x218   :  { %241 = vrot.lane.b32.xlu1 %v8861_v39, %s10314_s27  ;;  %251 = vrot.lane.b32.xlu0 %v8855_v38, %s10302_s28 }
 0x21c   :  { %249 = vrot.lane.b32.xlu1 %v8861_v39, %s10312_s7 }
 0x282   :  { %v8873_v40 = vpop.permute.xlu1 %243  ;;  %v8875_v41 = vpop.permute.xlu0 %239 }
 0x283   :  { %404 = vrot.lane.b32.xlu0 %v8873_v40, %s10302_s28  ;;  %328 = vrot.lane.b32.xlu1 %v8875_v41, %s10302_s28 }
 0x286   :  { %v8881_v42 = vpop.permute.xlu1 %247  ;;  %v8883_v43 = vpop.permute.xlu0 %245 }
 0x287   :  { %556 = vrot.lane.b32.xlu0 %v8861_v39, %s10302_s28  ;;  %480 = vrot.lane.b32.xlu1 %v8881_v42, %s10302_s28 }
 0x28a   :  { %v8889_v44 = vpop.permute.xlu1 %241  ;;  %v252_v45 = vpop.permute.xlu0 %251 }
 0x28b   :  { %632 = vrot.lane.b32.xlu1 %v8889_v44, %s10302_s28  ;;  %708 = vrot.lane.b32.xlu0 %v8883_v43, %s10302_s28 }
 0x28c   :  { %7888 = vmatpush3.xpose.msk.msra.mxu1 %vm253_vm2, %v252_v45 }
 0x28d   :  { %7892 = vmatprep.subr.mxu1 %v8674_v34 }
 0x28e   :  { %v8897_v46 = vpop.permute.xlu1 %249 }
 0x28f   :  { %7890 = vmatmul.mubr.msk.f32.vlgmr.msra.gmra.mxu1 %vm253_vm2, %v8855_v38  ;;  %784 = vrot.lane.b32.xlu1 %v8897_v46, %s10302_s28  ;;  %s10335_s28 = sld [smem:[#allocation11_spill]] }
 0x290   :  { %7894 = vmatprep.mubr.msk.f32.mxu1 %vm8675_vm1, %v8674_v34 }
 0x2f5   :  { %v329_v47 = vpop.permute.xlu1 %328  ;;  %v405_v48 = vpop.permute.xlu0 %404 }
 0x2f6   :  { %7893 = vmatpush3.xpose.msk.msra.mxu1 %vm253_vm2, %v329_v47  ;;  %7898 = vmatpush3.xpose.msk.msra.mxu0 %vm253_vm2, %v405_v48 }
 0x2f7   :  { %7902 = vmatprep.subr.mxu1 %v8674_v34  ;;  %7907 = vmatprep.subr.mxu0 %v8674_v34 }
 0x2f9   :  { %v481_v49 = vpop.permute.xlu1 %480  ;;  %7895 = vmatmul.mubr.msk.f32.vlgmr.msra.gmra.mxu1 %vm253_vm2, %v8875_v41  ;;  %7900 = vmatmul.mubr.msk.f32.vlgmr.msra.gmra.mxu0 %vm253_vm2, %v8873_v40  ;;  %v557_v50 = vpop.permute.xlu0 %556 }
 0x2fa   :  { %7903 = vmatpush3.xpose.msk.msra.mxu1 %vm253_vm2, %v481_v49  ;;  %7908 = vmatpush3.xpose.msk.msra.mxu0 %vm253_vm2, %v557_v50 }
 0x2fb   :  { %7904 = vmatprep.mubr.msk.f32.mxu1 %vm8675_vm1, %v8674_v34  ;;  %7909 = vmatprep.mubr.msk.f32.mxu0 %vm8675_vm1, %v8674_v34 }
 0x2fc   :  { %7912 = vmatprep.subr.mxu1 %v8674_v34  ;;  %7917 = vmatprep.subr.mxu0 %v8674_v34 }
 0x2fd   :  { %v633_v51 = vpop.permute.xlu1 %632  ;;  %7905 = vmatmul.mubr.msk.f32.vlgmr.msra.gmra.mxu1 %vm253_vm2, %v8881_v42  ;;  %7910 = vmatmul.mubr.msk.f32.vlgmr.msra.gmra.mxu0 %vm253_vm2, %v8861_v39  ;;  %v709_v52 = vpop.permute.xlu0 %708 }
 0x2fe   :  { %7913 = vmatpush3.xpose.msk.msra.mxu1 %vm253_vm2, %v633_v51  ;;  %7918 = vmatpush3.xpose.msk.msra.mxu0 %vm253_vm2, %v709_v52 }
 0x2ff   :  { %7914 = vmatprep.mubr.msk.f32.mxu1 %vm8675_vm1, %v8674_v34  ;;  %7919 = vmatprep.mubr.msk.f32.mxu0 %vm8675_vm1, %v8674_v34 }
 0x300   :  { %7922 = vmatprep.subr.mxu1 %v8674_v34  ;;  %7927 = vmatprep.subr.mxu0 %v8674_v34 }
 0x301   :  { %v785_v53 = vpop.permute.xlu1 %784  ;;  %7915 = vmatmul.mubr.msk.f32.vlgmr.msra.gmra.mxu1 %vm253_vm2, %v8889_v44  ;;  %7920 = vmatmul.mubr.msk.f32.vlgmr.msra.gmra.mxu0 %vm253_vm2, %v8883_v43 }
 0x302   :  { %7923 = vmatpush3.xpose.msk.msra.mxu1 %vm253_vm2, %v785_v53  ;;  %7924 = vmatprep.mubr.msk.f32.mxu1 %vm8675_vm1, %v8674_v34 }
 0x303   :  { %7932 = vmatprep.subr.mxu1 %v8674_v34  ;;  %7929 = vmatprep.mubr.msk.f32.mxu0 %vm8675_vm1, %v8674_v34 }
 0x305   :  { %7925 = vmatmul.mubr.msk.f32.vlgmr.msra.gmra.mxu1 %vm253_vm2, %v8897_v46 }
 0x306   :  { %7934 = vmatprep.mubr.msk.f32.mxu1 %vm8675_vm1, %v8674_v34 }
 0x34f   :  { %v324_v55 = vpop.f32.mrf.mxu1 }
 0x350   :  { %v860_v57 = vmul.f32 0.35355338, %v324_v55 }
 0x351   :  { %v7891_v58 = vpop.f32.mrf.mxu1 }
 0x352   :  { %v868_v59 = vadd.f32 %v860_v57, %v8951_v56 }
 0x354   :  { %v876_v60 = vsel %vm253_vm2, %v868_v59, -inf }
 0x355   :  { %877 = vmax.xlane.f32.xlu0 %v876_v60 }
 0x3b9   :  { %v400_v61 = vpop.f32.mrf.mxu1  ;;  %v476_v62 = vpop.f32.mrf.mxu0 }
 0x3ba   :  { %v861_v2 = vmul.f32 0.35355338, %v400_v61  ;;  %v862_v3 = vmul.f32 0.35355338, %v476_v62 }
 0x3bb   :  { %v7896_v4 = vpop.f32.mrf.mxu1  ;;  %v7901_v5 = vpop.f32.mrf.mxu0 }
 0x3bc   :  { %v869_v6 = vadd.f32 %v861_v2, %v8951_v56  ;;  %v870_v7 = vadd.f32 %v862_v3, %v8951_v56 }
 0x3bd   :  { %v552_v8 = vpop.f32.mrf.mxu1  ;;  %v628_v9 = vpop.f32.mrf.mxu0 }
 0x3be   :  { %v863_v10 = vmul.f32 0.35355338, %v552_v8  ;;  %v864_v11 = vmul.f32 0.35355338, %v628_v9  ;;  %v879_v12 = vsel %vm253_vm2, %v869_v6, -inf  ;;  %v882_v13 = vsel %vm253_vm2, %v870_v7, -inf }
 0x3bf   :  { %880 = vmax.xlane.f32.xlu1 %v879_v12  ;;  %v7906_v14 = vpop.f32.mrf.mxu1  ;;  %883 = vmax.xlane.f32.xlu0 %v882_v13  ;;  %v7911_v15 = vpop.f32.mrf.mxu0 }
 0x3c0   :  { %v871_v17 = vadd.f32 %v863_v10, %v8951_v56  ;;  %v872_v23 = vadd.f32 %v864_v11, %v8963_v16 }
 0x3c1   :  { %v704_v18 = vpop.f32.mrf.mxu1  ;;  %v780_v19 = vpop.f32.mrf.mxu0 }
 0x3c2   :  { %v865_v20 = vmul.f32 0.35355338, %v704_v18  ;;  %v866_v21 = vmul.f32 0.35355338, %v780_v19  ;;  %v885_v22 = vsel %vm253_vm2, %v871_v17, -inf  ;;  %v888_v30 = vsel %vm253_vm2, %v872_v23, -inf }
 0x3c3   :  { %v7916_v24 = vpop.f32.mrf.mxu1  ;;  %886 = vmax.xlane.f32.xlu0 %v885_v22  ;;  %v7921_v25 = vpop.f32.mrf.mxu0 }
 0x3c4   :  { %v873_v26 = vadd.f32 %v865_v20, %v8963_v16  ;;  %v874_v31 = vadd.f32 %v866_v21, %v8963_v16 }
 0x3c5   :  { %v856_v27 = vpop.f32.mrf.mxu1 }
 0x3c6   :  { %v867_v28 = vmul.f32 0.35355338, %v856_v27  ;;  %v891_v29 = vsel %vm253_vm2, %v873_v26, -inf  ;;  %v894_v36 = vsel %vm253_vm2, %v874_v31, -inf }
 0x3c7   :  { %892 = vmax.xlane.f32.xlu1 %v891_v29  ;;  %v7926_v32 = vpop.f32.mrf.mxu1  ;;  %889 = vmax.xlane.f32.xlu0 %v888_v30 }
 0x3c8   :  { %v875_v33 = vadd.f32 %v867_v28, %v8963_v16 }
 0x3ca   :  { %v897_v35 = vsel %vm253_vm2, %v875_v33, -inf }
 0x3cb   :  { %898 = vmax.xlane.f32.xlu1 %v897_v35  ;;  %895 = vmax.xlane.f32.xlu0 %v894_v36 }
 0x3dc   :  { %1048 = vrot.lane.b32.xlu1 %v8875_v41, %s10300_s25 }
 0x3de   :  { %v878_v37 = vpop.xlane.xlu0 %877 }
 0x3df   :  { %v900_v45 = vsub.f32 %v868_v59, %v878_v37 }
 0x3e0   :  { %1124 = vrot.lane.b32.xlu1 %v8873_v40, %s10300_s25 }
 0x3e1   :  { %972 = vrot.lane.b32.xlu0 %v8855_v38, %s10300_s25  ;;  %v908_v47 = vmul.f32 1.442695, %v900_v45 }
 0x3e3   :  { %8454 = vpow2.f32 %v908_v47 }
 0x3e4   :  { %1200 = vrot.lane.b32.xlu1 %v8881_v42, %s10300_s25 }
 0x3e5   :  { %1276 = vrot.lane.b32.xlu0 %v8861_v39, %s10300_s25 }
 0x3e8   :  { %1352 = vrot.lane.b32.xlu1 %v8889_v44, %s10300_s25 }
 0x3f0   :  { %v8987_v41 = vpop.eup %8454 }
 0x3f1   :  { %v924_v40 = vsel %vm253_vm2, %v8987_v41, 0.0 }
 0x404   :  { %925 = vadd.xlane.f32.xlu0 %v924_v40 }
 0x448   :  { %v881_v38 = vpop.xlane.xlu1 %880  ;;  %v884_v48 = vpop.xlane.xlu0 %883 }
 0x449   :  { %v901_v49 = vsub.f32 %v869_v6, %v881_v38  ;;  %v902_v42 = vsub.f32 %v870_v7, %v884_v48 }
 0x44b   :  { %v910_v50 = vmul.f32 1.442695, %v901_v49  ;;  %v912_v51 = vmul.f32 1.442695, %v902_v42 }
 0x44c   :  { %v887_v39 = vpop.xlane.xlu0 %886 }
 0x44d   :  { %8456 = vpow2.f32 %v910_v50  ;;  %v903_v52 = vsub.f32 %v871_v17, %v887_v39 }
 0x44e   :  { %8458 = vpow2.f32 %v912_v51 }
 0x44f   :  { %v914_v44 = vmul.f32 1.442695, %v903_v52 }
 0x450   :  { %v893_v53 = vpop.xlane.xlu1 %892  ;;  %v890_v54 = vpop.xlane.xlu0 %889 }
 0x451   :  { %8460 = vpow2.f32 %v914_v44  ;;  %v905_v55 = vsub.f32 %v873_v26, %v893_v53  ;;  %v904_v57 = vsub.f32 %v872_v23, %v890_v54  ;;  %v1615_v54 = vld [vmem:[%s10332_s29 + $0x18] sm:$0xff] }
 0x453   :  { %v918_v58 = vmul.f32 1.442695, %v905_v55  ;;  %v916_v59 = vmul.f32 1.442695, %v904_v57  ;;  %v1614_v55 = vld [vmem:[%s10332_s29 + $0x10] sm:$0xff] }
 0x454   :  { %v899_v60 = vpop.xlane.xlu1 %898  ;;  %v896_v61 = vpop.xlane.xlu0 %895 }
 0x455   :  { %8462 = vpow2.f32 %v918_v58  ;;  %v907_v62 = vsub.f32 %v875_v33, %v899_v60  ;;  %v906_v63 = vsub.f32 %v874_v31, %v896_v61  ;;  %v1612_v60 = vld [vmem:[%s10332_s29] sm:$0xff] }
 0x456   :  { %8464 = vpow2.f32 %v916_v59  ;;  %v1613_v59 = vld [vmem:[%s10332_s29 + $0x8] sm:$0xff] }
 0x457   :  { %v922_v2 = vmul.f32 1.442695, %v907_v62  ;;  %v920_v3 = vmul.f32 1.442695, %v906_v63 }
 0x458   :  { %v1049_v4 = vpop.permute.xlu1 %1048  ;;  %v973_v5 = vpop.permute.xlu0 %972 }
 0x459   :  { %8466 = vpow2.f32 %v922_v2  ;;  %7928 = vmatpush3.msra.mxu0 %v973_v5  ;;  %7933 = vmatpush3.msra.mxu1 %v1049_v4 }
 0x45a   :  { %v8457_v6 = vpop.eup %8456  ;;  %8468 = vpow2.f32 %v920_v3  ;;  %7937 = vmatprep.subr.mxu0 %v8674_v34  ;;  %7942 = vmatprep.subr.mxu1 %v8674_v34 }
 0x45b   :  { %v8459_v7 = vpop.eup %8458  ;;  %v927_v8 = vsel %vm253_vm2, %v8457_v6, 0.0 }
 0x45c   :  { %928 = vadd.xlane.f32.xlu1 %v927_v8  ;;  %v930_v9 = vsel %vm253_vm2, %v8459_v7, 0.0  ;;  %v1277_v21 = vpop.permute.xlu0 %1276  ;;  %v1125_v25 = vpop.permute.xlu1 %1124 }
 0x45d   :  { %931 = vadd.xlane.f32.xlu0 %v930_v9 }
 0x45e   :  { %v8461_v10 = vpop.eup %8460 }
 0x45f   :  { %v933_v11 = vsel %vm253_vm2, %v8461_v10, 0.0 }
 0x460   :  { %934 = vadd.xlane.f32.xlu1 %v933_v11 }
 0x462   :  { %v8996_v12 = vpop.eup %8462 }
 0x463   :  { %v8998_v13 = vpop.eup %8464  ;;  %v939_v14 = vsel %vm253_vm2, %v8996_v12, 0.0 }
 0x464   :  { %940 = vadd.xlane.f32.xlu1 %v939_v14  ;;  %v936_v15 = vsel %vm253_vm2, %v8998_v13, 0.0 }
 0x465   :  { %937 = vadd.xlane.f32.xlu0 %v936_v15 }
 0x466   :  { %v9004_v17 = vpop.eup %8466 }
 0x467   :  { %v9006_v18 = vpop.eup %8468  ;;  %v945_v19 = vsel %vm253_vm2, %v9004_v17, 0.0 }
 0x468   :  { %946 = vadd.xlane.f32.xlu1 %v945_v19  ;;  %v942_v20 = vsel %vm253_vm2, %v9006_v18, 0.0 }
 0x469   :  { %943 = vadd.xlane.f32.xlu0 %v942_v20 }
 0x479   :  { %1504 = vrot.lane.b32.xlu1 %v8897_v46, %s10300_s25  ;;  %v1201_v46 = vpop.permute.xlu1 %1200 }
 0x47d   :  { %v1353_v26 = vpop.permute.xlu1 %1352 }
 0x47f   :  { %1428 = vrot.lane.b32.xlu0 %v8883_v43, %s10300_s25  ;;  %s10304_s25 = smov 24  }
 0x48d   :  { %v926_v22 = vpop.xlane.xlu0 %925 }
 0x48e   :  { %8470 = vrcp.f32 %v926_v22 }
 0x49b   :  { %v8471_v23 = vpop.eup %8470 }
 0x49c   :  { %v949_v24 = vmul.f32 %v8471_v23, %v8987_v41 }
 0x49e   :  { %964 = vst.msk [vmem:[#allocation4] sm:$0xff] %vm253_vm2, %v949_v24  ;;  %7930 = vmatmul.mubr.msk.f32.vlgmr.msra.gmra.mxu0 %vm253_vm2, %v949_v24 }
 0x49f   :  { %7938 = vmatpush3.msra.mxu0 %v1125_v25  ;;  %7939 = vmatprep.mubr.msk.f32.mxu0 %vm8675_vm1, %v8674_v34  ;;  %v7430_v25 = vld [vmem:[%s10276_s8] ss:$0 sm:$0xff] }
 0x4a0   :  { %7947 = vmatprep.subr.mxu0 %v8674_v34 }
 0x4e5   :  { %v929_v43 = vpop.xlane.xlu1 %928 }
 0x4e6   :  { %8472 = vrcp.f32 %v929_v43  ;;  %v932_v27 = vpop.xlane.xlu0 %931 }
 0x4e7   :  { %8474 = vrcp.f32 %v932_v27 }
 0x4e9   :  { %v935_v28 = vpop.xlane.xlu1 %934 }
 0x4ea   :  { %8476 = vrcp.f32 %v935_v28 }
 0x4ed   :  { %v941_v29 = vpop.xlane.xlu1 %940 }
 0x4ee   :  { %8478 = vrcp.f32 %v941_v29  ;;  %v938_v30 = vpop.xlane.xlu0 %937 }
 0x4ef   :  { %8480 = vrcp.f32 %v938_v30 }
 0x4f1   :  { %v947_v31 = vpop.xlane.xlu1 %946 }
 0x4f2   :  { %8482 = vrcp.f32 %v947_v31  ;;  %v944_v32 = vpop.xlane.xlu0 %943  ;;  %v1844_v31 = vld [vmem:[%s10279_s11 + $0x18] sm:$0xff] }
 0x4f3   :  { %v8473_v33 = vpop.eup %8472  ;;  %8484 = vrcp.f32 %v944_v32 }
 0x4f4   :  { %v8475_v35 = vpop.eup %8474  ;;  %v951_v36 = vmul.f32 %v8473_v33, %v8457_v6 }
 0x4f5   :  { %v953_v37 = vmul.f32 %v8475_v35, %v8459_v7  ;;  %v1505_v49 = vpop.permute.xlu1 %1504 }
 0x4f6   :  { %965 = vst.msk [vmem:[#allocation4 + $0x8] sm:$0xff] %vm253_vm2, %v951_v36  ;;  %7935 = vmatmul.mubr.msk.f32.vlgmr.msra.gmra.mxu1 %vm253_vm2, %v951_v36  ;;  %v1429_v50 = vpop.permute.xlu0 %1428 }
 0x4f7   :  { %v8477_v45 = vpop.eup %8476  ;;  %966 = vst.msk [vmem:[#allocation4 + $0x10] sm:$0xff] %vm253_vm2, %v953_v37  ;;  %7940 = vmatmul.mubr.msk.f32.vlgmr.msra.gmra.mxu0 %vm253_vm2, %v953_v37  ;;  %7943 = vmatpush3.msra.mxu1 %v1201_v46 }
 0x4f8   :  { %7948 = vmatpush3.msra.mxu0 %v1277_v21  ;;  %7944 = vmatprep.mubr.msk.f32.mxu1 %vm8675_vm1, %v8674_v34  ;;  %v955_v47 = vmul.f32 %v8477_v45, %v8461_v10 }
 0x4f9   :  { %7952 = vmatprep.subr.mxu1 %v8674_v34  ;;  %7949 = vmatprep.mubr.msk.f32.mxu0 %vm8675_vm1, %v8674_v34 }
 0x4fa   :  { %967 = vst.msk [vmem:[#allocation4 + $0x18] sm:$0xff] %vm253_vm2, %v955_v47  ;;  %7945 = vmatmul.mubr.msk.f32.vlgmr.msra.gmra.mxu1 %vm253_vm2, %v955_v47  ;;  %7957 = vmatprep.subr.mxu0 %v8674_v34 }
 0x4fb   :  { %v8479_v41 = vpop.eup %8478  ;;  %7953 = vmatpush3.msra.mxu1 %v1353_v26  ;;  %7954 = vmatprep.mubr.msk.f32.mxu1 %vm8675_vm1, %v8674_v34 }
 0x4fc   :  { %v8481_v40 = vpop.eup %8480  ;;  %7962 = vmatprep.subr.mxu1 %v8674_v34  ;;  %v959_v38 = vmul.f32 %v8479_v41, %v8996_v12 }
 0x4fd   :  { %v957_v48 = vmul.f32 %v8481_v40, %v8998_v13  ;;  %v1843_v40 = vld [vmem:[%s10279_s11 + $0x10] sm:$0xff] }
 0x4fe   :  { %969 = vst.msk [vmem:[#allocation4 + $0x48] sm:$0xff] %vm253_vm2, %v959_v38  ;;  %7955 = vmatmul.mubr.msk.f32.vlgmr.msra.gmra.mxu1 %vm253_vm2, %v959_v38  ;;  %v1842_v38 = vld [vmem:[%s10279_s11 + $0x8] sm:$0xff] }
 0x4ff   :  { %v8483_v42 = vpop.eup %8482  ;;  %968 = vst.msk [vmem:[#allocation4 + $0x40] sm:$0xff] %vm253_vm2, %v957_v48  ;;  %7950 = vmatmul.mubr.msk.f32.vlgmr.msra.gmra.mxu0 %vm253_vm2, %v957_v48  ;;  %7963 = vmatpush3.msra.mxu1 %v1505_v49  ;;  %v1841_v48 = vld [vmem:[%s10279_s11] sm:$0xff] }
 0x500   :  { %v8485_v51 = vpop.eup %8484  ;;  %7958 = vmatpush3.msra.mxu0 %v1429_v50  ;;  %7959 = vmatprep.mubr.msk.f32.mxu0 %vm8675_vm1, %v8674_v34  ;;  %v963_v39 = vmul.f32 %v8483_v42, %v9004_v17  ;;  %v75_v49 = vld [vmem:[%s10333_s6] sm:$0xff]  ;;  %v76_v42 = vld [vmem:[%s10333_s6 + $0x8] sm:$0xff]  ;;  %v1752_v50 = vld [vmem:[%s10277_s9 + $0x18] sm:$0xff] }
 0x501   :  { %7964 = vmatprep.mubr.msk.f32.mxu1 %vm8675_vm1, %v8674_v34  ;;  %v961_v52 = vmul.f32 %v8485_v51, %v9006_v18  ;;  %7967 = vmatprep.subr.mxu0 %v1615_v54  ;;  %v1751_v51 = vld [vmem:[%s10277_s9 + $0x10] sm:$0xff] }
 0x502   :  { %971 = vst.msk [vmem:[#allocation4 + $0x58] sm:$0xff] %vm253_vm2, %v963_v39  ;;  %7965 = vmatmul.mubr.msk.f32.vlgmr.msra.gmra.mxu1 %vm253_vm2, %v963_v39  ;;  %7978 = vmatprep.subr.mxu1 %v1752_v50  ;;  %v1750_v39 = vld [vmem:[%s10277_s9 + $0x8] sm:$0xff] }
 0x503   :  { %970 = vst.msk [vmem:[#allocation4 + $0x50] sm:$0xff] %vm253_vm2, %v961_v52  ;;  %7960 = vmatmul.mubr.msk.f32.vlgmr.msra.gmra.mxu0 %vm253_vm2, %v961_v52  ;;  %7979 = vmatpush3.msra.mxu1 %v1752_v50  ;;  %v1749_v52 = vld [vmem:[%s10277_s9] sm:$0xff] }
 0x504   :  { %7968 = vmatpush3.msra.mxu0 %v1615_v54  ;;  %7980 = vmatprep.subr.mxu1 %v1751_v51 }
 0x505   :  { %7969 = vmatprep.subr.mxu0 %v1614_v55  ;;  %7981 = vmatpush3.msra.mxu1 %v1751_v51 }
 0x506   :  { %7970 = vmatpush3.msra.mxu0 %v1614_v55  ;;  %7982 = vmatprep.subr.mxu1 %v1750_v39 }
 0x507   :  { %7971 = vmatprep.subr.mxu0 %v1613_v59  ;;  %7983 = vmatpush3.msra.mxu1 %v1750_v39 }
 0x508   :  { %7972 = vmatpush3.msra.mxu0 %v1613_v59  ;;  %7984 = vmatprep.subr.mxu1 %v1749_v52 }
 0x509   :  { %7973 = vmatprep.subr.mxu0 %v1612_v60  ;;  %7985 = vmatpush3.msra.mxu1 %v1749_v52 }
 0x50a   :  { %7974 = vmatpush3.msra.mxu0 %v1612_v60  ;;  %8003 = vmatprep.subr.mxu1 %v8674_v34 }
 0x50b   :  { %7989 = vmatprep.subr.mxu0 %v1844_v31 }
 0x55e   :  { %v1044_v44 = vpop.f32.mrf.mxu0 }
 0x560   :  { %v7931_v53 = vpop.f32.mrf.mxu0 }
 0x561   :  { %v78_v53 = vld [vmem:[%s10333_s6 + $0x18] sm:$0xff] }
 0x5b6   :  { %v1120_v57 = vpop.f32.mrf.mxu1 }
 0x5b7   :  { %v1196_v58 = vpop.f32.mrf.mxu0  ;;  %1582 = vrot.lane.b32.xlu0 %v1120_v57, %s10308_s4 }
 0x5b8   :  { %v7936_v61 = vpop.f32.mrf.mxu1 }
 0x5b9   :  { %v7941_v62 = vpop.f32.mrf.mxu0 }
 0x5ba   :  { %v1272_v63 = vpop.f32.mrf.mxu1  ;;  %v7433_v62 = vld [vmem:[%s10329_s30 + $0x2] ss:$0 sm:$0xff] }
 0x5bb   :  { %1590 = vrot.lane.b32.xlu0 %v1196_v58, %s10306_s1 }
 0x5bc   :  { %v7946_v2 = vpop.f32.mrf.mxu1 }
 0x5bd   :  { %v7434_v2 = vld [vmem:[%s10329_s30 + $0x3] ss:$0 sm:$0xff] }
 0x5be   :  { %v1424_v3 = vpop.f32.mrf.mxu1 }
 0x5bf   :  { %v1348_v4 = vpop.f32.mrf.mxu0  ;;  %1584 = vrot.lane.b32.xlu1 %v1424_v3, %s10308_s4  ;;  %1598 = vrot.lane.b32.xlu0 %v1272_v63, %s10304_s25  ;;  %s10337_s4 = smov 8  }
 0x5c0   :  { %v7956_v5 = vpop.f32.mrf.mxu1 }
 0x5c1   :  { %v7951_v6 = vpop.f32.mrf.mxu0 }
 0x5c2   :  { %v1576_v7 = vpop.f32.mrf.mxu1 }
 0x5c3   :  { %v1500_v8 = vpop.f32.mrf.mxu0 }
 0x5c4   :  { %1592 = vrot.lane.b32.xlu1 %v1500_v8, %s10306_s1  ;;  %v7966_v9 = vpop.f32.mrf.mxu1  ;;  %s10338_s1 = smov 16  }
 0x5c5   :  { %v7961_v10 = vpop.f32.mrf.mxu0  ;;  %v7438_v9 = vld [vmem:[%s10280_s12] ss:$0 sm:$0xff] }
 0x5c8   :  { %1600 = vrot.lane.b32.xlu1 %v1576_v7, %s10304_s25  ;;  %s10334_s25 = smov 112  }
 0x629   :  { %v1583_v11 = vpop.permute.xlu0 %1582 }
 0x62a   :  { %v1604_v13 = vsel %vm253_vm2, %v1044_v44, %v1583_v11  ;;  %v77_v44 = vld [vmem:[%s10333_s6 + $0x10] sm:$0xff] }
 0x62d   :  { %v1591_v12 = vpop.permute.xlu0 %1590 }
 0x62e   :  { %v1607_v14 = vsel %vm1606_vm5, %v1604_v13, %v1591_v12 }
 0x631   :  { %v1585_v15 = vpop.permute.xlu1 %1584  ;;  %v1599_v17 = vpop.permute.xlu0 %1598 }
 0x632   :  { %v1610_v18 = vsel %vm1609_vm6, %v1607_v14, %v1599_v17  ;;  %v1605_v20 = vsel %vm253_vm2, %v1348_v4, %v1585_v15 }
 0x633   :  { %7975 = vmatprep.mubr.msk.f32.mxu0 %vm105_vm0, %v1610_v18 }
 0x636   :  { %v1593_v19 = vpop.permute.xlu1 %1592 }
 0x637   :  { %v1608_v21 = vsel %vm1606_vm5, %v1605_v20, %v1593_v19  ;;  %v7435_v20 = vld [vmem:[%s10278_s10] ss:$0 sm:$0xff] }
 0x63a   :  { %v1601_v22 = vpop.permute.xlu1 %1600 }
 0x63b   :  { %v1611_v23 = vsel %vm1609_vm6, %v1608_v21, %v1601_v22 }
 0x63c   :  { %7976 = vmatmul.mubr.msk.f32.vlgmr.msra.gmra.mxu0 %vm105_vm0, %v1611_v23 }
 0x63d   :  { %7990 = vmatpush3.msra.mxu0 %v1844_v31  ;;  %7997 = vmatprep.mubr.msk.f32.mxu0 %vm105_vm0, %v75_v49 }
 0x63e   :  { %7991 = vmatprep.subr.mxu0 %v1843_v40 }
 0x63f   :  { %7992 = vmatpush3.msra.mxu0 %v1843_v40  ;;  %v93_v40 = vlaneseq }
 0x640   :  { %7993 = vmatprep.subr.mxu0 %v1842_v38 }
 0x641   :  { %7994 = vmatpush3.msra.mxu0 %v1842_v38  ;;  %v85_v38 = vld [vmem:[%s10335_s28] sm:$0x1] }
 0x642   :  { %7995 = vmatprep.subr.mxu0 %v1841_v48  ;;  %vm87_vm7 = vcmp.eq.f32.partialorder %v85_v38, 0.0 }
 0x643   :  { %7996 = vmatpush3.msra.mxu0 %v1841_v48  ;;  %v94_v48 = vshrl.u32 %v93_v40, 7 }
 0x644   :  { %7998 = vmatmul.mubr.msk.f32.vlgmr.msra.gmra.mxu0 %vm105_vm0, %v76_v42  ;;  %8010 = vmatprep.subr.mxu0 %v8674_v34  ;;  %v89_v42 = vsel %vm87_vm7, -1e+09, %v8674_v34 }
 0x645   :  { %8000 = vmatprep.mubr.msk.f32.mxu0 %vm105_vm0, %v77_v44  ;;  %v95_v49 = vsub.s32 0, %v94_v48 }
 0x647   :  { %v9294_v50 = vrot.slane %v89_v42, %v95_v49 }
 0x648   :  { %8001 = vmatmul.mubr.msk.f32.gmra.mxu0 %vm105_vm0, %v78_v53 }
 0x649   :  { %8014 = vmatprep.mubr.msk.f32.mxu0 %vm8675_vm1, %v8674_v34 }
 0x6fc   :  { %v7977_v24 = vpop.f32.mrf.mxu0 }
 0x6fd   :  { %v1698_v46 = vadd.f32 %v7977_v24, %v8816_v1 }
 0x6fe   :  { %v1688_v26 = vpop.f32.mrf.mxu0 }
 0x6ff   :  { %v9083_v43 = vadd.f32 %v7430_v25, %v1698_v46  ;;  %v1697_v27 = vadd.f32 %v1688_v26, %v8811_v0 }
 0x701   :  { %v9086_v28 = vadd.f32 %v7430_v25, %v1697_v27  ;;  %v1714_v29 = vsel %vm105_vm0, %v9083_v43, 0.0 }
 0x702   :  { %1715 = vadd.xlane.f32.xlu1 %v1714_v29 }
 0x703   :  { %v1711_v30 = vsel %vm105_vm0, %v9086_v28, 0.0 }
 0x704   :  { %1712 = vadd.xlane.f32.xlu0 %v1711_v30  ;;  %v7999_v10 = vpop.f32.mrf.mxu0 }
 0x705   :  { %v9153_v11 = vadd.f32 %v7999_v10, %v7438_v9 }
 0x706   :  { %v1930_v12 = vpop.f32.mrf.mxu0 }
 0x707   :  { %v9155_v13 = vadd.f32 %v7438_v9, %v1930_v12 }
 0x708   :  { %v8002_v17 = vpop.f32.mrf.mxu0 }
 0x709   :  { %v9190_v24 = vadd.f32 %v8002_v17, %v7438_v9 }
 0x70a   :  { %v1940_v19 = vpop.f32.mrf.mxu0 }
 0x70b   :  { %v9194_v25 = vadd.f32 %v7438_v9, %v1940_v19 }
 0x713   :  { %1967 = vrot.lane.b32.xlu1 %v9155_v13, %s10314_s27 }
 0x717   :  { %1977 = vrot.lane.b32.xlu1 %v9153_v11, %s10334_s25 }
 0x71b   :  { %1975 = vrot.lane.b32.xlu1 %v9155_v13, %s10334_s25 }
 0x78b   :  { %v1716_v1 = vpop.xlane.xlu1 %1715 }
 0x78c   :  { %v1718_v32 = vmul.f32 0.03125, %v1716_v1 }
 0x78d   :  { %v1713_v33 = vpop.xlane.xlu0 %1712 }
 0x78e   :  { %v1717_v0 = vmul.f32 0.03125, %v1713_v33  ;;  %v1720_v35 = vsub.f32 %v9083_v43, %v1718_v32 }
 0x78f   :  { %v9180_v15 = vpop.permute.xlu1 %1967 }
 0x790   :  { %v1719_v36 = vsub.f32 %v9086_v28, %v1717_v0  ;;  %v1722_v47 = vmul.f32 %v1720_v35, %v1720_v35 }
 0x792   :  { %v1721_v37 = vmul.f32 %v1719_v36, %v1719_v36  ;;  %v1726_v41 = vsel %vm105_vm0, %v1722_v47, 0.0 }
 0x793   :  { %v9188_v22 = vpop.permute.xlu1 %1977 }
 0x794   :  { %v1723_v45 = vsel %vm105_vm0, %v1721_v37, 0.0 }
 0x795   :  { %1724 = vadd.xlane.f32.xlu0 %v1723_v45 }
 0x797   :  { %v9201_v46 = vpop.permute.xlu1 %1975 }
 0x799   :  { %1727 = vadd.xlane.f32.xlu0 %v1726_v41 }
 0x7af   :  { %1969 = vrot.lane.b32.xlu0 %v9153_v11, %s10314_s27 }
 0x7b3   :  { %1985 = vrot.lane.b32.xlu0 %v9153_v11, %s10312_s7 }
 0x7b7   :  { %1983 = vrot.lane.b32.xlu0 %v9155_v13, %s10312_s7 }
 0x81e   :  { %v1725_v54 = vpop.xlane.xlu0 %1724 }
 0x81f   :  { %v1729_v55 = vmul.f32 0.03125, %v1725_v54 }
 0x821   :  { %v1731_v57 = vadd.f32 1e-06, %v1729_v55 }
 0x822   :  { %v1728_v58 = vpop.xlane.xlu0 %1727 }
 0x823   :  { %8486 = vrsqrt.f32 %v1731_v57  ;;  %v1730_v59 = vmul.f32 0.03125, %v1728_v58 }
 0x825   :  { %v1732_v60 = vadd.f32 1e-06, %v1730_v59 }
 0x826   :  { %v9175_v14 = vpop.permute.xlu0 %1969 }
 0x827   :  { %8488 = vrsqrt.f32 %v1732_v60  ;;  %8011 = vmatpush3.xpose.msk.msra.mxu0 %vm253_vm2, %v9175_v14  ;;  %v86_v60 = vld [vmem:[%s10335_s28 + $0x1] sm:$0x1] }
 0x828   :  { %8012 = vmatprep.subr.mxu0 %v8674_v34  ;;  %vm88_vm8 = vcmp.eq.f32.partialorder %v86_v60, 0.0 }
 0x82a   :  { %v9223_v27 = vpop.permute.xlu0 %1985 }
 0x82b   :  { %8013 = vmatpush3.xpose.msk.msra.mxu0 %vm253_vm2, %v9180_v15 }
 0x82c   :  { %8024 = vmatprep.subr.mxu0 %v8674_v34 }
 0x82e   :  { %v9225_v29 = vpop.permute.xlu0 %1983 }
 0x830   :  { %v8487_v61 = vpop.eup %8486 }
 0x831   :  { %v1735_v63 = vmul.f32 %v8487_v61, %v1719_v36 }
 0x833   :  { %v1741_v3 = vmul.f32 %v7433_v62, %v1735_v63 }
 0x834   :  { %v8489_v4 = vpop.eup %8488 }
 0x835   :  { %v1736_v5 = vmul.f32 %v8489_v4, %v1720_v35  ;;  %v1747_v6 = vadd.f32 %v7434_v2, %v1741_v3 }
 0x837   :  { %v1742_v7 = vmul.f32 %v7433_v62, %v1736_v5  ;;  %7986 = vmatprep.mubr.msk.f32.mxu1 %vm105_vm0, %v1747_v6  ;;  %v90_v6 = vsel %vm88_vm8, -1e+09, %v8674_v34 }
 0x838   :  { %v9310_v9 = vrot.slane %v90_v6, %v95_v49 }
 0x839   :  { %v1748_v8 = vadd.f32 %v7434_v2, %v1742_v7 }
 0x83b   :  { %7987 = vmatmul.mubr.msk.f32.vlgmr.msra.gmra.mxu1 %vm105_vm0, %v1748_v8 }
 0x83c   :  { %8007 = vmatprep.mubr.msk.f32.mxu1 %vm8675_vm1, %v8674_v34  ;;  %8004 = vmatpush3.xpose.msk.msra.mxu1 %vm253_vm2, %v9153_v11 }
 0x83d   :  { %8005 = vmatprep.subr.mxu1 %v8674_v34 }
 0x840   :  { %8006 = vmatpush3.xpose.msk.msra.mxu1 %vm253_vm2, %v9155_v13 }
 0x841   :  { %8017 = vmatprep.subr.mxu1 %v8674_v34 }
 0x8fb   :  { %v7988_v18 = vpop.f32.mrf.mxu1 }
 0x8fc   :  { %v1838_v26 = vadd.f32 %v7988_v18, %v7435_v20 }
 0x8fd   :  { %v1832_v21 = vpop.f32.mrf.mxu1 }
 0x8fe   :  { %v1833_v23 = vadd.f32 %v7435_v20, %v1832_v21 }
 0x900   :  { %1959 = vrot.lane.b32.xlu0 %v1833_v23, %s10312_s7  ;;  %1951 = vrot.lane.b32.xlu1 %v1833_v23, %s10314_s27 }
 0x901   :  { %8008 = vmatmul.mubr.msk.f32.vlgmr.msra.gmra.mxu1 %vm253_vm2, %v1833_v23 }
 0x902   :  { %8018 = vmatpush3.xpose.msk.msra.mxu1 %vm253_vm2, %v9188_v22  ;;  %8021 = vmatprep.mubr.msk.f32.mxu1 %vm8675_vm1, %v8674_v34 }
 0x903   :  { %8019 = vmatprep.subr.mxu1 %v8674_v34 }
 0x904   :  { %1971 = vrot.lane.b32.xlu0 %v9194_v25, %s10314_s27  ;;  %1973 = vrot.lane.b32.xlu1 %v9190_v24, %s10314_s27 }
 0x906   :  { %8020 = vmatpush3.xpose.msk.msra.mxu1 %vm253_vm2, %v9201_v46 }
 0x907   :  { %8031 = vmatprep.subr.mxu1 %v8674_v34 }
 0x908   :  { %1953 = vrot.lane.b32.xlu0 %v1838_v26, %s10314_s27  ;;  %1955 = vrot.lane.b32.xlu1 %v1833_v23, %s10334_s25 }
 0x90c   :  { %1979 = vrot.lane.b32.xlu0 %v9194_v25, %s10334_s25  ;;  %1981 = vrot.lane.b32.xlu1 %v9190_v24, %s10334_s25 }
 0x910   :  { %1957 = vrot.lane.b32.xlu0 %v1838_v26, %s10334_s25  ;;  %1989 = vrot.lane.b32.xlu1 %v9190_v24, %s10312_s7 }
 0x914   :  { %1987 = vrot.lane.b32.xlu1 %v9194_v25, %s10312_s7 }
 0x918   :  { %1961 = vrot.lane.b32.xlu1 %v1838_v26, %s10312_s7  ;;  %s10339_s7 = smov 24  }
 0x972   :  { %v1952_v30 = vpop.permute.xlu1 %1951  ;;  %v1960_v31 = vpop.permute.xlu0 %1959 }
 0x973   :  { %8015 = vmatmul.mubr.msk.f32.vlgmr.msra.gmra.mxu0 %vm253_vm2, %v1952_v30 }
 0x974   :  { %8025 = vmatpush3.xpose.msk.msra.mxu0 %vm253_vm2, %v9223_v27  ;;  %8028 = vmatprep.mubr.msk.f32.mxu0 %vm8675_vm1, %v8674_v34 }
 0x975   :  { %8026 = vmatprep.subr.mxu0 %v8674_v34 }
 0x976   :  { %v9233_v1 = vpop.permute.xlu1 %1973  ;;  %v9235_v32 = vpop.permute.xlu0 %1971 }
 0x978   :  { %8027 = vmatpush3.xpose.msk.msra.mxu0 %vm253_vm2, %v9225_v29 }
 0x979   :  { %8038 = vmatprep.subr.mxu0 %v8674_v34 }
 0x97a   :  { %v1956_v33 = vpop.permute.xlu1 %1955  ;;  %v1954_v0 = vpop.permute.xlu0 %1953 }
 0x97b   :  { %8029 = vmatmul.mubr.msk.f32.vlgmr.msra.gmra.mxu0 %vm253_vm2, %v1960_v31  ;;  %8022 = vmatmul.mubr.msk.f32.vlgmr.msra.gmra.mxu1 %vm253_vm2, %v1956_v33 }
 0x97c   :  { %8032 = vmatpush3.xpose.msk.msra.mxu1 %vm253_vm2, %v9190_v24  ;;  %8039 = vmatpush3.xpose.msk.msra.mxu0 %vm253_vm2, %v9233_v1 }
 0x97d   :  { %8033 = vmatprep.subr.mxu1 %v8674_v34  ;;  %8040 = vmatprep.subr.mxu0 %v8674_v34 }
 0x97e   :  { %v9248_v35 = vpop.permute.xlu1 %1981  ;;  %8035 = vmatprep.mubr.msk.f32.mxu1 %vm8675_vm1, %v8674_v34  ;;  %8042 = vmatprep.mubr.msk.f32.mxu0 %vm8675_vm1, %v8674_v34  ;;  %v9264_v37 = vpop.permute.xlu0 %1979 }
 0x980   :  { %8034 = vmatpush3.xpose.msk.msra.mxu1 %vm253_vm2, %v9194_v25  ;;  %8041 = vmatpush3.xpose.msk.msra.mxu0 %vm253_vm2, %v9235_v32 }
 0x981   :  { %8045 = vmatprep.subr.mxu1 %v8674_v34  ;;  %8052 = vmatprep.subr.mxu0 %v8674_v34 }
 0x982   :  { %v9260_v36 = vpop.permute.xlu1 %1989  ;;  %v1958_v47 = vpop.permute.xlu0 %1957 }
 0x983   :  { %8036 = vmatmul.mubr.msk.f32.vlgmr.msra.gmra.mxu1 %vm253_vm2, %v1838_v26  ;;  %8043 = vmatmul.mubr.msk.f32.vlgmr.msra.gmra.mxu0 %vm253_vm2, %v1954_v0 }
 0x984   :  { %8046 = vmatpush3.xpose.msk.msra.mxu1 %vm253_vm2, %v9248_v35  ;;  %8053 = vmatpush3.xpose.msk.msra.mxu0 %vm253_vm2, %v9260_v36 }
 0x985   :  { %8047 = vmatprep.subr.mxu1 %v8674_v34  ;;  %8054 = vmatprep.subr.mxu0 %v8674_v34 }
 0x986   :  { %v9272_v45 = vpop.permute.xlu1 %1987  ;;  %8049 = vmatprep.mubr.msk.f32.mxu1 %vm8675_vm1, %v8674_v34  ;;  %8056 = vmatprep.mubr.msk.f32.mxu0 %vm8675_vm1, %v8674_v34 }
 0x988   :  { %8048 = vmatpush3.xpose.msk.msra.mxu1 %vm253_vm2, %v9264_v37  ;;  %8055 = vmatpush3.xpose.msk.msra.mxu0 %vm253_vm2, %v9272_v45 }
 0x989   :  { %8059 = vmatprep.subr.mxu1 %v8674_v34  ;;  %8073 = vmatprep.subr.mxu0 %v8674_v34 }
 0x98a   :  { %v1962_v41 = vpop.permute.xlu1 %1961 }
 0x98b   :  { %8050 = vmatmul.mubr.msk.f32.vlgmr.msra.gmra.mxu1 %vm253_vm2, %v1958_v47  ;;  %8057 = vmatmul.mubr.msk.f32.vlgmr.msra.gmra.mxu0 %vm253_vm2, %v1962_v41 }
 0x98c   :  { %8063 = vmatprep.mubr.msk.f32.mxu1 %vm8675_vm1, %v8674_v34  ;;  %8077 = vmatprep.mubr.msk.f32.mxu0 %vm8675_vm1, %v8674_v34 }
 0x9c1   :  { %v2063_v51 = vpop.f32.mrf.mxu1 }
 0x9c2   :  { %v2599_v39 = vmul.f32 0.35355338, %v2063_v51 }
 0x9c3   :  { %v8009_v52 = vpop.f32.mrf.mxu1 }
 0x9c4   :  { %v2607_v44 = vadd.f32 %v2599_v39, %v9294_v50 }
 0x9c6   :  { %v2615_v53 = vsel %vm1606_vm5, %v2607_v44, -inf }
 0x9c7   :  { %2616 = vmax.xlane.f32.xlu0 %v2615_v53 }
 0xa33   :  { %v2139_v54 = vpop.f32.mrf.mxu0 }
 0xa34   :  { %v2600_v55 = vmul.f32 0.35355338, %v2139_v54 }
 0xa35   :  { %v8016_v57 = vpop.f32.mrf.mxu0 }
 0xa36   :  { %v9299_v58 = vadd.f32 %v2600_v55, %v9294_v50 }
 0xa38   :  { %v2618_v59 = vsel %vm1606_vm5, %v9299_v58, -inf }
 0xa39   :  { %2619 = vmax.xlane.f32.xlu1 %v2618_v59 }
 0xa3b   :  { %v2291_v61 = vpop.f32.mrf.mxu0  ;;  %v2215_v62 = vpop.f32.mrf.mxu1 }
 0xa3c   :  { %v2602_v63 = vmul.f32 0.35355338, %v2291_v61  ;;  %v2601_v2 = vmul.f32 0.35355338, %v2215_v62 }
 0xa3d   :  { %v8030_v3 = vpop.f32.mrf.mxu0  ;;  %v8023_v4 = vpop.f32.mrf.mxu1 }
 0xa3e   :  { %v2609_v5 = vadd.f32 %v2601_v2, %v9294_v50  ;;  %v2610_v8 = vadd.f32 %v2602_v63, %v9294_v50 }
 0xa40   :  { %v2621_v7 = vsel %vm1606_vm5, %v2609_v5, -inf  ;;  %v2624_v19 = vsel %vm1606_vm5, %v2610_v8, -inf }
 0xa41   :  { %2622 = vmax.xlane.f32.xlu0 %v2621_v7 }
 0xa43   :  { %v2367_v10 = vpop.f32.mrf.mxu1  ;;  %v2443_v12 = vpop.f32.mrf.mxu0 }
 0xa44   :  { %v2603_v17 = vmul.f32 0.35355338, %v2367_v10  ;;  %v2604_v18 = vmul.f32 0.35355338, %v2443_v12 }
 0xa45   :  { %v8037_v20 = vpop.f32.mrf.mxu1  ;;  %v8044_v21 = vpop.f32.mrf.mxu0  ;;  %2625 = vmax.xlane.f32.xlu0 %v2624_v19 }
 0xa46   :  { %v2612_v23 = vadd.f32 %v2604_v18, %v9310_v9  ;;  %v2611_v26 = vadd.f32 %v2603_v17, %v9310_v9 }
 0xa48   :  { %v2630_v30 = vsel %vm1606_vm5, %v2612_v23, -inf  ;;  %v2627_v31 = vsel %vm1606_vm5, %v2611_v26, -inf }
 0xa49   :  { %2631 = vmax.xlane.f32.xlu1 %v2630_v30  ;;  %2628 = vmax.xlane.f32.xlu0 %v2627_v31 }
 0xa4b   :  { %v2519_v33 = vpop.f32.mrf.mxu1  ;;  %v2595_v0 = vpop.f32.mrf.mxu0 }
 0xa4c   :  { %v2605_v47 = vmul.f32 0.35355338, %v2519_v33 }
 0xa4d   :  { %v8051_v41 = vpop.f32.mrf.mxu1  ;;  %v8058_v40 = vpop.f32.mrf.mxu0 }
 0xa4e   :  { %v2613_v38 = vadd.f32 %v2605_v47, %v9310_v9 }
 0xa50   :  { %v2633_v48 = vsel %vm1606_vm5, %v2613_v38, -inf }
 0xa51   :  { %2634 = vmax.xlane.f32.xlu0 %v2633_v48 }
 0xa5a   :  { %2711 = vrot.lane.b32.xlu1 %v9155_v13, %s10336_s24  ;;  %v2606_v13 = vmul.f32 0.35355338, %v2595_v0 }
 0xa5e   :  { %2792 = vrot.lane.b32.xlu1 %v9175_v14, %s10336_s24  ;;  %v2617_v14 = vpop.xlane.xlu0 %2616 }
 0xa62   :  { %2790 = vrot.lane.b32.xlu1 %v9180_v15, %s10336_s24  ;;  %v2639_v15 = vsub.f32 %v2607_v44, %v2617_v14 }
 0xa64   :  { %v2647_v49 = vmul.f32 1.442695, %v2639_v15 }
 0xa66   :  { %8490 = vpow2.f32 %v2647_v49 }
 0xa67   :  { %2713 = vrot.lane.b32.xlu0 %v9153_v11, %s10336_s24  ;;  %v9338_v11 = vadd.f32 %v2606_v13, %v9310_v9 }
 0xa6b   :  { %2871 = vrot.lane.b32.xlu0 %v9188_v22, %s10336_s24  ;;  %v2636_v22 = vsel %vm1606_vm5, %v9338_v11, -inf }
 0xa6f   :  { %2869 = vrot.lane.b32.xlu0 %v9201_v46, %s10336_s24 }
 0xa73   :  { %3029 = vrot.lane.b32.xlu0 %v9190_v24, %s10336_s24  ;;  %v9342_v46 = vpop.eup %8490 }
 0xa74   :  { %v2663_v24 = vsel %vm1606_vm5, %v9342_v46, 0.0 }
 0xa77   :  { %3027 = vrot.lane.b32.xlu0 %v9194_v25, %s10336_s24 }
 0xa7b   :  { %3187 = vrot.lane.b32.xlu0 %v9248_v35, %s10336_s24 }
 0xa86   :  { %2637 = vmax.xlane.f32.xlu1 %v2636_v22 }
 0xa97   :  { %2950 = vrot.lane.b32.xlu1 %v9223_v27, %s10336_s24 }
 0xa9a   :  { %2664 = vadd.xlane.f32.xlu0 %v2663_v24 }
 0xa9b   :  { %2948 = vrot.lane.b32.xlu1 %v9225_v29, %s10336_s24 }
 0xa9f   :  { %3108 = vrot.lane.b32.xlu1 %v9233_v1, %s10336_s24 }
 0xaa3   :  { %3106 = vrot.lane.b32.xlu1 %v9235_v32, %s10336_s24 }
 0xaa7   :  { %3266 = vrot.lane.b32.xlu1 %v9260_v36, %s10336_s24 }
 0xac2   :  { %v2620_v25 = vpop.xlane.xlu1 %2619 }
 0xac3   :  { %v2640_v35 = vsub.f32 %v9299_v58, %v2620_v25 }
 0xac5   :  { %v2649_v27 = vmul.f32 1.442695, %v2640_v35 }
 0xac7   :  { %8492 = vpow2.f32 %v2649_v27 }
 0xaca   :  { %v2623_v42 = vpop.xlane.xlu0 %2622 }
 0xacb   :  { %v2641_v51 = vsub.f32 %v2609_v5, %v2623_v42 }
 0xacd   :  { %v2651_v39 = vmul.f32 1.442695, %v2641_v51 }
 0xace   :  { %v2626_v52 = vpop.xlane.xlu0 %2625 }
 0xacf   :  { %8494 = vpow2.f32 %v2651_v39  ;;  %v2642_v29 = vsub.f32 %v2610_v8, %v2626_v52 }
 0xad1   :  { %v2653_v44 = vmul.f32 1.442695, %v2642_v29 }
 0xad2   :  { %v2632_v53 = vpop.xlane.xlu1 %2631  ;;  %v2629_v1 = vpop.xlane.xlu0 %2628 }
 0xad3   :  { %8496 = vpow2.f32 %v2653_v44  ;;  %v2644_v54 = vsub.f32 %v2612_v23, %v2632_v53  ;;  %v2643_v32 = vsub.f32 %v2611_v26, %v2629_v1 }
 0xad4   :  { %v9357_v55 = vpop.eup %8492 }
 0xad5   :  { %v2657_v36 = vmul.f32 1.442695, %v2644_v54  ;;  %v2655_v57 = vmul.f32 1.442695, %v2643_v32  ;;  %v2666_v58 = vsel %vm1606_vm5, %v9357_v55, 0.0 }
 0xad6   :  { %2667 = vadd.xlane.f32.xlu1 %v2666_v58  ;;  %v2712_v4 = vpop.permute.xlu1 %2711 }
 0xad7   :  { %8498 = vpow2.f32 %v2657_v36 }
 0xad8   :  { %8500 = vpow2.f32 %v2655_v57 }
 0xada   :  { %v2635_v59 = vpop.xlane.xlu0 %2634  ;;  %v2793_v20 = vpop.permute.xlu1 %2792 }
 0xadb   :  { %v2645_v60 = vsub.f32 %v2613_v38, %v2635_v59 }
 0xadc   :  { %v9361_v61 = vpop.eup %8494 }
 0xadd   :  { %v2659_v62 = vmul.f32 1.442695, %v2645_v60  ;;  %v2669_v63 = vsel %vm1606_vm5, %v9361_v61, 0.0 }
 0xade   :  { %v2714_v2 = vpop.permute.xlu0 %2713  ;;  %2670 = vadd.xlane.f32.xlu0 %v2669_v63  ;;  %v2791_v21 = vpop.permute.xlu1 %2790 }
 0xadf   :  { %8502 = vpow2.f32 %v2659_v62  ;;  %8060 = vmatpush3.msra.mxu1 %v2714_v2 }
 0xae0   :  { %v9365_v3 = vpop.eup %8496  ;;  %8061 = vmatprep.subr.mxu1 %v8674_v34 }
 0xae1   :  { %8062 = vmatpush3.msra.mxu1 %v2712_v4  ;;  %v2672_v5 = vsel %vm1606_vm5, %v9365_v3, 0.0 }
 0xae2   :  { %v2872_v6 = vpop.permute.xlu0 %2871  ;;  %2673 = vadd.xlane.f32.xlu1 %v2672_v5  ;;  %8066 = vmatprep.subr.mxu1 %v8674_v34  ;;  %v3376_v5 = vld [vmem:[%s10281_s13 + $0x18] sm:$0xff] }
 0xae3   :  { %8074 = vmatpush3.msra.mxu0 %v2872_v6  ;;  %v3375_v6 = vld [vmem:[%s10281_s13 + $0x10] sm:$0xff] }
 0xae4   :  { %v9371_v7 = vpop.eup %8498  ;;  %8075 = vmatprep.subr.mxu0 %v8674_v34 }
 0xae5   :  { %v9374_v8 = vpop.eup %8500  ;;  %v2678_v10 = vsel %vm1606_vm5, %v9371_v7, 0.0 }
 0xae6   :  { %v2870_v12 = vpop.permute.xlu0 %2869  ;;  %2679 = vadd.xlane.f32.xlu1 %v2678_v10  ;;  %v2675_v17 = vsel %vm1606_vm5, %v9374_v8, 0.0 }
 0xae7   :  { %2676 = vadd.xlane.f32.xlu0 %v2675_v17  ;;  %8076 = vmatpush3.msra.mxu0 %v2870_v12  ;;  %v3373_v12 = vld [vmem:[%s10281_s13] sm:$0xff] }
 0xae8   :  { %8087 = vmatprep.subr.mxu0 %v8674_v34 }
 0xaea   :  { %v3030_v31 = vpop.permute.xlu0 %3029 }
 0xaec   :  { %v9381_v18 = vpop.eup %8502 }
 0xaed   :  { %v2681_v19 = vsel %vm1606_vm5, %v9381_v18, 0.0 }
 0xaee   :  { %2682 = vadd.xlane.f32.xlu0 %v2681_v19  ;;  %v3028_v33 = vpop.permute.xlu0 %3027 }
 0xaf2   :  { %v9388_v0 = vpop.permute.xlu0 %3187 }
 0xb04   :  { %3185 = vrot.lane.b32.xlu0 %v9264_v37, %s10336_s24 }
 0xb0f   :  { %v2638_v23 = vpop.xlane.xlu1 %2637 }
 0xb10   :  { %v2646_v26 = vsub.f32 %v9338_v11, %v2638_v23 }
 0xb12   :  { %v2661_v30 = vmul.f32 1.442695, %v2646_v26 }
 0xb13   :  { %v2951_v48 = vpop.permute.xlu1 %2950 }
 0xb14   :  { %8504 = vpow2.f32 %v2661_v30 }
 0xb17   :  { %v2949_v13 = vpop.permute.xlu1 %2948 }
 0xb1b   :  { %v3109_v14 = vpop.permute.xlu1 %3108 }
 0xb1f   :  { %v3107_v15 = vpop.permute.xlu1 %3106 }
 0xb21   :  { %v9390_v47 = vpop.eup %8504 }
 0xb22   :  { %v2684_v41 = vsel %vm1606_vm5, %v9390_v47, 0.0 }
 0xb23   :  { %2685 = vadd.xlane.f32.xlu1 %v2684_v41  ;;  %v2665_v40 = vpop.xlane.xlu0 %2664  ;;  %v3267_v11 = vpop.permute.xlu1 %3266 }
 0xb24   :  { %8506 = vrcp.f32 %v2665_v40 }
 0xb31   :  { %v8507_v37 = vpop.eup %8506 }
 0xb32   :  { %v2688_v38 = vmul.f32 %v8507_v37, %v9342_v46 }
 0xb34   :  { %3264 = vrot.lane.b32.xlu1 %v9272_v45, %s10336_s24  ;;  %2703 = vst.msk [vmem:[#allocation6] sm:$0xff] %vm1606_vm5, %v2688_v38  ;;  %8064 = vmatmul.mubr.msk.f32.vlgmr.msra.gmra.mxu1 %vm1606_vm5, %v2688_v38 }
 0xb35   :  { %8067 = vmatpush3.msra.mxu1 %v2793_v20  ;;  %8070 = vmatprep.mubr.msk.f32.mxu1 %vm8675_vm1, %v8674_v34 }
 0xb36   :  { %8068 = vmatprep.subr.mxu1 %v8674_v34 }
 0xb37   :  { %8069 = vmatpush3.msra.mxu1 %v2791_v21 }
 0xb38   :  { %8080 = vmatprep.subr.mxu1 %v8674_v34 }
 0xb5f   :  { %v2668_v49 = vpop.xlane.xlu1 %2667 }
 0xb60   :  { %8508 = vrcp.f32 %v2668_v49 }
 0xb67   :  { %v2671_v45 = vpop.xlane.xlu0 %2670 }
 0xb68   :  { %8510 = vrcp.f32 %v2671_v45 }
 0xb6b   :  { %v2674_v22 = vpop.xlane.xlu1 %2673 }
 0xb6c   :  { %8512 = vrcp.f32 %v2674_v22 }
 0xb6d   :  { %v8509_v46 = vpop.eup %8508 }
 0xb6e   :  { %v2690_v24 = vmul.f32 %v8509_v46, %v9357_v55 }
 0xb6f   :  { %v2680_v25 = vpop.xlane.xlu1 %2679 }
 0xb70   :  { %8514 = vrcp.f32 %v2680_v25  ;;  %v2677_v35 = vpop.xlane.xlu0 %2676  ;;  %2704 = vst.msk [vmem:[#allocation6 + $0x8] sm:$0xff] %vm1606_vm5, %v2690_v24  ;;  %8071 = vmatmul.mubr.msk.f32.vlgmr.msra.gmra.mxu1 %vm1606_vm5, %v2690_v24 }
 0xb71   :  { %8516 = vrcp.f32 %v2677_v35  ;;  %8081 = vmatpush3.msra.mxu1 %v2951_v48  ;;  %8084 = vmatprep.mubr.msk.f32.mxu1 %vm8675_vm1, %v8674_v34 }
 0xb72   :  { %8082 = vmatprep.subr.mxu1 %v8674_v34 }
 0xb73   :  { %8083 = vmatpush3.msra.mxu1 %v2949_v13 }
 0xb74   :  { %8094 = vmatprep.subr.mxu1 %v8674_v34 }
 0xb75   :  { %v8511_v27 = vpop.eup %8510 }
 0xb76   :  { %v2692_v42 = vmul.f32 %v8511_v27, %v9361_v61 }
 0xb77   :  { %v2683_v51 = vpop.xlane.xlu0 %2682 }
 0xb78   :  { %8518 = vrcp.f32 %v2683_v51  ;;  %2705 = vst.msk [vmem:[#allocation6 + $0x10] sm:$0xff] %vm1606_vm5, %v2692_v42  ;;  %8078 = vmatmul.mubr.msk.f32.vlgmr.msra.gmra.mxu0 %vm1606_vm5, %v2692_v42 }
 0xb79   :  { %v8513_v39 = vpop.eup %8512  ;;  %8088 = vmatpush3.msra.mxu0 %v3030_v31  ;;  %8091 = vmatprep.mubr.msk.f32.mxu0 %vm8675_vm1, %v8674_v34 }
 0xb7a   :  { %8089 = vmatprep.subr.mxu0 %v8674_v34  ;;  %v2694_v52 = vmul.f32 %v8513_v39, %v9365_v3 }
 0xb7b   :  { %8090 = vmatpush3.msra.mxu0 %v3028_v33  ;;  %v3186_v54 = vpop.permute.xlu0 %3185 }
 0xb7c   :  { %2706 = vst.msk [vmem:[#allocation6 + $0x18] sm:$0xff] %vm1606_vm5, %v2694_v52  ;;  %8085 = vmatmul.mubr.msk.f32.vlgmr.msra.gmra.mxu1 %vm1606_vm5, %v2694_v52  ;;  %8101 = vmatprep.subr.mxu0 %v8674_v34 }
 0xb7d   :  { %v8515_v29 = vpop.eup %8514  ;;  %8095 = vmatpush3.msra.mxu1 %v3109_v14  ;;  %8098 = vmatprep.mubr.msk.f32.mxu1 %vm8675_vm1, %v8674_v34 }
 0xb7e   :  { %v8517_v44 = vpop.eup %8516  ;;  %8096 = vmatprep.subr.mxu1 %v8674_v34  ;;  %v2698_v53 = vmul.f32 %v8515_v29, %v9371_v7 }
 0xb7f   :  { %8097 = vmatpush3.msra.mxu1 %v3107_v15  ;;  %v2696_v1 = vmul.f32 %v8517_v44, %v9374_v8  ;;  %v3374_v8 = vld [vmem:[%s10281_s13 + $0x8] sm:$0xff] }
 0xb80   :  { %8108 = vmatprep.subr.mxu1 %v8674_v34  ;;  %2708 = vst.msk [vmem:[#allocation6 + $0x48] sm:$0xff] %vm1606_vm5, %v2698_v53  ;;  %8099 = vmatmul.mubr.msk.f32.vlgmr.msra.gmra.mxu1 %vm1606_vm5, %v2698_v53 }
 0xb81   :  { %2707 = vst.msk [vmem:[#allocation6 + $0x40] sm:$0xff] %vm1606_vm5, %v2696_v1  ;;  %8092 = vmatmul.mubr.msk.f32.vlgmr.msra.gmra.mxu0 %vm1606_vm5, %v2696_v1  ;;  %8109 = vmatpush3.msra.mxu1 %v3267_v11  ;;  %v7477_v11 = vld [vmem:[%s10282_s14] ss:$0 sm:$0xff]  ;;  %v3513_v1 = vld [vmem:[%s10283_s15 + $0x18] sm:$0xff] }
 0xb82   :  { %8102 = vmatpush3.msra.mxu0 %v9388_v0  ;;  %8105 = vmatprep.mubr.msk.f32.mxu0 %vm8675_vm1, %v8674_v34 }
 0xb83   :  { %8103 = vmatprep.subr.mxu0 %v8674_v34  ;;  %8110 = vmatprep.subr.mxu1 %v8674_v34 }
 0xb84   :  { %8104 = vmatpush3.msra.mxu0 %v3186_v54  ;;  %8112 = vmatprep.mubr.msk.f32.mxu1 %vm8675_vm1, %v8674_v34  ;;  %v3512_v54 = vld [vmem:[%s10283_s15 + $0x10] sm:$0xff] }
 0xb85   :  { %v8519_v32 = vpop.eup %8518  ;;  %8115 = vmatprep.subr.mxu0 %v3376_v5 }
 0xb86   :  { %v2700_v55 = vmul.f32 %v8519_v32, %v9381_v18  ;;  %v3511_v32 = vld [vmem:[%s10283_s15 + $0x8] sm:$0xff] }
 0xb88   :  { %2709 = vst.msk [vmem:[#allocation6 + $0x50] sm:$0xff] %vm1606_vm5, %v2700_v55  ;;  %8106 = vmatmul.mubr.msk.f32.vlgmr.msra.gmra.mxu0 %vm1606_vm5, %v2700_v55  ;;  %v3510_v55 = vld [vmem:[%s10283_s15] sm:$0xff] }
 0xb89   :  { %8116 = vmatpush3.msra.mxu0 %v3376_v5  ;;  %v7480_v5 = vld [vmem:[%s10329_s30 + $0x4] ss:$0 sm:$0xff] }
 0xb8a   :  { %8117 = vmatprep.subr.mxu0 %v3375_v6 }
 0xb8b   :  { %8118 = vmatpush3.msra.mxu0 %v3375_v6 }
 0xb8c   :  { %8119 = vmatprep.subr.mxu0 %v3374_v8 }
 0xb8d   :  { %8120 = vmatpush3.msra.mxu0 %v3374_v8 }
 0xb8e   :  { %8121 = vmatprep.subr.mxu0 %v3373_v12 }
 0xb8f   :  { %8122 = vmatpush3.msra.mxu0 %v3373_v12 }
 0xbac   :  { %v2686_v36 = vpop.xlane.xlu1 %2685 }
 0xbad   :  { %8520 = vrcp.f32 %v2686_v36  ;;  %v3611_v36 = vld [vmem:[%s10285_s17 + $0x38] sm:$0xff] }
 0xbae   :  { %8137 = vmatprep.subr.mxu0 %v3611_v36 }
 0xbb0   :  { %v3265_v57 = vpop.permute.xlu1 %3264 }
 0xbb1   :  { %8111 = vmatpush3.msra.mxu1 %v3265_v57  ;;  %v3610_v57 = vld [vmem:[%s10285_s17 + $0x30] sm:$0xff] }
 0xbb2   :  { %8126 = vmatprep.subr.mxu1 %v3513_v1 }
 0xbba   :  { %v8521_v58 = vpop.eup %8520 }
 0xbbb   :  { %v2702_v59 = vmul.f32 %v8521_v58, %v9390_v47  ;;  %v3609_v58 = vld [vmem:[%s10285_s17 + $0x28] sm:$0xff] }
 0xbbd   :  { %2710 = vst.msk [vmem:[#allocation6 + $0x58] sm:$0xff] %vm1606_vm5, %v2702_v59  ;;  %8113 = vmatmul.mubr.msk.f32.vlgmr.msra.gmra.mxu1 %vm1606_vm5, %v2702_v59  ;;  %v3608_v59 = vld [vmem:[%s10285_s17 + $0x20] sm:$0xff] }
 0xbbe   :  { %8127 = vmatpush3.msra.mxu1 %v3513_v1 }
 0xbbf   :  { %8128 = vmatprep.subr.mxu1 %v3512_v54 }
 0xbc0   :  { %8129 = vmatpush3.msra.mxu1 %v3512_v54 }
 0xbc1   :  { %8130 = vmatprep.subr.mxu1 %v3511_v32 }
 0xbc2   :  { %8131 = vmatpush3.msra.mxu1 %v3511_v32 }
 0xbc3   :  { %8132 = vmatprep.subr.mxu1 %v3510_v55 }
 0xbc4   :  { %8133 = vmatpush3.msra.mxu1 %v3510_v55 }
 0xbf4   :  { %v2786_v60 = vpop.f32.mrf.mxu1 }
 0xbf6   :  { %v8065_v61 = vpop.f32.mrf.mxu1 }
 0xc30   :  { %v2865_v62 = vpop.f32.mrf.mxu1 }
 0xc31   :  { %3345 = vrot.lane.b32.xlu0 %v2865_v62, %s10337_s4 }
 0xc32   :  { %v8072_v63 = vpop.f32.mrf.mxu1 }
 0xc38   :  { %v2944_v2 = vpop.f32.mrf.mxu0 }
 0xc39   :  { %3353 = vrot.lane.b32.xlu0 %v2944_v2, %s10338_s1 }
 0xc3a   :  { %v8079_v3 = vpop.f32.mrf.mxu0 }
 0xc3c   :  { %v3023_v4 = vpop.f32.mrf.mxu1 }
 0xc3d   :  { %3361 = vrot.lane.b32.xlu0 %v3023_v4, %s10339_s7 }
 0xc3e   :  { %v8086_v7 = vpop.f32.mrf.mxu1 }
 0xc3f   :  { %v7481_v7 = vld [vmem:[%s10329_s30 + $0x5] ss:$0 sm:$0xff] }
 0xc40   :  { %v3181_v10 = vpop.f32.mrf.mxu1 }
 0xc41   :  { %v3102_v17 = vpop.f32.mrf.mxu0  ;;  %3347 = vrot.lane.b32.xlu1 %v3181_v10, %s10337_s4 }
 0xc42   :  { %v8100_v18 = vpop.f32.mrf.mxu1 }
 0xc43   :  { %v8093_v19 = vpop.f32.mrf.mxu0 }
 0xc48   :  { %v3260_v20 = vpop.f32.mrf.mxu0 }
 0xc49   :  { %3355 = vrot.lane.b32.xlu1 %v3260_v20, %s10338_s1  ;;  %v3607_v20 = vld [vmem:[%s10285_s17 + $0x18] sm:$0xff] }
 0xc4a   :  { %v8107_v21 = vpop.f32.mrf.mxu0 }
 0xc4b   :  { %v3606_v21 = vld [vmem:[%s10285_s17 + $0x10] sm:$0xff] }
 0xc7d   :  { %v3339_v23 = vpop.f32.mrf.mxu1 }
 0xc7e   :  { %3363 = vrot.lane.b32.xlu1 %v3339_v23, %s10339_s7  ;;  %v3605_v23 = vld [vmem:[%s10285_s17 + $0x8] sm:$0xff] }
 0xc7f   :  { %v8114_v26 = vpop.f32.mrf.mxu1 }
 0xc80   :  { %v3604_v26 = vld [vmem:[%s10285_s17] sm:$0xff] }
 0xca3   :  { %v3346_v30 = vpop.permute.xlu0 %3345 }
 0xca4   :  { %v3367_v33 = vsel %vm253_vm2, %v2786_v60, %v3346_v30  ;;  %v7482_v30 = vld [vmem:[%s10284_s16] ss:$0 sm:$0xff] }
 0xcab   :  { %v3354_v31 = vpop.permute.xlu0 %3353 }
 0xcac   :  { %v3369_v0 = vsel %vm1606_vm5, %v3367_v33, %v3354_v31 }
 0xcaf   :  { %v3362_v47 = vpop.permute.xlu0 %3361 }
 0xcb0   :  { %v3371_v41 = vsel %vm1609_vm6, %v3369_v0, %v3362_v47 }
 0xcb1   :  { %8123 = vmatprep.mubr.msk.f32.mxu0 %vm105_vm0, %v3371_v41 }
 0xcb3   :  { %v3348_v40 = vpop.permute.xlu1 %3347 }
 0xcb4   :  { %v3368_v38 = vsel %vm253_vm2, %v3102_v17, %v3348_v40 }
 0xcbb   :  { %v3356_v37 = vpop.permute.xlu1 %3355 }
 0xcbc   :  { %v3370_v48 = vsel %vm1606_vm5, %v3368_v38, %v3356_v37  ;;  %v7487_v38 = vld [vmem:[%s10286_s18] ss:$0 sm:$0xff] }
 0xcf0   :  { %v3364_v13 = vpop.permute.xlu1 %3363 }
 0xcf1   :  { %v3372_v14 = vsel %vm1609_vm6, %v3370_v48, %v3364_v13 }
 0xcf2   :  { %8124 = vmatmul.mubr.msk.f32.vlgmr.msra.gmra.mxu0 %vm105_vm0, %v3372_v14 }
 0xcf3   :  { %8138 = vmatpush3.msra.mxu0 %v3611_v36 }
 0xcf4   :  { %8139 = vmatprep.subr.mxu0 %v3610_v57 }
 0xcf5   :  { %8140 = vmatpush3.msra.mxu0 %v3610_v57 }
 0xcf6   :  { %8141 = vmatprep.subr.mxu0 %v3609_v58 }
 0xcf7   :  { %8142 = vmatpush3.msra.mxu0 %v3609_v58  ;;  %v7490_v58 = vld [vmem:[%s10329_s30 + $0x6] ss:$0 sm:$0xff] }
 0xcf8   :  { %8143 = vmatprep.subr.mxu0 %v3608_v59 }
 0xcf9   :  { %8144 = vmatpush3.msra.mxu0 %v3608_v59 }
 0xcfa   :  { %8145 = vmatprep.subr.mxu0 %v3607_v20 }
 0xcfb   :  { %8146 = vmatpush3.msra.mxu0 %v3607_v20 }
 0xcfc   :  { %8147 = vmatprep.subr.mxu0 %v3606_v21 }
 0xcfd   :  { %8148 = vmatpush3.msra.mxu0 %v3606_v21 }
 0xcfe   :  { %8149 = vmatprep.subr.mxu0 %v3605_v23 }
 0xcff   :  { %8150 = vmatpush3.msra.mxu0 %v3605_v23 }
 0xd00   :  { %8151 = vmatprep.subr.mxu0 %v3604_v26 }
 0xd01   :  { %8152 = vmatpush3.msra.mxu0 %v3604_v26 }
 0xd02   :  { %8177 = vmatprep.subr.mxu0 %v8674_v34 }
 0xdb2   :  { %v8125_v15 = vpop.f32.mrf.mxu0 }
 0xdb3   :  { %v3459_v49 = vadd.f32 %v8125_v15, %v9083_v43 }
 0xdb4   :  { %v3449_v45 = vpop.f32.mrf.mxu0 }
 0xdb5   :  { %v9473_v22 = vadd.f32 %v7477_v11, %v3459_v49  ;;  %v3458_v46 = vadd.f32 %v3449_v45, %v9086_v28 }
 0xdb7   :  { %v9476_v24 = vadd.f32 %v7477_v11, %v3458_v46  ;;  %v3475_v25 = vsel %vm105_vm0, %v9473_v22, 0.0 }
 0xdb8   :  { %3476 = vadd.xlane.f32.xlu1 %v3475_v25 }
 0xdb9   :  { %v3472_v35 = vsel %vm105_vm0, %v9476_v24, 0.0 }
 0xdba   :  { %3473 = vadd.xlane.f32.xlu0 %v3472_v35 }
 0xe41   :  { %v3477_v27 = vpop.xlane.xlu1 %3476 }
 0xe42   :  { %v3479_v42 = vmul.f32 0.03125, %v3477_v27 }
 0xe43   :  { %v3474_v51 = vpop.xlane.xlu0 %3473 }
 0xe44   :  { %v3478_v39 = vmul.f32 0.03125, %v3474_v51  ;;  %v3481_v43 = vsub.f32 %v9473_v22, %v3479_v42 }
 0xe46   :  { %v3480_v52 = vsub.f32 %v9476_v24, %v3478_v39  ;;  %v3483_v44 = vmul.f32 %v3481_v43, %v3481_v43 }
 0xe48   :  { %v3482_v29 = vmul.f32 %v3480_v52, %v3480_v52  ;;  %v3487_v53 = vsel %vm105_vm0, %v3483_v44, 0.0  ;;  %v7492_v44 = vld [vmem:[%s10328_s2 + $0x20] sm:$0xff] }
 0xe4a   :  { %v3484_v28 = vsel %vm105_vm0, %v3482_v29, 0.0  ;;  %v7494_v29 = vld [vmem:[%s10328_s2 + $0x30] sm:$0xff] }
 0xe4b   :  { %3485 = vadd.xlane.f32.xlu0 %v3484_v28  ;;  %v7493_v28 = vld [vmem:[%s10328_s2 + $0x28] sm:$0xff] }
 0xe4f   :  { %3488 = vadd.xlane.f32.xlu0 %v3487_v53 }
 0xed4   :  { %v3486_v60 = vpop.xlane.xlu0 %3485 }
 0xed5   :  { %v3490_v61 = vmul.f32 0.03125, %v3486_v60 }
 0xed7   :  { %v3492_v62 = vadd.f32 1e-06, %v3490_v61 }
 0xed8   :  { %v3489_v63 = vpop.xlane.xlu0 %3488 }
 0xed9   :  { %8522 = vrsqrt.f32 %v3492_v62  ;;  %v3491_v2 = vmul.f32 0.03125, %v3489_v63  ;;  %v7491_v63 = vld [vmem:[%s10329_s30 + $0x7] ss:$0 sm:$0xff] }
 0xedb   :  { %v3493_v3 = vadd.f32 1e-06, %v3491_v2 }
 0xedd   :  { %8524 = vrsqrt.f32 %v3493_v3 }
 0xee6   :  { %v8523_v4 = vpop.eup %8522 }
 0xee7   :  { %v3496_v6 = vmul.f32 %v8523_v4, %v3480_v52  ;;  %v7495_v52 = vld [vmem:[%s10328_s2 + $0x38] sm:$0xff] }
 0xee8   :  { %8156 = vmatprep.subr.mxu1 %v7495_v52 }
 0xee9   :  { %v3502_v8 = vmul.f32 %v7480_v5, %v3496_v6  ;;  %v7497_v6 = vld [vmem:[%s10330_s26 + $0x1] ss:$0 sm:$0xff]  ;;  %s10342_s26 = smov 64  }
 0xeea   :  { %v8525_v10 = vpop.eup %8524 }
 0xeeb   :  { %v3497_v12 = vmul.f32 %v8525_v10, %v3481_v43  ;;  %v3508_v17 = vadd.f32 %v7481_v7, %v3502_v8 }
 0xeed   :  { %v3503_v18 = vmul.f32 %v7480_v5, %v3497_v12  ;;  %8134 = vmatprep.mubr.msk.f32.mxu1 %vm105_vm0, %v3508_v17 }
 0xeef   :  { %v3509_v19 = vadd.f32 %v7481_v7, %v3503_v18 }
 0xef1   :  { %8135 = vmatmul.mubr.msk.f32.vlgmr.msra.gmra.mxu1 %vm105_vm0, %v3509_v19 }
 0xef2   :  { %8157 = vmatpush3.msra.mxu1 %v7495_v52 }
 0xef3   :  { %8158 = vmatprep.subr.mxu1 %v7494_v29 }
 0xef4   :  { %8159 = vmatpush3.msra.mxu1 %v7494_v29 }
 0xef5   :  { %8160 = vmatprep.subr.mxu1 %v7493_v28 }
 0xef6   :  { %8161 = vmatpush3.msra.mxu1 %v7493_v28 }
 0xef7   :  { %8162 = vmatprep.subr.mxu1 %v7492_v44 }
 0xef8   :  { %8163 = vmatpush3.msra.mxu1 %v7492_v44 }
 0xef9   :  { %8167 = vmatprep.subr.mxu1 %v8674_v34 }
 0xfb1   :  { %v8136_v31 = vpop.f32.mrf.mxu1 }
 0xfb2   :  { %v3599_v33 = vadd.f32 %v8136_v31, %v7482_v30 }
 0xfb3   :  { %v3593_v0 = vpop.f32.mrf.mxu1 }
 0xfb4   :  { %v3594_v47 = vadd.f32 %v7482_v30, %v3593_v0  ;;  %v3603_v40 = vmax.f32 %v3599_v33, 0.0 }
 0xfb6   :  { %v3602_v41 = vmax.f32 %v3594_v47, 0.0 }
 0xfb8   :  { %8153 = vmatprep.mubr.msk.f32.mxu0 %vm3612_vm9, %v3602_v41 }
 0xfb9   :  { %8154 = vmatmul.mubr.msk.f32.vlgmr.msra.gmra.mxu0 %vm3612_vm9, %v3603_v40 }
 0xfba   :  { %8179 = vmatprep.mubr.msk.f32.mxu0 %vm8675_vm1, %v8674_v34 }
0x1079   :  { %v8155_v37 = vpop.f32.mrf.mxu0 }
0x107a   :  { %v3695_v48 = vadd.f32 %v8155_v37, %v9473_v22 }
0x107b   :  { %v3685_v13 = vpop.f32.mrf.mxu0 }
0x107c   :  { %v9542_v14 = vadd.f32 %v7487_v38, %v3695_v48  ;;  %v3694_v15 = vadd.f32 %v3685_v13, %v9476_v24 }
0x107e   :  { %v9545_v11 = vadd.f32 %v7487_v38, %v3694_v15  ;;  %v3711_v49 = vsel %vm105_vm0, %v9542_v14, 0.0 }
0x107f   :  { %3712 = vadd.xlane.f32.xlu1 %v3711_v49 }
0x1080   :  { %v3708_v45 = vsel %vm105_vm0, %v9545_v11, 0.0 }
0x1081   :  { %3709 = vadd.xlane.f32.xlu0 %v3708_v45 }
0x1108   :  { %v3713_v46 = vpop.xlane.xlu1 %3712 }
0x1109   :  { %v3715_v25 = vmul.f32 0.03125, %v3713_v46 }
0x110a   :  { %v3710_v35 = vpop.xlane.xlu0 %3709 }
0x110b   :  { %v3717_v22 = vsub.f32 %v9542_v14, %v3715_v25  ;;  %v3714_v27 = vmul.f32 0.03125, %v3710_v35 }
0x110d   :  { %v3716_v42 = vsub.f32 %v9545_v11, %v3714_v27  ;;  %v3719_v51 = vmul.f32 %v3717_v22, %v3717_v22 }
0x110f   :  { %v3723_v24 = vsel %vm105_vm0, %v3719_v51, 0.0  ;;  %v3718_v39 = vmul.f32 %v3716_v42, %v3716_v42 }
0x1110   :  { %3724 = vadd.xlane.f32.xlu1 %v3723_v24 }
0x1111   :  { %v3720_v43 = vsel %vm105_vm0, %v3718_v39, 0.0 }
0x1112   :  { %3721 = vadd.xlane.f32.xlu0 %v3720_v43 }
0x1199   :  { %v3725_v53 = vpop.xlane.xlu1 %3724 }
0x119a   :  { %v3727_v1 = vmul.f32 0.03125, %v3725_v53 }
0x119b   :  { %v3722_v54 = vpop.xlane.xlu0 %3721 }
0x119c   :  { %v3729_v32 = vadd.f32 1e-06, %v3727_v1  ;;  %v3726_v55 = vmul.f32 0.03125, %v3722_v54 }
0x119e   :  { %8526 = vrsqrt.f32 %v3729_v32  ;;  %v3728_v36 = vadd.f32 1e-06, %v3726_v55 }
0x11a0   :  { %8528 = vrsqrt.f32 %v3728_v36 }
0x11ab   :  { %v8527_v57 = vpop.eup %8526 }
0x11ac   :  { %v3733_v59 = vmul.f32 %v8527_v57, %v3717_v22 }
0x11ad   :  { %v8529_v60 = vpop.eup %8528 }
0x11ae   :  { %v3732_v61 = vmul.f32 %v8529_v60, %v3716_v42  ;;  %v3739_v62 = vmul.f32 %v7490_v58, %v3733_v59 }
0x11b0   :  { %v3738_v2 = vmul.f32 %v7490_v58, %v3732_v61  ;;  %v3745_v4 = vadd.f32 %v7491_v63, %v3739_v62 }
0x11b2   :  { %v3744_v3 = vadd.f32 %v7491_v63, %v3738_v2 }
0x11b4   :  { %8164 = vmatprep.mubr.msk.f32.mxu1 %vm105_vm0, %v3744_v3 }
0x11b5   :  { %8165 = vmatmul.mubr.msk.f32.vlgmr.msra.gmra.mxu1 %vm105_vm0, %v3745_v4 }
0x11b6   :  { %8169 = vmatprep.mubr.msk.f32.mxu1 %vm8675_vm1, %v8674_v34 }
0x1275   :  { %v8166_v5 = vpop.f32.mrf.mxu1 }
0x1276   :  { %v9587_v10 = vadd.f32 %v8166_v5, %v7497_v6 }
0x1277   :  { %v3831_v7 = vpop.f32.mrf.mxu1 }
0x1278   :  { %v9581_v8 = vadd.f32 %v7497_v6, %v3831_v7 }
0x127a   :  { %3846 = vrot.lane.b32.xlu1 %v9581_v8, %s10334_s25  ;;  %3842 = vrot.lane.b32.xlu0 %v9581_v8, %s10340_s0 }
0x127e   :  { %3850 = vrot.lane.b32.xlu1 %v9581_v8, %s10341_s19  ;;  %3848 = vrot.lane.b32.xlu0 %v9587_v10, %s10334_s25 }
0x1282   :  { %3844 = vrot.lane.b32.xlu1 %v9587_v10, %s10340_s0  ;;  %3854 = vrot.lane.b32.xlu0 %v9581_v8, %s10336_s24 }
0x1286   :  { %3852 = vrot.lane.b32.xlu1 %v9587_v10, %s10341_s19 }
0x12ec   :  { %v9599_v12 = vpop.permute.xlu1 %3846  ;;  %v9601_v17 = vpop.permute.xlu0 %3842 }
0x12ed   :  { %4006 = vrot.lane.b32.xlu0 %v9599_v12, %s10336_s24  ;;  %3930 = vrot.lane.b32.xlu1 %v9601_v17, %s10336_s24 }
0x12f0   :  { %v9607_v18 = vpop.permute.xlu1 %3850  ;;  %v9609_v19 = vpop.permute.xlu0 %3848 }
0x12f1   :  { %4158 = vrot.lane.b32.xlu0 %v9587_v10, %s10336_s24  ;;  %4082 = vrot.lane.b32.xlu1 %v9607_v18, %s10336_s24 }
0x12f4   :  { %v9615_v20 = vpop.permute.xlu1 %3844  ;;  %v3855_v21 = vpop.permute.xlu0 %3854 }
0x12f5   :  { %4234 = vrot.lane.b32.xlu1 %v9615_v20, %s10336_s24  ;;  %4310 = vrot.lane.b32.xlu0 %v9609_v19, %s10336_s24 }
0x12f6   :  { %8168 = vmatpush3.xpose.msk.msra.mxu1 %vm253_vm2, %v3855_v21 }
0x12f7   :  { %8172 = vmatprep.subr.mxu1 %v8674_v34 }
0x12f8   :  { %v9623_v23 = vpop.permute.xlu1 %3852 }
0x12f9   :  { %8170 = vmatmul.mubr.msk.f32.vlgmr.msra.gmra.mxu1 %vm253_vm2, %v9581_v8  ;;  %4386 = vrot.lane.b32.xlu1 %v9623_v23, %s10336_s24 }
0x12fa   :  { %8174 = vmatprep.mubr.msk.f32.mxu1 %vm8675_vm1, %v8674_v34 }
0x135f   :  { %v3931_v26 = vpop.permute.xlu1 %3930  ;;  %v4007_v30 = vpop.permute.xlu0 %4006 }
0x1360   :  { %8173 = vmatpush3.xpose.msk.msra.mxu1 %vm253_vm2, %v3931_v26  ;;  %8178 = vmatpush3.xpose.msk.msra.mxu0 %vm253_vm2, %v4007_v30 }
0x1361   :  { %8182 = vmatprep.subr.mxu1 %v8674_v34  ;;  %8187 = vmatprep.subr.mxu0 %v8674_v34 }
0x1363   :  { %v4083_v31 = vpop.permute.xlu1 %4082  ;;  %8175 = vmatmul.mubr.msk.f32.vlgmr.msra.gmra.mxu1 %vm253_vm2, %v9601_v17  ;;  %8180 = vmatmul.mubr.msk.f32.vlgmr.msra.gmra.mxu0 %vm253_vm2, %v9599_v12  ;;  %v4159_v33 = vpop.permute.xlu0 %4158 }
0x1364   :  { %8183 = vmatpush3.xpose.msk.msra.mxu1 %vm253_vm2, %v4083_v31  ;;  %8188 = vmatpush3.xpose.msk.msra.mxu0 %vm253_vm2, %v4159_v33 }
0x1365   :  { %8184 = vmatprep.mubr.msk.f32.mxu1 %vm8675_vm1, %v8674_v34  ;;  %8189 = vmatprep.mubr.msk.f32.mxu0 %vm8675_vm1, %v8674_v34 }
0x1366   :  { %8192 = vmatprep.subr.mxu1 %v8674_v34  ;;  %8197 = vmatprep.subr.mxu0 %v8674_v34 }
0x1367   :  { %v4235_v0 = vpop.permute.xlu1 %4234  ;;  %8185 = vmatmul.mubr.msk.f32.vlgmr.msra.gmra.mxu1 %vm253_vm2, %v9607_v18  ;;  %8190 = vmatmul.mubr.msk.f32.vlgmr.msra.gmra.mxu0 %vm253_vm2, %v9587_v10  ;;  %v4311_v47 = vpop.permute.xlu0 %4310 }
0x1368   :  { %8193 = vmatpush3.xpose.msk.msra.mxu1 %vm253_vm2, %v4235_v0  ;;  %8198 = vmatpush3.xpose.msk.msra.mxu0 %vm253_vm2, %v4311_v47 }
0x1369   :  { %8194 = vmatprep.mubr.msk.f32.mxu1 %vm8675_vm1, %v8674_v34  ;;  %8199 = vmatprep.mubr.msk.f32.mxu0 %vm8675_vm1, %v8674_v34 }
0x136a   :  { %8202 = vmatprep.subr.mxu1 %v8674_v34  ;;  %8207 = vmatprep.subr.mxu0 %v8674_v34 }
0x136b   :  { %v4387_v41 = vpop.permute.xlu1 %4386  ;;  %8195 = vmatmul.mubr.msk.f32.vlgmr.msra.gmra.mxu1 %vm253_vm2, %v9615_v20  ;;  %8200 = vmatmul.mubr.msk.f32.vlgmr.msra.gmra.mxu0 %vm253_vm2, %v9609_v19 }
0x136c   :  { %8203 = vmatpush3.xpose.msk.msra.mxu1 %vm253_vm2, %v4387_v41  ;;  %8204 = vmatprep.mubr.msk.f32.mxu1 %vm8675_vm1, %v8674_v34 }
0x136d   :  { %8212 = vmatprep.subr.mxu1 %v8674_v34  ;;  %8209 = vmatprep.mubr.msk.f32.mxu0 %vm8675_vm1, %v8674_v34 }
0x136f   :  { %8205 = vmatmul.mubr.msk.f32.vlgmr.msra.gmra.mxu1 %vm253_vm2, %v9623_v23 }
0x1370   :  { %8214 = vmatprep.mubr.msk.f32.mxu1 %vm8675_vm1, %v8674_v34 }
0x13b9   :  { %v3926_v40 = vpop.f32.mrf.mxu1 }
0x13ba   :  { %v4462_v37 = vmul.f32 0.35355338, %v3926_v40 }
0x13bb   :  { %v8171_v38 = vpop.f32.mrf.mxu1 }
0x13bc   :  { %v4470_v48 = vadd.f32 %v4462_v37, %v8951_v56 }
0x13be   :  { %v4478_v13 = vsel %vm253_vm2, %v4470_v48, -inf }
0x13bf   :  { %4479 = vmax.xlane.f32.xlu0 %v4478_v13 }
0x1423   :  { %v4002_v15 = vpop.f32.mrf.mxu1  ;;  %v4078_v49 = vpop.f32.mrf.mxu0 }
0x1424   :  { %v4463_v45 = vmul.f32 0.35355338, %v4002_v15  ;;  %v4464_v46 = vmul.f32 0.35355338, %v4078_v49 }
0x1425   :  { %v8176_v25 = vpop.f32.mrf.mxu1  ;;  %v8181_v35 = vpop.f32.mrf.mxu0 }
0x1426   :  { %v4471_v22 = vadd.f32 %v4463_v45, %v8951_v56  ;;  %v4472_v27 = vadd.f32 %v4464_v46, %v8951_v56 }
0x1427   :  { %v4154_v42 = vpop.f32.mrf.mxu1  ;;  %v4230_v51 = vpop.f32.mrf.mxu0 }
0x1428   :  { %v4465_v24 = vmul.f32 0.35355338, %v4154_v42  ;;  %v4466_v39 = vmul.f32 0.35355338, %v4230_v51  ;;  %v4481_v43 = vsel %vm253_vm2, %v4471_v22, -inf  ;;  %v4484_v52 = vsel %vm253_vm2, %v4472_v27, -inf }
0x1429   :  { %4482 = vmax.xlane.f32.xlu1 %v4481_v43  ;;  %v8186_v29 = vpop.f32.mrf.mxu1  ;;  %4485 = vmax.xlane.f32.xlu0 %v4484_v52  ;;  %v8191_v28 = vpop.f32.mrf.mxu0 }
0x142a   :  { %v4473_v44 = vadd.f32 %v4465_v24, %v8951_v56  ;;  %v4474_v54 = vadd.f32 %v4466_v39, %v8963_v16 }
0x142b   :  { %v4306_v53 = vpop.f32.mrf.mxu1  ;;  %v4382_v1 = vpop.f32.mrf.mxu0 }
0x142c   :  { %v4467_v32 = vmul.f32 0.35355338, %v4306_v53  ;;  %v4468_v55 = vmul.f32 0.35355338, %v4382_v1  ;;  %v4487_v36 = vsel %vm253_vm2, %v4473_v44, -inf  ;;  %v4490_v56 = vsel %vm253_vm2, %v4474_v54, -inf }
0x142d   :  { %v8196_v57 = vpop.f32.mrf.mxu1  ;;  %4488 = vmax.xlane.f32.xlu0 %v4487_v36  ;;  %v8201_v58 = vpop.f32.mrf.mxu0 }
0x142e   :  { %v4475_v59 = vadd.f32 %v4467_v32, %v8963_v16  ;;  %v4476_v61 = vadd.f32 %v4468_v55, %v8963_v16 }
0x142f   :  { %v4458_v60 = vpop.f32.mrf.mxu1 }
0x1430   :  { %v4469_v62 = vmul.f32 0.35355338, %v4458_v60  ;;  %v4493_v63 = vsel %vm253_vm2, %v4475_v59, -inf  ;;  %v4496_v5 = vsel %vm253_vm2, %v4476_v61, -inf }
0x1431   :  { %4494 = vmax.xlane.f32.xlu1 %v4493_v63  ;;  %v8206_v2 = vpop.f32.mrf.mxu1  ;;  %4491 = vmax.xlane.f32.xlu0 %v4490_v56 }
0x1432   :  { %v4477_v3 = vadd.f32 %v4469_v62, %v8963_v16 }
0x1434   :  { %v4499_v4 = vsel %vm253_vm2, %v4477_v3, -inf }
0x1435   :  { %4500 = vmax.xlane.f32.xlu1 %v4499_v4  ;;  %4497 = vmax.xlane.f32.xlu0 %v4496_v5 }
0x1446   :  { %4651 = vrot.lane.b32.xlu1 %v9601_v17, %s10342_s26 }
0x1448   :  { %v4480_v16 = vpop.xlane.xlu0 %4479 }
0x1449   :  { %v4502_v6 = vsub.f32 %v4470_v48, %v4480_v16 }
0x144a   :  { %4727 = vrot.lane.b32.xlu1 %v9599_v12, %s10342_s26 }
0x144b   :  { %4575 = vrot.lane.b32.xlu0 %v9581_v8, %s10342_s26  ;;  %v4510_v7 = vmul.f32 1.442695, %v4502_v6 }
0x144d   :  { %8530 = vpow2.f32 %v4510_v7 }
0x144e   :  { %4803 = vrot.lane.b32.xlu1 %v9607_v18, %s10342_s26 }
0x144f   :  { %4879 = vrot.lane.b32.xlu0 %v9587_v10, %s10342_s26 }
0x1452   :  { %4955 = vrot.lane.b32.xlu1 %v9615_v20, %s10342_s26 }
0x145a   :  { %v9701_v17 = vpop.eup %8530 }
0x145b   :  { %v4526_v12 = vsel %vm253_vm2, %v9701_v17, 0.0 }
0x146e   :  { %4527 = vadd.xlane.f32.xlu0 %v4526_v12 }
0x14b2   :  { %v4483_v8 = vpop.xlane.xlu1 %4482  ;;  %v4486_v21 = vpop.xlane.xlu0 %4485 }
0x14b3   :  { %v4503_v26 = vsub.f32 %v4471_v22, %v4483_v8  ;;  %v4504_v18 = vsub.f32 %v4472_v27, %v4486_v21 }
0x14b5   :  { %v4512_v30 = vmul.f32 1.442695, %v4503_v26  ;;  %v4514_v31 = vmul.f32 1.442695, %v4504_v18 }
0x14b6   :  { %v4489_v10 = vpop.xlane.xlu0 %4488 }
0x14b7   :  { %8532 = vpow2.f32 %v4512_v30  ;;  %v4505_v33 = vsub.f32 %v4473_v44, %v4489_v10 }
0x14b8   :  { %8534 = vpow2.f32 %v4514_v31 }
0x14b9   :  { %v4516_v20 = vmul.f32 1.442695, %v4505_v33 }
0x14ba   :  { %v4495_v0 = vpop.xlane.xlu1 %4494  ;;  %v4492_v47 = vpop.xlane.xlu0 %4491 }
0x14bb   :  { %8536 = vpow2.f32 %v4516_v20  ;;  %v4507_v41 = vsub.f32 %v4475_v59, %v4495_v0  ;;  %v4506_v40 = vsub.f32 %v4474_v54, %v4492_v47  ;;  %v7527_v47 = vld [vmem:[%s10332_s29 + $0x38] sm:$0xff] }
0x14bd   :  { %v4520_v37 = vmul.f32 1.442695, %v4507_v41  ;;  %v4518_v38 = vmul.f32 1.442695, %v4506_v40  ;;  %v7526_v41 = vld [vmem:[%s10332_s29 + $0x30] sm:$0xff] }
0x14be   :  { %v4501_v48 = vpop.xlane.xlu1 %4500  ;;  %v4498_v13 = vpop.xlane.xlu0 %4497 }
0x14bf   :  { %8538 = vpow2.f32 %v4520_v37  ;;  %v4509_v15 = vsub.f32 %v4477_v3, %v4501_v48  ;;  %v4508_v49 = vsub.f32 %v4476_v61, %v4498_v13  ;;  %v7524_v48 = vld [vmem:[%s10332_s29 + $0x20] sm:$0xff] }
0x14c0   :  { %8540 = vpow2.f32 %v4518_v38  ;;  %v7525_v38 = vld [vmem:[%s10332_s29 + $0x28] sm:$0xff] }
0x14c1   :  { %v4524_v45 = vmul.f32 1.442695, %v4509_v15  ;;  %v4522_v46 = vmul.f32 1.442695, %v4508_v49 }
0x14c2   :  { %v4652_v25 = vpop.permute.xlu1 %4651  ;;  %v4576_v35 = vpop.permute.xlu0 %4575 }
0x14c3   :  { %8542 = vpow2.f32 %v4524_v45  ;;  %8208 = vmatpush3.msra.mxu0 %v4576_v35  ;;  %8213 = vmatpush3.msra.mxu1 %v4652_v25 }
0x14c4   :  { %v8533_v22 = vpop.eup %8532  ;;  %8544 = vpow2.f32 %v4522_v46  ;;  %8217 = vmatprep.subr.mxu0 %v8674_v34  ;;  %8222 = vmatprep.subr.mxu1 %v8674_v34 }
0x14c5   :  { %v8535_v27 = vpop.eup %8534  ;;  %v4529_v42 = vsel %vm253_vm2, %v8533_v22, 0.0 }
0x14c6   :  { %4530 = vadd.xlane.f32.xlu1 %v4529_v42  ;;  %v4532_v51 = vsel %vm253_vm2, %v8535_v27, 0.0  ;;  %v4880_v32 = vpop.permute.xlu0 %4879  ;;  %v4728_v58 = vpop.permute.xlu1 %4727 }
0x14c7   :  { %4533 = vadd.xlane.f32.xlu0 %v4532_v51 }
0x14c8   :  { %v8537_v24 = vpop.eup %8536 }
0x14c9   :  { %v4535_v39 = vsel %vm253_vm2, %v8537_v24, 0.0 }
0x14ca   :  { %4536 = vadd.xlane.f32.xlu1 %v4535_v39 }
0x14cc   :  { %v9710_v43 = vpop.eup %8538 }
0x14cd   :  { %v9712_v52 = vpop.eup %8540  ;;  %v4541_v29 = vsel %vm253_vm2, %v9710_v43, 0.0 }
0x14ce   :  { %4542 = vadd.xlane.f32.xlu1 %v4541_v29  ;;  %v4538_v28 = vsel %vm253_vm2, %v9712_v52, 0.0 }
0x14cf   :  { %4539 = vadd.xlane.f32.xlu0 %v4538_v28 }
0x14d0   :  { %v9718_v44 = vpop.eup %8542 }
0x14d1   :  { %v9720_v53 = vpop.eup %8544  ;;  %v4547_v1 = vsel %vm253_vm2, %v9718_v44, 0.0 }
0x14d2   :  { %4548 = vadd.xlane.f32.xlu1 %v4547_v1  ;;  %v4544_v54 = vsel %vm253_vm2, %v9720_v53, 0.0 }
0x14d3   :  { %4545 = vadd.xlane.f32.xlu0 %v4544_v54 }
0x14e3   :  { %5107 = vrot.lane.b32.xlu1 %v9623_v23, %s10342_s26  ;;  %v4804_v23 = vpop.permute.xlu1 %4803 }
0x14e7   :  { %v4956_v59 = vpop.permute.xlu1 %4955 }
0x14e9   :  { %5031 = vrot.lane.b32.xlu0 %v9609_v19, %s10342_s26 }
0x14f7   :  { %v4528_v55 = vpop.xlane.xlu0 %4527 }
0x14f8   :  { %8546 = vrcp.f32 %v4528_v55 }
0x1505   :  { %v8547_v36 = vpop.eup %8546 }
0x1506   :  { %v4551_v57 = vmul.f32 %v8547_v36, %v9701_v17 }
0x1508   :  { %4567 = vst.msk [vmem:[#allocation4 + $0x20] sm:$0xff] %vm253_vm2, %v4551_v57  ;;  %8210 = vmatmul.mubr.msk.f32.vlgmr.msra.gmra.mxu0 %vm253_vm2, %v4551_v57  ;;  %v8606_v57 = vld [vmem:[%s10333_s6] sm:$0xff] }
0x1509   :  { %8218 = vmatpush3.msra.mxu0 %v4728_v58  ;;  %8219 = vmatprep.mubr.msk.f32.mxu0 %vm8675_vm1, %v8674_v34 }
0x150a   :  { %8227 = vmatprep.subr.mxu0 %v8674_v34 }
0x154f   :  { %v4531_v19 = vpop.xlane.xlu1 %4530 }
0x1550   :  { %8548 = vrcp.f32 %v4531_v19  ;;  %v4534_v60 = vpop.xlane.xlu0 %4533 }
0x1551   :  { %8550 = vrcp.f32 %v4534_v60 }
0x1553   :  { %v4537_v61 = vpop.xlane.xlu1 %4536 }
0x1554   :  { %8552 = vrcp.f32 %v4537_v61 }
0x1557   :  { %v4543_v62 = vpop.xlane.xlu1 %4542 }
0x1558   :  { %8554 = vrcp.f32 %v4543_v62  ;;  %v4540_v63 = vpop.xlane.xlu0 %4539 }
0x1559   :  { %8556 = vrcp.f32 %v4540_v63 }
0x155b   :  { %v4549_v56 = vpop.xlane.xlu1 %4548 }
0x155c   :  { %8558 = vrcp.f32 %v4549_v56  ;;  %v4546_v2 = vpop.xlane.xlu0 %4545 }
0x155d   :  { %v8549_v3 = vpop.eup %8548  ;;  %8560 = vrcp.f32 %v4546_v2  ;;  %v7547_v2 = vld [vmem:[%s10279_s11 + $0x38] sm:$0xff] }
0x155e   :  { %v8551_v4 = vpop.eup %8550  ;;  %v4553_v5 = vmul.f32 %v8549_v3, %v8533_v22 }
0x155f   :  { %v4555_v16 = vmul.f32 %v8551_v4, %v8535_v27  ;;  %v5108_v26 = vpop.permute.xlu1 %5107 }
0x1560   :  { %4568 = vst.msk [vmem:[#allocation4 + $0x28] sm:$0xff] %vm253_vm2, %v4553_v5  ;;  %8215 = vmatmul.mubr.msk.f32.vlgmr.msra.gmra.mxu1 %vm253_vm2, %v4553_v5  ;;  %v5032_v30 = vpop.permute.xlu0 %5031 }
0x1561   :  { %v8553_v6 = vpop.eup %8552  ;;  %4569 = vst.msk [vmem:[#allocation4 + $0x30] sm:$0xff] %vm253_vm2, %v4555_v16  ;;  %8220 = vmatmul.mubr.msk.f32.vlgmr.msra.gmra.mxu0 %vm253_vm2, %v4555_v16  ;;  %8223 = vmatpush3.msra.mxu1 %v4804_v23  ;;  %v7531_v23 = vld [vmem:[%s10276_s8 + $0x1] ss:$0 sm:$0xff] }
0x1562   :  { %8228 = vmatpush3.msra.mxu0 %v4880_v32  ;;  %8224 = vmatprep.mubr.msk.f32.mxu1 %vm8675_vm1, %v8674_v34  ;;  %v4557_v7 = vmul.f32 %v8553_v6, %v8537_v24 }
0x1563   :  { %8232 = vmatprep.subr.mxu1 %v8674_v34  ;;  %8229 = vmatprep.mubr.msk.f32.mxu0 %vm8675_vm1, %v8674_v34 }
0x1564   :  { %4570 = vst.msk [vmem:[#allocation4 + $0x38] sm:$0xff] %vm253_vm2, %v4557_v7  ;;  %8225 = vmatmul.mubr.msk.f32.vlgmr.msra.gmra.mxu1 %vm253_vm2, %v4557_v7  ;;  %8237 = vmatprep.subr.mxu0 %v8674_v34 }
0x1565   :  { %v8555_v17 = vpop.eup %8554  ;;  %8233 = vmatpush3.msra.mxu1 %v4956_v59  ;;  %8234 = vmatprep.mubr.msk.f32.mxu1 %vm8675_vm1, %v8674_v34 }
0x1566   :  { %v8557_v12 = vpop.eup %8556  ;;  %8242 = vmatprep.subr.mxu1 %v8674_v34  ;;  %v4561_v8 = vmul.f32 %v8555_v17, %v9710_v43 }
0x1567   :  { %v4559_v21 = vmul.f32 %v8557_v12, %v9712_v52 }
0x1568   :  { %4572 = vst.msk [vmem:[#allocation4 + $0x68] sm:$0xff] %vm253_vm2, %v4561_v8  ;;  %8235 = vmatmul.mubr.msk.f32.vlgmr.msra.gmra.mxu1 %vm253_vm2, %v4561_v8  ;;  %v7546_v8 = vld [vmem:[%s10279_s11 + $0x30] sm:$0xff] }
0x1569   :  { %v8559_v18 = vpop.eup %8558  ;;  %4571 = vst.msk [vmem:[#allocation4 + $0x60] sm:$0xff] %vm253_vm2, %v4559_v21  ;;  %8230 = vmatmul.mubr.msk.f32.vlgmr.msra.gmra.mxu0 %vm253_vm2, %v4559_v21  ;;  %8243 = vmatpush3.msra.mxu1 %v5108_v26  ;;  %v7545_v21 = vld [vmem:[%s10279_s11 + $0x28] sm:$0xff]  ;;  %v7544_v26 = vld [vmem:[%s10279_s11 + $0x20] sm:$0xff] }
0x156a   :  { %v8561_v31 = vpop.eup %8560  ;;  %8238 = vmatpush3.msra.mxu0 %v5032_v30  ;;  %8239 = vmatprep.mubr.msk.f32.mxu0 %vm8675_vm1, %v8674_v34  ;;  %v4565_v10 = vmul.f32 %v8559_v18, %v9718_v44  ;;  %v8607_v18 = vld [vmem:[%s10333_s6 + $0x8] sm:$0xff]  ;;  %v7539_v30 = vld [vmem:[%s10277_s9 + $0x38] sm:$0xff] }
0x156b   :  { %8244 = vmatprep.mubr.msk.f32.mxu1 %vm8675_vm1, %v8674_v34  ;;  %v4563_v33 = vmul.f32 %v8561_v31, %v9720_v53  ;;  %8247 = vmatprep.subr.mxu0 %v7527_v47  ;;  %v7538_v31 = vld [vmem:[%s10277_s9 + $0x30] sm:$0xff] }
0x156c   :  { %4574 = vst.msk [vmem:[#allocation4 + $0x78] sm:$0xff] %vm253_vm2, %v4565_v10  ;;  %8245 = vmatmul.mubr.msk.f32.vlgmr.msra.gmra.mxu1 %vm253_vm2, %v4565_v10  ;;  %v8608_v10 = vld [vmem:[%s10333_s6 + $0x10] sm:$0xff]  ;;  %8258 = vmatprep.subr.mxu1 %v7539_v30 }
0x156d   :  { %4573 = vst.msk [vmem:[#allocation4 + $0x70] sm:$0xff] %vm253_vm2, %v4563_v33  ;;  %8240 = vmatmul.mubr.msk.f32.vlgmr.msra.gmra.mxu0 %vm253_vm2, %v4563_v33  ;;  %8259 = vmatpush3.msra.mxu1 %v7539_v30  ;;  %v7537_v33 = vld [vmem:[%s10277_s9 + $0x28] sm:$0xff] }
0x156e   :  { %8248 = vmatpush3.msra.mxu0 %v7527_v47  ;;  %8260 = vmatprep.subr.mxu1 %v7538_v31 }
0x156f   :  { %8249 = vmatprep.subr.mxu0 %v7526_v41  ;;  %8261 = vmatpush3.msra.mxu1 %v7538_v31 }
0x1570   :  { %8250 = vmatpush3.msra.mxu0 %v7526_v41  ;;  %8262 = vmatprep.subr.mxu1 %v7537_v33 }
0x1571   :  { %8251 = vmatprep.subr.mxu0 %v7525_v38  ;;  %8263 = vmatpush3.msra.mxu1 %v7537_v33 }
0x1572   :  { %8252 = vmatpush3.msra.mxu0 %v7525_v38 }
0x1573   :  { %8253 = vmatprep.subr.mxu0 %v7524_v48 }
0x1574   :  { %8254 = vmatpush3.msra.mxu0 %v7524_v48 }
0x1575   :  { %8269 = vmatprep.subr.mxu0 %v7547_v2 }
0x15c8   :  { %v4647_v20 = vpop.f32.mrf.mxu0 }
0x15ca   :  { %v8211_v0 = vpop.f32.mrf.mxu0 }
0x15cb   :  { %v7536_v0 = vld [vmem:[%s10277_s9 + $0x20] sm:$0xff] }
0x15cc   :  { %8264 = vmatprep.subr.mxu1 %v7536_v0 }
0x15cd   :  { %8265 = vmatpush3.msra.mxu1 %v7536_v0 }
0x15ce   :  { %8283 = vmatprep.subr.mxu1 %v8674_v34 }
0x1620   :  { %v4723_v40 = vpop.f32.mrf.mxu1 }
0x1621   :  { %v4799_v37 = vpop.f32.mrf.mxu0  ;;  %5185 = vrot.lane.b32.xlu0 %v4723_v40, %s10337_s4 }
0x1622   :  { %v8216_v13 = vpop.f32.mrf.mxu1 }
0x1623   :  { %v8221_v15 = vpop.f32.mrf.mxu0 }
0x1624   :  { %v4875_v49 = vpop.f32.mrf.mxu1  ;;  %v7534_v15 = vld [vmem:[%s10329_s30 + $0x8] ss:$0 sm:$0xff] }
0x1625   :  { %5193 = vrot.lane.b32.xlu0 %v4799_v37, %s10338_s1 }
0x1626   :  { %v8226_v45 = vpop.f32.mrf.mxu1 }
0x1627   :  { %v7535_v45 = vld [vmem:[%s10329_s30 + $0x9] ss:$0 sm:$0xff] }
0x1628   :  { %v5027_v46 = vpop.f32.mrf.mxu1 }
0x1629   :  { %v4951_v25 = vpop.f32.mrf.mxu0  ;;  %5187 = vrot.lane.b32.xlu1 %v5027_v46, %s10337_s4  ;;  %5201 = vrot.lane.b32.xlu0 %v4875_v49, %s10339_s7 }
0x162a   :  { %v8236_v35 = vpop.f32.mrf.mxu1 }
0x162b   :  { %v8231_v22 = vpop.f32.mrf.mxu0 }
0x162c   :  { %v5179_v27 = vpop.f32.mrf.mxu1 }
0x162d   :  { %v5103_v42 = vpop.f32.mrf.mxu0 }
0x162e   :  { %5195 = vrot.lane.b32.xlu1 %v5103_v42, %s10338_s1  ;;  %v8246_v51 = vpop.f32.mrf.mxu1 }
0x162f   :  { %v8241_v24 = vpop.f32.mrf.mxu0  ;;  %v7549_v51 = vld [vmem:[%s10280_s12 + $0x1] ss:$0 sm:$0xff] }
0x1632   :  { %5203 = vrot.lane.b32.xlu1 %v5179_v27, %s10339_s7 }
0x1693   :  { %v5186_v39 = vpop.permute.xlu0 %5185 }
0x1694   :  { %v5207_v52 = vsel %vm253_vm2, %v4647_v20, %v5186_v39  ;;  %v8609_v20 = vld [vmem:[%s10333_s6 + $0x18] sm:$0xff] }
0x1697   :  { %v5194_v43 = vpop.permute.xlu0 %5193 }
0x1698   :  { %v5209_v29 = vsel %vm1606_vm5, %v5207_v52, %v5194_v43 }
0x169b   :  { %v5188_v28 = vpop.permute.xlu1 %5187  ;;  %v5202_v44 = vpop.permute.xlu0 %5201 }
0x169c   :  { %v5211_v53 = vsel %vm1609_vm6, %v5209_v29, %v5202_v44  ;;  %v5208_v54 = vsel %vm253_vm2, %v4951_v25, %v5188_v28 }
0x169d   :  { %8255 = vmatprep.mubr.msk.f32.mxu0 %vm105_vm0, %v5211_v53 }
0x16a0   :  { %v5196_v1 = vpop.permute.xlu1 %5195 }
0x16a1   :  { %v5210_v32 = vsel %vm1606_vm5, %v5208_v54, %v5196_v1  ;;  %v7541_v54 = vld [vmem:[%s10278_s10 + $0x1] ss:$0 sm:$0xff] }
0x16a4   :  { %v5204_v55 = vpop.permute.xlu1 %5203 }
0x16a5   :  { %v5212_v36 = vsel %vm1609_vm6, %v5210_v32, %v5204_v55 }
0x16a6   :  { %8256 = vmatmul.mubr.msk.f32.vlgmr.msra.gmra.mxu0 %vm105_vm0, %v5212_v36 }
0x16a7   :  { %8277 = vmatprep.mubr.msk.f32.mxu0 %vm105_vm0, %v8606_v57  ;;  %8270 = vmatpush3.msra.mxu0 %v7547_v2 }
0x16a8   :  { %8271 = vmatprep.subr.mxu0 %v7546_v8 }
0x16a9   :  { %8272 = vmatpush3.msra.mxu0 %v7546_v8 }
0x16aa   :  { %8273 = vmatprep.subr.mxu0 %v7545_v21 }
0x16ab   :  { %8274 = vmatpush3.msra.mxu0 %v7545_v21 }
0x16ac   :  { %8275 = vmatprep.subr.mxu0 %v7544_v26 }
0x16ad   :  { %8276 = vmatpush3.msra.mxu0 %v7544_v26 }
0x16ae   :  { %8278 = vmatmul.mubr.msk.f32.vlgmr.msra.gmra.mxu0 %vm105_vm0, %v8607_v18  ;;  %8290 = vmatprep.subr.mxu0 %v8674_v34 }
0x16af   :  { %8280 = vmatprep.mubr.msk.f32.mxu0 %vm105_vm0, %v8608_v10 }
0x16b2   :  { %8281 = vmatmul.mubr.msk.f32.gmra.mxu0 %vm105_vm0, %v8609_v20 }
0x16b3   :  { %8294 = vmatprep.mubr.msk.f32.mxu0 %vm8675_vm1, %v8674_v34 }
0x1766   :  { %v8257_v58 = vpop.f32.mrf.mxu0 }
0x1767   :  { %v5300_v59 = vadd.f32 %v8257_v58, %v9542_v14 }
0x1768   :  { %v5290_v19 = vpop.f32.mrf.mxu0 }
0x1769   :  { %v9801_v60 = vadd.f32 %v7531_v23, %v5300_v59  ;;  %v5299_v61 = vadd.f32 %v5290_v19, %v9545_v11 }
0x176b   :  { %v9804_v62 = vadd.f32 %v7531_v23, %v5299_v61  ;;  %v5317_v63 = vsel %vm105_vm0, %v9801_v60, 0.0 }
0x176c   :  { %5318 = vadd.xlane.f32.xlu1 %v5317_v63 }
0x176d   :  { %v5314_v56 = vsel %vm105_vm0, %v9804_v62, 0.0 }
0x176e   :  { %5315 = vadd.xlane.f32.xlu0 %v5314_v56  ;;  %v8279_v24 = vpop.f32.mrf.mxu0 }
0x176f   :  { %v9867_v39 = vadd.f32 %v8279_v24, %v7549_v51 }
0x1770   :  { %v5525_v43 = vpop.f32.mrf.mxu0 }
0x1771   :  { %v9869_v52 = vadd.f32 %v7549_v51, %v5525_v43 }
0x1772   :  { %v8282_v44 = vpop.f32.mrf.mxu0 }
0x1773   :  { %v9904_v57 = vadd.f32 %v8282_v44, %v7549_v51 }
0x1774   :  { %v5535_v1 = vpop.f32.mrf.mxu0 }
0x1775   :  { %v9908_v58 = vadd.f32 %v7549_v51, %v5535_v1 }
0x177d   :  { %5562 = vrot.lane.b32.xlu1 %v9869_v52, %s10340_s0 }
0x1781   :  { %5572 = vrot.lane.b32.xlu1 %v9867_v39, %s10334_s25 }
0x1785   :  { %5570 = vrot.lane.b32.xlu1 %v9869_v52, %s10334_s25 }
0x17f5   :  { %v5319_v14 = vpop.xlane.xlu1 %5318 }
0x17f6   :  { %v5321_v3 = vmul.f32 0.03125, %v5319_v14 }
0x17f7   :  { %v5316_v4 = vpop.xlane.xlu0 %5315 }
0x17f8   :  { %v5320_v11 = vmul.f32 0.03125, %v5316_v4  ;;  %v5323_v5 = vsub.f32 %v9801_v60, %v5321_v3 }
0x17f9   :  { %v9894_v28 = vpop.permute.xlu1 %5562 }
0x17fa   :  { %v5322_v16 = vsub.f32 %v9804_v62, %v5320_v11  ;;  %v5325_v17 = vmul.f32 %v5323_v5, %v5323_v5 }
0x17fc   :  { %v5324_v6 = vmul.f32 %v5322_v16, %v5322_v16  ;;  %v5329_v12 = vsel %vm105_vm0, %v5325_v17, 0.0 }
0x17fd   :  { %v9902_v55 = vpop.permute.xlu1 %5572 }
0x17fe   :  { %v5326_v7 = vsel %vm105_vm0, %v5324_v6, 0.0 }
0x17ff   :  { %5327 = vadd.xlane.f32.xlu0 %v5326_v7 }
0x1801   :  { %v9915_v23 = vpop.permute.xlu1 %5570 }
0x1803   :  { %5330 = vadd.xlane.f32.xlu0 %v5329_v12 }
0x1819   :  { %5564 = vrot.lane.b32.xlu0 %v9867_v39, %s10340_s0 }
0x181d   :  { %5580 = vrot.lane.b32.xlu0 %v9867_v39, %s10341_s19 }
0x1821   :  { %5578 = vrot.lane.b32.xlu0 %v9869_v52, %s10341_s19 }
0x1888   :  { %v5328_v47 = vpop.xlane.xlu0 %5327 }
0x1889   :  { %v5332_v41 = vmul.f32 0.03125, %v5328_v47 }
0x188b   :  { %v5334_v40 = vadd.f32 1e-06, %v5332_v41 }
0x188c   :  { %v5331_v37 = vpop.xlane.xlu0 %5330 }
0x188d   :  { %8562 = vrsqrt.f32 %v5334_v40  ;;  %v5333_v38 = vmul.f32 0.03125, %v5331_v37 }
0x188f   :  { %v5335_v48 = vadd.f32 1e-06, %v5333_v38 }
0x1890   :  { %v9889_v29 = vpop.permute.xlu0 %5564 }
0x1891   :  { %8564 = vrsqrt.f32 %v5335_v48  ;;  %8291 = vmatpush3.xpose.msk.msra.mxu0 %vm253_vm2, %v9889_v29 }
0x1892   :  { %8292 = vmatprep.subr.mxu0 %v8674_v34 }
0x1894   :  { %v9937_v19 = vpop.permute.xlu0 %5580 }
0x1895   :  { %8293 = vmatpush3.xpose.msk.msra.mxu0 %vm253_vm2, %v9894_v28 }
0x1896   :  { %8304 = vmatprep.subr.mxu0 %v8674_v34 }
0x1898   :  { %v9939_v61 = vpop.permute.xlu0 %5578 }
0x189a   :  { %v8563_v13 = vpop.eup %8562 }
0x189b   :  { %v5338_v49 = vmul.f32 %v8563_v13, %v5322_v16 }
0x189d   :  { %v5344_v46 = vmul.f32 %v7534_v15, %v5338_v49 }
0x189e   :  { %v8565_v25 = vpop.eup %8564 }
0x189f   :  { %v5339_v35 = vmul.f32 %v8565_v25, %v5323_v5  ;;  %v5350_v22 = vadd.f32 %v7535_v45, %v5344_v46 }
0x18a1   :  { %v5345_v27 = vmul.f32 %v7534_v15, %v5339_v35  ;;  %8266 = vmatprep.mubr.msk.f32.mxu1 %vm105_vm0, %v5350_v22 }
0x18a3   :  { %v5351_v42 = vadd.f32 %v7535_v45, %v5345_v27 }
0x18a5   :  { %8267 = vmatmul.mubr.msk.f32.vlgmr.msra.gmra.mxu1 %vm105_vm0, %v5351_v42 }
0x18a6   :  { %8287 = vmatprep.mubr.msk.f32.mxu1 %vm8675_vm1, %v8674_v34  ;;  %8284 = vmatpush3.xpose.msk.msra.mxu1 %vm253_vm2, %v9867_v39 }
0x18a7   :  { %8285 = vmatprep.subr.mxu1 %v8674_v34 }
0x18aa   :  { %8286 = vmatpush3.xpose.msk.msra.mxu1 %vm253_vm2, %v9869_v52 }
0x18ab   :  { %8297 = vmatprep.subr.mxu1 %v8674_v34 }
0x1965   :  { %v8268_v53 = vpop.f32.mrf.mxu1 }
0x1966   :  { %v5443_v59 = vadd.f32 %v8268_v53, %v7541_v54 }
0x1967   :  { %v5437_v32 = vpop.f32.mrf.mxu1 }
0x1968   :  { %v5438_v36 = vadd.f32 %v7541_v54, %v5437_v32 }
0x196a   :  { %5554 = vrot.lane.b32.xlu0 %v5438_v36, %s10341_s19  ;;  %5546 = vrot.lane.b32.xlu1 %v5438_v36, %s10340_s0 }
0x196b   :  { %8288 = vmatmul.mubr.msk.f32.vlgmr.msra.gmra.mxu1 %vm253_vm2, %v5438_v36 }
0x196c   :  { %8298 = vmatpush3.xpose.msk.msra.mxu1 %vm253_vm2, %v9902_v55  ;;  %8301 = vmatprep.mubr.msk.f32.mxu1 %vm8675_vm1, %v8674_v34 }
0x196d   :  { %8299 = vmatprep.subr.mxu1 %v8674_v34 }
0x196e   :  { %5566 = vrot.lane.b32.xlu0 %v9908_v58, %s10340_s0  ;;  %5568 = vrot.lane.b32.xlu1 %v9904_v57, %s10340_s0 }
0x1970   :  { %8300 = vmatpush3.xpose.msk.msra.mxu1 %vm253_vm2, %v9915_v23 }
0x1971   :  { %8311 = vmatprep.subr.mxu1 %v8674_v34 }
0x1972   :  { %5548 = vrot.lane.b32.xlu0 %v5443_v59, %s10340_s0  ;;  %5550 = vrot.lane.b32.xlu1 %v5438_v36, %s10334_s25 }
0x1976   :  { %5574 = vrot.lane.b32.xlu0 %v9908_v58, %s10334_s25  ;;  %5576 = vrot.lane.b32.xlu1 %v9904_v57, %s10334_s25 }
0x197a   :  { %5552 = vrot.lane.b32.xlu0 %v5443_v59, %s10334_s25  ;;  %5584 = vrot.lane.b32.xlu1 %v9904_v57, %s10341_s19 }
0x197e   :  { %5582 = vrot.lane.b32.xlu1 %v9908_v58, %s10341_s19 }
0x1982   :  { %5556 = vrot.lane.b32.xlu1 %v5443_v59, %s10341_s19 }
0x19dc   :  { %v5547_v63 = vpop.permute.xlu1 %5546  ;;  %v5555_v56 = vpop.permute.xlu0 %5554 }
0x19dd   :  { %8295 = vmatmul.mubr.msk.f32.vlgmr.msra.gmra.mxu0 %vm253_vm2, %v5547_v63 }
0x19de   :  { %8305 = vmatpush3.xpose.msk.msra.mxu0 %vm253_vm2, %v9937_v19  ;;  %8308 = vmatprep.mubr.msk.f32.mxu0 %vm8675_vm1, %v8674_v34 }
0x19df   :  { %8306 = vmatprep.subr.mxu0 %v8674_v34 }
0x19e0   :  { %v9947_v2 = vpop.permute.xlu1 %5568  ;;  %v9949_v14 = vpop.permute.xlu0 %5566 }
0x19e2   :  { %8307 = vmatpush3.xpose.msk.msra.mxu0 %vm253_vm2, %v9939_v61 }
0x19e3   :  { %8318 = vmatprep.subr.mxu0 %v8674_v34 }
0x19e4   :  { %v5551_v3 = vpop.permute.xlu1 %5550  ;;  %v5549_v4 = vpop.permute.xlu0 %5548 }
0x19e5   :  { %8309 = vmatmul.mubr.msk.f32.vlgmr.msra.gmra.mxu0 %vm253_vm2, %v5555_v56  ;;  %8302 = vmatmul.mubr.msk.f32.vlgmr.msra.gmra.mxu1 %vm253_vm2, %v5551_v3 }
0x19e6   :  { %8312 = vmatpush3.xpose.msk.msra.mxu1 %vm253_vm2, %v9904_v57  ;;  %8319 = vmatpush3.xpose.msk.msra.mxu0 %vm253_vm2, %v9947_v2 }
0x19e7   :  { %8313 = vmatprep.subr.mxu1 %v8674_v34  ;;  %8320 = vmatprep.subr.mxu0 %v8674_v34 }
0x19e8   :  { %v9962_v11 = vpop.permute.xlu1 %5576  ;;  %8315 = vmatprep.mubr.msk.f32.mxu1 %vm8675_vm1, %v8674_v34  ;;  %8322 = vmatprep.mubr.msk.f32.mxu0 %vm8675_vm1, %v8674_v34  ;;  %v9978_v16 = vpop.permute.xlu0 %5574 }
0x19ea   :  { %8314 = vmatpush3.xpose.msk.msra.mxu1 %vm253_vm2, %v9908_v58  ;;  %8321 = vmatpush3.xpose.msk.msra.mxu0 %vm253_vm2, %v9949_v14 }
0x19eb   :  { %8325 = vmatprep.subr.mxu1 %v8674_v34  ;;  %8332 = vmatprep.subr.mxu0 %v8674_v34 }
0x19ec   :  { %v9974_v5 = vpop.permute.xlu1 %5584  ;;  %v5553_v7 = vpop.permute.xlu0 %5552 }
0x19ed   :  { %8316 = vmatmul.mubr.msk.f32.vlgmr.msra.gmra.mxu1 %vm253_vm2, %v5443_v59  ;;  %8323 = vmatmul.mubr.msk.f32.vlgmr.msra.gmra.mxu0 %vm253_vm2, %v5549_v4 }
0x19ee   :  { %8326 = vmatpush3.xpose.msk.msra.mxu1 %vm253_vm2, %v9962_v11  ;;  %8333 = vmatpush3.xpose.msk.msra.mxu0 %vm253_vm2, %v9974_v5 }
0x19ef   :  { %8327 = vmatprep.subr.mxu1 %v8674_v34  ;;  %8334 = vmatprep.subr.mxu0 %v8674_v34 }
0x19f0   :  { %v9986_v6 = vpop.permute.xlu1 %5582  ;;  %8329 = vmatprep.mubr.msk.f32.mxu1 %vm8675_vm1, %v8674_v34  ;;  %8336 = vmatprep.mubr.msk.f32.mxu0 %vm8675_vm1, %v8674_v34 }
0x19f2   :  { %8328 = vmatpush3.xpose.msk.msra.mxu1 %vm253_vm2, %v9978_v16  ;;  %8335 = vmatpush3.xpose.msk.msra.mxu0 %vm253_vm2, %v9986_v6 }
0x19f3   :  { %8339 = vmatprep.subr.mxu1 %v8674_v34  ;;  %8353 = vmatprep.subr.mxu0 %v8674_v34 }
0x19f4   :  { %v5557_v17 = vpop.permute.xlu1 %5556 }
0x19f5   :  { %8330 = vmatmul.mubr.msk.f32.vlgmr.msra.gmra.mxu1 %vm253_vm2, %v5553_v7  ;;  %8337 = vmatmul.mubr.msk.f32.vlgmr.msra.gmra.mxu0 %vm253_vm2, %v5557_v17 }
0x19f6   :  { %8343 = vmatprep.mubr.msk.f32.mxu1 %vm8675_vm1, %v8674_v34  ;;  %8357 = vmatprep.mubr.msk.f32.mxu0 %vm8675_vm1, %v8674_v34 }
0x1a2b   :  { %v5658_v12 = vpop.f32.mrf.mxu1 }
0x1a2c   :  { %v6194_v8 = vmul.f32 0.35355338, %v5658_v12 }
0x1a2d   :  { %v8289_v21 = vpop.f32.mrf.mxu1 }
0x1a2e   :  { %v6202_v26 = vadd.f32 %v6194_v8, %v9294_v50 }
0x1a30   :  { %v6210_v18 = vsel %vm1606_vm5, %v6202_v26, -inf }
0x1a31   :  { %6211 = vmax.xlane.f32.xlu0 %v6210_v18 }
0x1a9d   :  { %v5734_v30 = vpop.f32.mrf.mxu0 }
0x1a9e   :  { %v6195_v31 = vmul.f32 0.35355338, %v5734_v30 }
0x1a9f   :  { %v8296_v10 = vpop.f32.mrf.mxu0 }
0x1aa0   :  { %v6203_v33 = vadd.f32 %v6195_v31, %v9294_v50 }
0x1aa2   :  { %v6213_v20 = vsel %vm1606_vm5, %v6203_v33, -inf }
0x1aa3   :  { %6214 = vmax.xlane.f32.xlu1 %v6213_v20 }
0x1aa5   :  { %v5886_v0 = vpop.f32.mrf.mxu0  ;;  %v5810_v47 = vpop.f32.mrf.mxu1 }
0x1aa6   :  { %v6197_v41 = vmul.f32 0.35355338, %v5886_v0  ;;  %v6196_v40 = vmul.f32 0.35355338, %v5810_v47 }
0x1aa7   :  { %v8310_v37 = vpop.f32.mrf.mxu0  ;;  %v8303_v38 = vpop.f32.mrf.mxu1 }
0x1aa8   :  { %v6204_v48 = vadd.f32 %v6196_v40, %v9294_v50  ;;  %v6205_v13 = vadd.f32 %v6197_v41, %v9294_v50 }
0x1aaa   :  { %v6216_v15 = vsel %vm1606_vm5, %v6204_v48, -inf  ;;  %v6219_v35 = vsel %vm1606_vm5, %v6205_v13, -inf }
0x1aab   :  { %6217 = vmax.xlane.f32.xlu0 %v6216_v15 }
0x1aad   :  { %v5962_v49 = vpop.f32.mrf.mxu1  ;;  %v6038_v45 = vpop.f32.mrf.mxu0 }
0x1aae   :  { %v6198_v46 = vmul.f32 0.35355338, %v5962_v49  ;;  %v6199_v25 = vmul.f32 0.35355338, %v6038_v45 }
0x1aaf   :  { %v8317_v22 = vpop.f32.mrf.mxu1  ;;  %v8324_v27 = vpop.f32.mrf.mxu0  ;;  %6220 = vmax.xlane.f32.xlu0 %v6219_v35 }
0x1ab0   :  { %v6206_v42 = vadd.f32 %v6198_v46, %v9310_v9  ;;  %v6207_v51 = vadd.f32 %v6199_v25, %v9310_v9 }
0x1ab2   :  { %v6225_v24 = vsel %vm1606_vm5, %v6207_v51, -inf  ;;  %v6222_v50 = vsel %vm1606_vm5, %v6206_v42, -inf }
0x1ab3   :  { %6226 = vmax.xlane.f32.xlu1 %v6225_v24  ;;  %6223 = vmax.xlane.f32.xlu0 %v6222_v50 }
0x1ab5   :  { %v6114_v43 = vpop.f32.mrf.mxu1  ;;  %v6190_v44 = vpop.f32.mrf.mxu0 }
0x1ab6   :  { %v6200_v53 = vmul.f32 0.35355338, %v6114_v43 }
0x1ab7   :  { %v8331_v1 = vpop.f32.mrf.mxu1  ;;  %v8338_v54 = vpop.f32.mrf.mxu0 }
0x1ab8   :  { %v6208_v32 = vadd.f32 %v6200_v53, %v9310_v9 }
0x1aba   :  { %v6228_v36 = vsel %vm1606_vm5, %v6208_v32, -inf }
0x1abb   :  { %6229 = vmax.xlane.f32.xlu0 %v6228_v36 }
0x1ac4   :  { %6307 = vrot.lane.b32.xlu1 %v9869_v52, %s10336_s24  ;;  %v6201_v52 = vmul.f32 0.35355338, %v6190_v44 }
0x1ac8   :  { %6388 = vrot.lane.b32.xlu1 %v9889_v29, %s10336_s24  ;;  %v6212_v29 = vpop.xlane.xlu0 %6211 }
0x1acc   :  { %6386 = vrot.lane.b32.xlu1 %v9894_v28, %s10336_s24  ;;  %v10037_v28 = vadd.f32 %v6201_v52, %v9310_v9 }
0x1ad1   :  { %6309 = vrot.lane.b32.xlu0 %v9867_v39, %s10336_s24  ;;  %v6234_v39 = vsub.f32 %v6202_v26, %v6212_v29 }
0x1ad3   :  { %v6242_v59 = vmul.f32 1.442695, %v6234_v39 }
0x1ad5   :  { %6467 = vrot.lane.b32.xlu0 %v9902_v55, %s10336_s24  ;;  %v6231_v55 = vsel %vm1606_vm5, %v10037_v28, -inf  ;;  %8566 = vpow2.f32 %v6242_v59 }
0x1ad9   :  { %6465 = vrot.lane.b32.xlu0 %v9915_v23, %s10336_s24 }
0x1add   :  { %6625 = vrot.lane.b32.xlu0 %v9904_v57, %s10336_s24 }
0x1ae1   :  { %6623 = vrot.lane.b32.xlu0 %v9908_v58, %s10336_s24 }
0x1ae2   :  { %v10041_v23 = vpop.eup %8566 }
0x1ae3   :  { %v6258_v57 = vsel %vm1606_vm5, %v10041_v23, 0.0 }
0x1ae5   :  { %6783 = vrot.lane.b32.xlu0 %v9962_v11, %s10336_s24 }
0x1af0   :  { %6232 = vmax.xlane.f32.xlu1 %v6231_v55 }
0x1b01   :  { %6546 = vrot.lane.b32.xlu1 %v9937_v19, %s10336_s24 }
0x1b04   :  { %6259 = vadd.xlane.f32.xlu0 %v6258_v57 }
0x1b05   :  { %6544 = vrot.lane.b32.xlu1 %v9939_v61, %s10336_s24 }
0x1b09   :  { %6704 = vrot.lane.b32.xlu1 %v9947_v2, %s10336_s24 }
0x1b0d   :  { %6702 = vrot.lane.b32.xlu1 %v9949_v14, %s10336_s24 }
0x1b11   :  { %6862 = vrot.lane.b32.xlu1 %v9974_v5, %s10336_s24 }
0x1b2c   :  { %v6215_v9 = vpop.xlane.xlu1 %6214 }
0x1b2d   :  { %v6235_v58 = vsub.f32 %v6203_v33, %v6215_v9 }
0x1b2f   :  { %v6244_v63 = vmul.f32 1.442695, %v6235_v58 }
0x1b31   :  { %8568 = vpow2.f32 %v6244_v63 }
0x1b34   :  { %v6218_v19 = vpop.xlane.xlu0 %6217 }
0x1b35   :  { %v6236_v56 = vsub.f32 %v6204_v48, %v6218_v19 }
0x1b37   :  { %v6246_v3 = vmul.f32 1.442695, %v6236_v56 }
0x1b38   :  { %v6221_v4 = vpop.xlane.xlu0 %6220 }
0x1b39   :  { %8570 = vpow2.f32 %v6246_v3  ;;  %v6237_v11 = vsub.f32 %v6205_v13, %v6221_v4 }
0x1b3b   :  { %v6248_v61 = vmul.f32 1.442695, %v6237_v11 }
0x1b3c   :  { %v6227_v7 = vpop.xlane.xlu1 %6226  ;;  %v6224_v17 = vpop.xlane.xlu0 %6223 }
0x1b3d   :  { %8572 = vpow2.f32 %v6248_v61  ;;  %v6239_v2 = vsub.f32 %v6207_v51, %v6227_v7  ;;  %v6238_v12 = vsub.f32 %v6206_v42, %v6224_v17 }
0x1b3e   :  { %v10055_v14 = vpop.eup %8568 }
0x1b3f   :  { %v6252_v8 = vmul.f32 1.442695, %v6239_v2  ;;  %v6250_v5 = vmul.f32 1.442695, %v6238_v12  ;;  %v6261_v21 = vsel %vm1606_vm5, %v10055_v14, 0.0 }
0x1b40   :  { %6262 = vadd.xlane.f32.xlu1 %v6261_v21  ;;  %v6308_v0 = vpop.permute.xlu1 %6307 }
0x1b41   :  { %8574 = vpow2.f32 %v6252_v8 }
0x1b42   :  { %8576 = vpow2.f32 %v6250_v5 }
0x1b44   :  { %v6230_v26 = vpop.xlane.xlu0 %6229  ;;  %v6389_v45 = vpop.permute.xlu1 %6388 }
0x1b45   :  { %v6240_v18 = vsub.f32 %v6208_v32, %v6230_v26 }
0x1b46   :  { %v10059_v30 = vpop.eup %8570 }
0x1b47   :  { %v6254_v31 = vmul.f32 1.442695, %v6240_v18  ;;  %v6264_v10 = vsel %vm1606_vm5, %v10059_v30, 0.0 }
0x1b48   :  { %v6310_v33 = vpop.permute.xlu0 %6309  ;;  %6265 = vadd.xlane.f32.xlu0 %v6264_v10  ;;  %v6387_v46 = vpop.permute.xlu1 %6386  ;;  %v7588_v10 = vld [vmem:[%s10281_s13 + $0x30] sm:$0xff] }
0x1b49   :  { %8578 = vpow2.f32 %v6254_v31  ;;  %8340 = vmatpush3.msra.mxu1 %v6310_v33  ;;  %v7589_v31 = vld [vmem:[%s10281_s13 + $0x38] sm:$0xff] }
0x1b4a   :  { %v10063_v20 = vpop.eup %8572  ;;  %8341 = vmatprep.subr.mxu1 %v8674_v34 }
0x1b4b   :  { %8342 = vmatpush3.msra.mxu1 %v6308_v0  ;;  %v6267_v47 = vsel %vm1606_vm5, %v10063_v20, 0.0 }
0x1b4c   :  { %v6468_v41 = vpop.permute.xlu0 %6467  ;;  %6268 = vadd.xlane.f32.xlu1 %v6267_v47  ;;  %8346 = vmatprep.subr.mxu1 %v8674_v34  ;;  %v7586_v47 = vld [vmem:[%s10281_s13 + $0x20] sm:$0xff] }
0x1b4d   :  { %8354 = vmatpush3.msra.mxu0 %v6468_v41 }
0x1b4e   :  { %v10069_v40 = vpop.eup %8574  ;;  %8355 = vmatprep.subr.mxu0 %v8674_v34 }
0x1b4f   :  { %v10072_v37 = vpop.eup %8576  ;;  %v6273_v38 = vsel %vm1606_vm5, %v10069_v40, 0.0 }
0x1b50   :  { %v6466_v48 = vpop.permute.xlu0 %6465  ;;  %6274 = vadd.xlane.f32.xlu1 %v6273_v38  ;;  %v6270_v13 = vsel %vm1606_vm5, %v10072_v37, 0.0 }
0x1b51   :  { %6271 = vadd.xlane.f32.xlu0 %v6270_v13  ;;  %8356 = vmatpush3.msra.mxu0 %v6466_v48 }
0x1b52   :  { %8367 = vmatprep.subr.mxu0 %v8674_v34 }
0x1b54   :  { %v6626_v27 = vpop.permute.xlu0 %6625 }
0x1b56   :  { %v10079_v15 = vpop.eup %8578 }
0x1b57   :  { %v6276_v49 = vsel %vm1606_vm5, %v10079_v15, 0.0 }
0x1b58   :  { %6277 = vadd.xlane.f32.xlu0 %v6276_v49  ;;  %v6624_v42 = vpop.permute.xlu0 %6623 }
0x1b5c   :  { %v10086_v51 = vpop.permute.xlu0 %6783 }
0x1b6e   :  { %6781 = vrot.lane.b32.xlu0 %v9978_v16, %s10336_s24 }
0x1b79   :  { %v6233_v25 = vpop.xlane.xlu1 %6232 }
0x1b7a   :  { %v6241_v35 = vsub.f32 %v10037_v28, %v6233_v25 }
0x1b7c   :  { %v6256_v22 = vmul.f32 1.442695, %v6241_v35 }
0x1b7d   :  { %v6547_v53 = vpop.permute.xlu1 %6546 }
0x1b7e   :  { %8580 = vpow2.f32 %v6256_v22 }
0x1b81   :  { %v6545_v1 = vpop.permute.xlu1 %6544 }
0x1b85   :  { %v6705_v54 = vpop.permute.xlu1 %6704 }
0x1b89   :  { %v6703_v32 = vpop.permute.xlu1 %6702 }
0x1b8b   :  { %v10088_v24 = vpop.eup %8580 }
0x1b8c   :  { %v6279_v50 = vsel %vm1606_vm5, %v10088_v24, 0.0 }
0x1b8d   :  { %6280 = vadd.xlane.f32.xlu1 %v6279_v50  ;;  %v6260_v43 = vpop.xlane.xlu0 %6259  ;;  %v6863_v36 = vpop.permute.xlu1 %6862 }
0x1b8e   :  { %8582 = vrcp.f32 %v6260_v43 }
0x1b9b   :  { %v8583_v16 = vpop.eup %8582 }
0x1b9c   :  { %v6283_v44 = vmul.f32 %v8583_v16, %v10041_v23 }
0x1b9e   :  { %6860 = vrot.lane.b32.xlu1 %v9986_v6, %s10336_s24  ;;  %6299 = vst.msk [vmem:[#allocation6 + $0x20] sm:$0xff] %vm1606_vm5, %v6283_v44  ;;  %8344 = vmatmul.mubr.msk.f32.vlgmr.msra.gmra.mxu1 %vm1606_vm5, %v6283_v44  ;;  %v7593_v44 = vld [vmem:[%s10282_s14 + $0x1] ss:$0 sm:$0xff] }
0x1b9f   :  { %8347 = vmatpush3.msra.mxu1 %v6389_v45  ;;  %8350 = vmatprep.mubr.msk.f32.mxu1 %vm8675_vm1, %v8674_v34 }
0x1ba0   :  { %8348 = vmatprep.subr.mxu1 %v8674_v34 }
0x1ba1   :  { %8349 = vmatpush3.msra.mxu1 %v6387_v46 }
0x1ba2   :  { %8360 = vmatprep.subr.mxu1 %v8674_v34 }
0x1bc9   :  { %v6263_v52 = vpop.xlane.xlu1 %6262 }
0x1bca   :  { %8584 = vrcp.f32 %v6263_v52 }
0x1bd1   :  { %v6266_v6 = vpop.xlane.xlu0 %6265 }
0x1bd2   :  { %8586 = vrcp.f32 %v6266_v6 }
0x1bd5   :  { %v6269_v29 = vpop.xlane.xlu1 %6268 }
0x1bd6   :  { %8588 = vrcp.f32 %v6269_v29 }
0x1bd7   :  { %v8585_v28 = vpop.eup %8584 }
0x1bd8   :  { %v6285_v39 = vmul.f32 %v8585_v28, %v10055_v14 }
0x1bd9   :  { %v6275_v59 = vpop.xlane.xlu1 %6274 }
0x1bda   :  { %8590 = vrcp.f32 %v6275_v59  ;;  %v6272_v55 = vpop.xlane.xlu0 %6271  ;;  %6300 = vst.msk [vmem:[#allocation6 + $0x28] sm:$0xff] %vm1606_vm5, %v6285_v39  ;;  %8351 = vmatmul.mubr.msk.f32.vlgmr.msra.gmra.mxu1 %vm1606_vm5, %v6285_v39 }
0x1bdb   :  { %8592 = vrcp.f32 %v6272_v55  ;;  %8361 = vmatpush3.msra.mxu1 %v6547_v53  ;;  %8364 = vmatprep.mubr.msk.f32.mxu1 %vm8675_vm1, %v8674_v34 }
0x1bdc   :  { %8362 = vmatprep.subr.mxu1 %v8674_v34 }
0x1bdd   :  { %8363 = vmatpush3.msra.mxu1 %v6545_v1 }
0x1bde   :  { %8374 = vmatprep.subr.mxu1 %v8674_v34 }
0x1bdf   :  { %v8587_v23 = vpop.eup %8586 }
0x1be0   :  { %v6287_v57 = vmul.f32 %v8587_v23, %v10059_v30 }
0x1be1   :  { %v6278_v9 = vpop.xlane.xlu0 %6277 }
0x1be2   :  { %8594 = vrcp.f32 %v6278_v9  ;;  %6301 = vst.msk [vmem:[#allocation6 + $0x30] sm:$0xff] %vm1606_vm5, %v6287_v57  ;;  %8358 = vmatmul.mubr.msk.f32.vlgmr.msra.gmra.mxu0 %vm1606_vm5, %v6287_v57 }
0x1be3   :  { %v8589_v58 = vpop.eup %8588  ;;  %8368 = vmatpush3.msra.mxu0 %v6626_v27  ;;  %8371 = vmatprep.mubr.msk.f32.mxu0 %vm8675_vm1, %v8674_v34 }
0x1be4   :  { %8369 = vmatprep.subr.mxu0 %v8674_v34  ;;  %v6289_v63 = vmul.f32 %v8589_v58, %v10063_v20  ;;  %v7587_v20 = vld [vmem:[%s10281_s13 + $0x28] sm:$0xff]  ;;  %v7601_v58 = vld [vmem:[%s10283_s15 + $0x38] sm:$0xff] }
0x1be5   :  { %8370 = vmatpush3.msra.mxu0 %v6624_v42  ;;  %v6782_v11 = vpop.permute.xlu0 %6781 }
0x1be6   :  { %6302 = vst.msk [vmem:[#allocation6 + $0x38] sm:$0xff] %vm1606_vm5, %v6289_v63  ;;  %8365 = vmatmul.mubr.msk.f32.vlgmr.msra.gmra.mxu1 %vm1606_vm5, %v6289_v63  ;;  %8381 = vmatprep.subr.mxu0 %v8674_v34  ;;  %v7600_v63 = vld [vmem:[%s10283_s15 + $0x30] sm:$0xff] }
0x1be7   :  { %v8591_v19 = vpop.eup %8590  ;;  %8375 = vmatpush3.msra.mxu1 %v6705_v54  ;;  %8378 = vmatprep.mubr.msk.f32.mxu1 %vm8675_vm1, %v8674_v34 }
0x1be8   :  { %v8593_v56 = vpop.eup %8592  ;;  %8376 = vmatprep.subr.mxu1 %v8674_v34  ;;  %v6293_v3 = vmul.f32 %v8591_v19, %v10069_v40  ;;  %v7599_v19 = vld [vmem:[%s10283_s15 + $0x28] sm:$0xff] }
0x1be9   :  { %8377 = vmatpush3.msra.mxu1 %v6703_v32  ;;  %v6291_v4 = vmul.f32 %v8593_v56, %v10072_v37  ;;  %v7598_v56 = vld [vmem:[%s10283_s15 + $0x20] sm:$0xff] }
0x1bea   :  { %8388 = vmatprep.subr.mxu1 %v8674_v34  ;;  %6304 = vst.msk [vmem:[#allocation6 + $0x68] sm:$0xff] %vm1606_vm5, %v6293_v3  ;;  %8379 = vmatmul.mubr.msk.f32.vlgmr.msra.gmra.mxu1 %vm1606_vm5, %v6293_v3  ;;  %v7613_v3 = vld [vmem:[%s10285_s17 + $0x78] sm:$0xff] }
0x1beb   :  { %6303 = vst.msk [vmem:[#allocation6 + $0x60] sm:$0xff] %vm1606_vm5, %v6291_v4  ;;  %8372 = vmatmul.mubr.msk.f32.vlgmr.msra.gmra.mxu0 %vm1606_vm5, %v6291_v4  ;;  %8389 = vmatpush3.msra.mxu1 %v6863_v36  ;;  %v7612_v4 = vld [vmem:[%s10285_s17 + $0x70] sm:$0xff] }
0x1bec   :  { %8382 = vmatpush3.msra.mxu0 %v10086_v51  ;;  %8385 = vmatprep.mubr.msk.f32.mxu0 %vm8675_vm1, %v8674_v34 }
0x1bed   :  { %8383 = vmatprep.subr.mxu0 %v8674_v34  ;;  %8390 = vmatprep.subr.mxu1 %v8674_v34 }
0x1bee   :  { %8384 = vmatpush3.msra.mxu0 %v6782_v11  ;;  %8392 = vmatprep.mubr.msk.f32.mxu1 %vm8675_vm1, %v8674_v34  ;;  %v7611_v11 = vld [vmem:[%s10285_s17 + $0x68] sm:$0xff] }
0x1bef   :  { %v8595_v61 = vpop.eup %8594  ;;  %8395 = vmatprep.subr.mxu0 %v7589_v31 }
0x1bf0   :  { %v6295_v7 = vmul.f32 %v8595_v61, %v10079_v15  ;;  %v7610_v61 = vld [vmem:[%s10285_s17 + $0x60] sm:$0xff] }
0x1bf2   :  { %6305 = vst.msk [vmem:[#allocation6 + $0x70] sm:$0xff] %vm1606_vm5, %v6295_v7  ;;  %8386 = vmatmul.mubr.msk.f32.vlgmr.msra.gmra.mxu0 %vm1606_vm5, %v6295_v7 }
0x1bf3   :  { %8396 = vmatpush3.msra.mxu0 %v7589_v31 }
0x1bf4   :  { %8397 = vmatprep.subr.mxu0 %v7588_v10 }
0x1bf5   :  { %8398 = vmatpush3.msra.mxu0 %v7588_v10 }
0x1bf6   :  { %8399 = vmatprep.subr.mxu0 %v7587_v20 }
0x1bf7   :  { %8400 = vmatpush3.msra.mxu0 %v7587_v20 }
0x1bf8   :  { %8401 = vmatprep.subr.mxu0 %v7586_v47 }
0x1bf9   :  { %8402 = vmatpush3.msra.mxu0 %v7586_v47  ;;  %v7608_v47 = vld [vmem:[%s10285_s17 + $0x50] sm:$0xff] }
0x1bfa   :  { %8417 = vmatprep.subr.mxu0 %v7613_v3 }
0x1c16   :  { %v6281_v17 = vpop.xlane.xlu1 %6280 }
0x1c17   :  { %8596 = vrcp.f32 %v6281_v17 }
0x1c1a   :  { %v6861_v2 = vpop.permute.xlu1 %6860 }
0x1c1b   :  { %8391 = vmatpush3.msra.mxu1 %v6861_v2 }
0x1c1c   :  { %8406 = vmatprep.subr.mxu1 %v7601_v58 }
0x1c24   :  { %v8597_v12 = vpop.eup %8596 }
0x1c25   :  { %v6297_v14 = vmul.f32 %v8597_v12, %v10088_v24 }
0x1c27   :  { %6306 = vst.msk [vmem:[#allocation6 + $0x78] sm:$0xff] %vm1606_vm5, %v6297_v14  ;;  %8393 = vmatmul.mubr.msk.f32.vlgmr.msra.gmra.mxu1 %vm1606_vm5, %v6297_v14 }
0x1c28   :  { %8407 = vmatpush3.msra.mxu1 %v7601_v58 }
0x1c29   :  { %8408 = vmatprep.subr.mxu1 %v7600_v63 }
0x1c2a   :  { %8409 = vmatpush3.msra.mxu1 %v7600_v63 }
0x1c2b   :  { %8410 = vmatprep.subr.mxu1 %v7599_v19 }
0x1c2c   :  { %8411 = vmatpush3.msra.mxu1 %v7599_v19 }
0x1c2d   :  { %8412 = vmatprep.subr.mxu1 %v7598_v56 }
0x1c2e   :  { %8413 = vmatpush3.msra.mxu1 %v7598_v56 }
0x1c5e   :  { %v6382_v8 = vpop.f32.mrf.mxu1 }
0x1c60   :  { %v8345_v34 = vpop.f32.mrf.mxu1 }
0x1c9a   :  { %v6461_v5 = vpop.f32.mrf.mxu1 }
0x1c9b   :  { %6941 = vrot.lane.b32.xlu0 %v6461_v5, %s10337_s4  ;;  %v7596_v5 = vld [vmem:[%s10329_s30 + $0xa] ss:$0 sm:$0xff] }
0x1c9c   :  { %v8352_v21 = vpop.f32.mrf.mxu1 }
0x1ca2   :  { %v6540_v26 = vpop.f32.mrf.mxu0 }
0x1ca3   :  { %6949 = vrot.lane.b32.xlu0 %v6540_v26, %s10338_s1  ;;  %v7597_v26 = vld [vmem:[%s10329_s30 + $0xb] ss:$0 sm:$0xff] }
0x1ca4   :  { %v8359_v18 = vpop.f32.mrf.mxu0 }
0x1ca6   :  { %v6619_v30 = vpop.f32.mrf.mxu1 }
0x1ca7   :  { %6957 = vrot.lane.b32.xlu0 %v6619_v30, %s10339_s7 }
0x1ca8   :  { %v8366_v33 = vpop.f32.mrf.mxu1 }
0x1caa   :  { %v6777_v0 = vpop.f32.mrf.mxu1 }
0x1cab   :  { %v6698_v41 = vpop.f32.mrf.mxu0  ;;  %6943 = vrot.lane.b32.xlu1 %v6777_v0, %s10337_s4  ;;  %v7609_v0 = vld [vmem:[%s10285_s17 + $0x58] sm:$0xff] }
0x1cac   :  { %v8380_v40 = vpop.f32.mrf.mxu1 }
0x1cad   :  { %v8373_v37 = vpop.f32.mrf.mxu0  ;;  %v7606_v40 = vld [vmem:[%s10285_s17 + $0x40] sm:$0xff] }
0x1cae   :  { %v7603_v37 = vld [vmem:[%s10284_s16 + $0x1] ss:$0 sm:$0xff]  ;;  %s8684_s16 = smov [#allocation4]  }
0x1cb2   :  { %v6856_v38 = vpop.f32.mrf.mxu0 }
0x1cb3   :  { %6951 = vrot.lane.b32.xlu1 %v6856_v38, %s10338_s1 }
0x1cb4   :  { %v8387_v48 = vpop.f32.mrf.mxu0 }
0x1ce7   :  { %v6935_v13 = vpop.f32.mrf.mxu1 }
0x1ce8   :  { %6959 = vrot.lane.b32.xlu1 %v6935_v13, %s10339_s7 }
0x1ce9   :  { %v8394_v15 = vpop.f32.mrf.mxu1 }
0x1d0d   :  { %v6942_v49 = vpop.permute.xlu0 %6941 }
0x1d0e   :  { %v6963_v46 = vsel %vm253_vm2, %v6382_v8, %v6942_v49 }
0x1d15   :  { %v6950_v45 = vpop.permute.xlu0 %6949 }
0x1d16   :  { %v6965_v25 = vsel %vm1606_vm5, %v6963_v46, %v6950_v45 }
0x1d19   :  { %v6958_v35 = vpop.permute.xlu0 %6957 }
0x1d1a   :  { %v6967_v22 = vsel %vm1609_vm6, %v6965_v25, %v6958_v35  ;;  %v7617_v25 = vld [vmem:[%s10286_s18 + $0x1] ss:$0 sm:$0xff]  ;;  %s7369_s18 = sshll.u32 %s8684_s16, 4  ;;  %s7370_s18 = int_to_ptr.vmem [resolvable:$true] %s7369_s18 }
0x1d1b   :  { %8403 = vmatprep.mubr.msk.f32.mxu0 %vm105_vm0, %v6967_v22  ;;  %s8610_s5 = scalar_lea.vmem %s7370_s18, 2048  ;;  %p8615_p1 = scmp.lt.s32.totalorder %s7370_s18, %s7370_s18 }
0x1d1c   :  { %p8611_p0 = scmp.ne.s32.totalorder %s7370_s18, %s8610_s5  ;;  %p8616_p2 = scmp.lt.s32.totalorder %s8610_s5, %s8610_s5 }
0x1d1d   :  { %v6944_v27 = vpop.permute.xlu1 %6943 }
0x1d1e   :  { %v6964_v51 = vsel %vm253_vm2, %v6698_v41, %v6944_v27  ;;  %v7607_v41 = vld [vmem:[%s10285_s17 + $0x48] sm:$0xff]  ;;  %p8617_p3 = por %p8616_p2, %p8615_p1 }
0x1d20   :  { %p8618_p4 = pnand %p8617_p3, %p8611_p0 }
0x1d25   :  { %v6952_v42 = vpop.permute.xlu1 %6951 }
0x1d26   :  { %v6966_v24 = vsel %vm1606_vm5, %v6964_v51, %v6952_v42 }
0x1d5a   :  { %v6960_v50 = vpop.permute.xlu1 %6959 }
0x1d5b   :  { %v6968_v43 = vsel %vm1609_vm6, %v6966_v24, %v6960_v50 }
0x1d5c   :  { %8404 = vmatmul.mubr.msk.f32.vlgmr.msra.gmra.mxu0 %vm105_vm0, %v6968_v43 }
0x1d5d   :  { %8418 = vmatpush3.msra.mxu0 %v7613_v3 }
0x1d5e   :  { %8419 = vmatprep.subr.mxu0 %v7612_v4 }
0x1d5f   :  { %8420 = vmatpush3.msra.mxu0 %v7612_v4 }
0x1d60   :  { %8421 = vmatprep.subr.mxu0 %v7611_v11 }
0x1d61   :  { %8422 = vmatpush3.msra.mxu0 %v7611_v11 }
0x1d62   :  { %8423 = vmatprep.subr.mxu0 %v7610_v61 }
0x1d63   :  { %8424 = vmatpush3.msra.mxu0 %v7610_v61 }
0x1d64   :  { %8425 = vmatprep.subr.mxu0 %v7609_v0 }
0x1d65   :  { %8426 = vmatpush3.msra.mxu0 %v7609_v0 }
0x1d66   :  { %8427 = vmatprep.subr.mxu0 %v7608_v47 }
0x1d67   :  { %8428 = vmatpush3.msra.mxu0 %v7608_v47 }
0x1d68   :  { %8429 = vmatprep.subr.mxu0 %v7607_v41 }
0x1d69   :  { %8430 = vmatpush3.msra.mxu0 %v7607_v41 }
0x1d6a   :  { %8431 = vmatprep.subr.mxu0 %v7606_v40 }
0x1d6b   :  { %8432 = vmatpush3.msra.mxu0 %v7606_v40 }
0x1e1c   :  { %v8405_v16 = vpop.f32.mrf.mxu0 }
0x1e1d   :  { %v7056_v53 = vadd.f32 %v8405_v16, %v9801_v60 }
0x1e1e   :  { %v7046_v1 = vpop.f32.mrf.mxu0 }
0x1e1f   :  { %v10171_v54 = vadd.f32 %v7593_v44, %v7056_v53  ;;  %v7055_v32 = vadd.f32 %v7046_v1, %v9804_v62 }
0x1e21   :  { %v10174_v36 = vadd.f32 %v7593_v44, %v7055_v32  ;;  %v7073_v52 = vsel %vm105_vm0, %v10171_v54, 0.0 }
0x1e22   :  { %7074 = vadd.xlane.f32.xlu1 %v7073_v52 }
0x1e23   :  { %v7070_v6 = vsel %vm105_vm0, %v10174_v36, 0.0 }
0x1e24   :  { %7071 = vadd.xlane.f32.xlu0 %v7070_v6 }
0x1eab   :  { %v7075_v29 = vpop.xlane.xlu1 %7074 }
0x1eac   :  { %v7077_v28 = vmul.f32 0.03125, %v7075_v29 }
0x1ead   :  { %v7072_v39 = vpop.xlane.xlu0 %7071 }
0x1eae   :  { %v7076_v59 = vmul.f32 0.03125, %v7072_v39  ;;  %v7079_v60 = vsub.f32 %v10171_v54, %v7077_v28 }
0x1eb0   :  { %v7078_v55 = vsub.f32 %v10174_v36, %v7076_v59  ;;  %v7081_v57 = vmul.f32 %v7079_v60, %v7079_v60 }
0x1eb2   :  { %v7080_v23 = vmul.f32 %v7078_v55, %v7078_v55  ;;  %v7085_v9 = vsel %vm105_vm0, %v7081_v57, 0.0 }
0x1eb4   :  { %v7082_v62 = vsel %vm105_vm0, %v7080_v23, 0.0 }
0x1eb5   :  { %7083 = vadd.xlane.f32.xlu0 %v7082_v62 }
0x1eb9   :  { %7086 = vadd.xlane.f32.xlu0 %v7085_v9 }
0x1f3e   :  { %v7084_v7 = vpop.xlane.xlu0 %7083 }
0x1f3f   :  { %v7088_v17 = vmul.f32 0.03125, %v7084_v7 }
0x1f41   :  { %v7090_v2 = vadd.f32 1e-06, %v7088_v17 }
0x1f42   :  { %v7087_v12 = vpop.xlane.xlu0 %7086 }
0x1f43   :  { %8598 = vrsqrt.f32 %v7090_v2  ;;  %v7089_v14 = vmul.f32 0.03125, %v7087_v12 }
0x1f45   :  { %v7091_v8 = vadd.f32 1e-06, %v7089_v14 }
0x1f47   :  { %8600 = vrsqrt.f32 %v7091_v8 }
0x1f50   :  { %v8599_v34 = vpop.eup %8598 }
0x1f51   :  { %v7094_v21 = vmul.f32 %v8599_v34, %v7078_v55 }
0x1f53   :  { %v7100_v18 = vmul.f32 %v7596_v5, %v7094_v21 }
0x1f54   :  { %v8601_v30 = vpop.eup %8600 }
0x1f55   :  { %v7095_v31 = vmul.f32 %v8601_v30, %v7079_v60  ;;  %v7106_v10 = vadd.f32 %v7597_v26, %v7100_v18 }
0x1f57   :  { %v7101_v33 = vmul.f32 %v7596_v5, %v7095_v31  ;;  %8414 = vmatprep.mubr.msk.f32.mxu1 %vm105_vm0, %v7106_v10 }
0x1f59   :  { %v7107_v20 = vadd.f32 %v7597_v26, %v7101_v33 }
0x1f5b   :  { %8415 = vmatmul.mubr.msk.f32.vlgmr.msra.gmra.mxu1 %vm105_vm0, %v7107_v20 }
0x201b   :  { %v8416_v38 = vpop.f32.mrf.mxu1 }
0x201c   :  { %v7199_v48 = vadd.f32 %v8416_v38, %v7603_v37 }
0x201d   :  { %v7193_v13 = vpop.f32.mrf.mxu1 }
0x201e   :  { %v7194_v15 = vadd.f32 %v7603_v37, %v7193_v13  ;;  %v7203_v45 = vmax.f32 %v7199_v48, 0.0 }
0x2020   :  { %v7202_v49 = vmax.f32 %v7194_v15, 0.0 }
0x2022   :  { %8433 = vmatprep.mubr.msk.f32.mxu0 %vm3612_vm9, %v7202_v49 }
0x2023   :  { %8434 = vmatmul.mubr.msk.f32.vlgmr.msra.gmra.mxu0 %vm3612_vm9, %v7203_v45 }
0x20e3   :  { %v8435_v46 = vpop.f32.mrf.mxu0 }
0x20e4   :  { %v7295_v35 = vadd.f32 %v8435_v46, %v10171_v54 }
0x20e5   :  { %v7285_v22 = vpop.f32.mrf.mxu0 }
0x20e6   :  { %v7305_v27 = vadd.f32 %v7617_v25, %v7295_v35  ;;  %v7294_v42 = vadd.f32 %v7285_v22, %v10174_v36 }
0x20e8   :  { %v7304_v51 = vadd.f32 %v7617_v25, %v7294_v42  ;;  %v7311_v24 = vsel %vm105_vm0, %v7305_v27, 0.0 }
0x20e9   :  { %7312 = vadd.xlane.f32.xlu1 %v7311_v24 }
0x20ea   :  { %v7308_v50 = vsel %vm105_vm0, %v7304_v51, 0.0 }
0x20eb   :  { %7309 = vadd.xlane.f32.xlu0 %v7308_v50 }
0x2172   :  { %v7313_v43 = vpop.xlane.xlu1 %7312 }
0x2173   :  { %v7315_v16 = vmul.f32 0.03125, %v7313_v43 }
0x2174   :  { %v7310_v44 = vpop.xlane.xlu0 %7309 }
0x2175   :  { %v7317_v53 = vsub.f32 %v7305_v27, %v7315_v16  ;;  %v7314_v1 = vmul.f32 0.03125, %v7310_v44 }
0x2177   :  { %v7316_v32 = vsub.f32 %v7304_v51, %v7314_v1  ;;  %v7319_v52 = vmul.f32 %v7317_v53, %v7317_v53 }
0x2179   :  { %v7323_v54 = vsel %vm105_vm0, %v7319_v52, 0.0  ;;  %v7318_v6 = vmul.f32 %v7316_v32, %v7316_v32 }
0x217a   :  { %7324 = vadd.xlane.f32.xlu1 %v7323_v54 }
0x217b   :  { %v7320_v36 = vsel %vm105_vm0, %v7318_v6, 0.0 }
0x217c   :  { %7321 = vadd.xlane.f32.xlu0 %v7320_v36 }
0x217d   :  { %8621 = shalt.err (!%p8618_p4)
}
0x217e   :  { %s8685_s8 = smov 128   ;;  %s8686_s3 = smov [#allocation6]  }
0x217f   :  { %7375 = dma.vmem_to_hbm [thread:$0]  %s7370_s18, 2048, %s10290_s22, [#allocation5], %s8685_s8, %s8685_s8, %s10337_s4  }
0x2180   :  { %s7381_s12 = sshll.u32 %s8686_s3, 4  ;;  %s7382_s12 = int_to_ptr.vmem [resolvable:$true] %s7381_s12 }
0x2181   :  { %s8630_s11 = scalar_lea.vmem %s7382_s12, 2048  ;;  %p8635_p6 = scmp.lt.s32.totalorder %s7382_s12, %s7382_s12 }
0x2182   :  { %p8631_p5 = scmp.ne.s32.totalorder %s7382_s12, %s8630_s11  ;;  %p8636_p7 = scmp.lt.s32.totalorder %s8630_s11, %s8630_s11 }
0x2184   :  { %p8637_p8 = por %p8636_p7, %p8635_p6 }
0x2186   :  { %p8638_p9 = pnand %p8637_p8, %p8631_p5 }
0x2188   :  { %8641 = shalt.err (!%p8638_p9)
}
0x2189   :  { %7387 = dma.vmem_to_hbm [thread:$0]  %s7382_s12, 2048, %s10291_s23, [#allocation5], %s8685_s8, %s8685_s8, %s10337_s4  }
0x218a   :  { %s10343_s24 = sld [smem:[#allocation17_spill]]  ;;  %s8687_s23 = smov [#allocation2]  }
0x218b   :  { %s10344_s26 = sld [smem:[#allocation18_spill]]  ;;  %s7357_s29 = sshll.u32 %s8687_s23, 4  ;;  %s7358_s29 = int_to_ptr.vmem [resolvable:$true] %s7357_s29 }
0x218c   :  { %s8650_s20 = scalar_lea.vmem %s7358_s29, 256  ;;  %p8655_p11 = scmp.lt.s32.totalorder %s7358_s29, %s7358_s29 }
0x218d   :  { %p8651_p10 = scmp.ne.s32.totalorder %s7358_s29, %s8650_s20  ;;  %p8656_p12 = scmp.lt.s32.totalorder %s8650_s20, %s8650_s20 }
0x218f   :  { %p8657_p13 = por %p8656_p12, %p8655_p11 }
0x2190   :  { %v7618_v62 = vld [vmem:[%s10343_s24] ss:$0 sm:$0xff] }
0x2191   :  { %v7619_v58 = vld [vmem:[%s10344_s26] ss:$0 sm:$0xff]  ;;  %p8658_p0 = pnand %p8657_p13, %p8651_p10 }
0x2203   :  { %v7325_v29 = vpop.xlane.xlu1 %7324 }
0x2204   :  { %v7327_v28 = vmul.f32 0.03125, %v7325_v29 }
0x2205   :  { %v7322_v39 = vpop.xlane.xlu0 %7321 }
0x2206   :  { %v7329_v59 = vadd.f32 1e-05, %v7327_v28  ;;  %v7326_v60 = vmul.f32 0.03125, %v7322_v39 }
0x2208   :  { %8602 = vrsqrt.f32 %v7329_v59  ;;  %v7328_v55 = vadd.f32 1e-05, %v7326_v60 }
0x220a   :  { %8604 = vrsqrt.f32 %v7328_v55 }
0x2215   :  { %v8603_v23 = vpop.eup %8602 }
0x2216   :  { %v7333_v57 = vmul.f32 %v8603_v23, %v7317_v53 }
0x2217   :  { %v8605_v9 = vpop.eup %8604 }
0x2218   :  { %v7332_v63 = vmul.f32 %v8605_v9, %v7316_v32  ;;  %v7341_v19 = vmul.f32 %v7618_v62, %v7333_v57 }
0x221a   :  { %v7340_v56 = vmul.f32 %v7618_v62, %v7332_v63  ;;  %v7349_v3 = vadd.f32 %v7619_v58, %v7341_v19 }
0x221c   :  { %v7348_v4 = vadd.f32 %v7619_v58, %v7340_v56  ;;  %7351 = vst.msk [vmem:[#allocation2 + $0x8] sm:$0xff] %vm105_vm0, %v7349_v3 }
0x221e   :  { %7350 = vst.msk [vmem:[#allocation2] sm:$0xff] %vm105_vm0, %v7348_v4 }
0x221f   :  { %8661 = shalt.err (!%p8658_p0)
}
0x2220   :  { %s10345_s30 = sld [smem:[#allocation19_spill]] }
0x2226   :  { %7363 = dma.vmem_to_hbm [thread:$0]  %s7358_s29, 256, %s10345_s30, [#allocation3], %s8685_s8, %s8685_s8, %s10337_s4  }
0x2227   :  { %8670 = dma.done.wait [#allocation3], 256  }
0x2228   :  { %8671 = vsyncadd [#allocation3], 4294967040 }
0x2229   :  { %8672 = dma.done.wait [#allocation5], 4096  }
0x222a   :  { %8673 = vsyncadd [#allocation5], 4294963200 }
0x222b   :  { %7397 = vsyncpa [#allocation3], 1 }
0x222c   :  { %7398 = vsyncpa [#allocation5], 1 }

</bundles_post_ra>
